<compile_context>
chip_gen: v7x
topology: tpu7x:2x2x1
jax: 0.10.0
libtpu: 0.0.40
codegen_flags: <defaults>
</compile_context>

<pallas_src>
import jax
import jax.numpy as jnp
from jax import lax
from jax.experimental import pallas as pl
from jax.experimental.pallas import tpu as pltpu


# --------------------------------------------------------------------------
# kernel
# --------------------------------------------------------------------------
def _make_kernel(num_layers, hidden_dim, seq_len):
    L, H, T = num_layers, hidden_dim, seq_len
    # Partial unroll keeps LLO scheduler visibility without blowing vreg
    # pressure at large T.
    unroll = True if T <= 16 else 4

    def kernel(x_ref, xs_ref, *rest):
        # rest = [Wih_l, Whh_l, b_l]*L, W1_h, W1_s, b1, W2, b2, out_ref,
        #        gates_sc, hseq_sc
        layer_refs = rest[: 3 * L]
        (w1h_ref, w1s_ref, b1_ref, w2_ref, b2_ref,
         out_ref, gates_sc, hseq_sc) = rest[3 * L:]

        b_blk = x_ref.shape[1]
        h_top = None

        for l in range(L):
            wih_ref = layer_refs[3 * l]
            whh_ref = layer_refs[3 * l + 1]
            b_ref = layer_refs[3 * l + 2]
            in_l = wih_ref.shape[0]

            # (1) input->gate projection for ALL timesteps as one MXU matmul,
            #     bias folded in (single broadcast per layer, outside the loop).
            if l == 0:
                inp_seq = x_ref[...].astype(jnp.float32).reshape(T * b_blk, in_l)
            else:
                inp_seq = hseq_sc[...].reshape(T * b_blk, in_l)
            gates_pre = (
                jnp.dot(inp_seq, wih_ref[...], preferred_element_type=jnp.float32)
                + b_ref[...]
            )
            gates_sc[...] = gates_pre.reshape(T, b_blk, 4 * H)

            # (2) recurrence: only h @ Whh + elementwise on the serial path.
            #     Whh is streamed from VMEM each step (no hoisted weight values
            #     holding vregs across the whole loop).
            last_layer = (l == L - 1)

            def step(t, carry, whh_ref=whh_ref, last_layer=last_layer):
                h_prev, c_prev = carry
                gates = gates_sc[t] + jnp.dot(
                    h_prev, whh_ref[...], preferred_element_type=jnp.float32)
                # gate lane order [i, f, o, g] (packed in the wrapper):
                # one wide sigmoid over 3H lanes + one tanh over H lanes.
                sig = jax.nn.sigmoid(gates[:, : 3 * H])
                i_g = sig[:, 0 * H:1 * H]
                f_g = sig[:, 1 * H:2 * H]
                o_g = sig[:, 2 * H:3 * H]
                g_g = jnp.tanh(gates[:, 3 * H:])
                c_n = f_g * c_prev + i_g * g_g
                h_n = o_g * jnp.tanh(c_n)
                if not last_layer:
                    hseq_sc[t] = h_n          # feeds next layer's precompute
                return (h_n, c_n)

            zero = jnp.zeros((b_blk, H), jnp.float32)
            h_l, _ = lax.fori_loop(0, T, step, (zero, zero), unroll=unroll)
            h_top = h_l

        # classifier head fused in: fc1 split as [W1_h | W1_static] so no lane
        # concat of (h, static) is needed; output is a lane-dense 128 slab.
        xs = xs_ref[...].astype(jnp.float32)
        z = jnp.maximum(
            jnp.dot(h_top, w1h_ref[...], preferred_element_type=jnp.float32)
            + jnp.dot(xs, w1s_ref[...], preferred_element_type=jnp.float32)
            + b1_ref[...],
            0.0,
        )
        out = (jnp.dot(z, w2_ref[...], preferred_element_type=jnp.float32)
               + b2_ref[...])
        out_ref[...] = out.astype(out_ref.dtype)

    return kernel


# --------------------------------------------------------------------------
# weight packing (wrapper-side layout plumbing)
# --------------------------------------------------------------------------
def _pack_params(raw):
    """Repack PyTorch-layout params for the kernel.

    - Reorder LSTM gate rows from PyTorch [i, f, g, o] to [i, f, o, g].
    - Transpose Wih -> (in_l, 4H), Whh -> (H, 4H); combine b_ih + b_hh.
    - Split fc1 weight into the h-part (H, 128) and static-part (S, 128).
    - fc_final weight/bias padded to a lane-dense 128-wide output slab.
    """
    packed = {"lstm": []}
    for (w_ih, w_hh, b_ih, b_hh) in raw["lstm"]:
        H = w_hh.shape[1]
        perm = jnp.concatenate(
            [jnp.arange(0, 2 * H),          # i, f
             jnp.arange(3 * H, 4 * H),      # o
             jnp.arange(2 * H, 3 * H)]      # g
        )
        wih_t = w_ih[perm].T                                     # (in_l, 4H)
        whh_t = w_hh[perm].T                                     # (H, 4H)
        b = (b_ih + b_hh)[perm].reshape(1, 4 * H)
        packed["lstm"].append((wih_t, whh_t, b))

    H = raw["lstm"][0][1].shape[1]
    w1, b1 = raw["fc1"]
    w1_t = w1.T                                                  # (H+S, 128)
    packed["fc1"] = (w1_t[:H], w1_t[H:], b1.reshape(1, -1))

    w2, b2 = raw["fc_final"]
    out_dim = w2.shape[0]
    out_pad = max(128, ((out_dim + 127) // 128) * 128)
    w2_pad = jnp.zeros((w2.shape[1], out_pad), jnp.float32).at[:, :out_dim].set(w2.T)
    b2_pad = jnp.zeros((1, out_pad), jnp.float32).at[:, :out_dim].set(b2.reshape(1, -1))
    packed["fc_final"] = (w2_pad, b2_pad)
    return packed


def _pick_batch_block(B):
    """Return (b_blk, nb).  Batch padded to >= 8 sublanes; nb=1 (single big
    block: the grid is a sequential loop on 1-TC chips) unless B is large, in
    which case nb=2 lets v7x's two TensorCores each take half the batch."""
    B_pad = max(8, -(-B // 8) * 8)
    if B_pad >= 512:
        half = -(-(B_pad // 2) // 8) * 8
        return half, 2
    return B_pad, 1


def _padded_bytes(shape, itemsize=4):
    s = list(shape)
    s[-1] = -(-s[-1] // 128) * 128
    if len(s) >= 2:
        s[-2] = -(-s[-2] // 8) * 8
    n = 1
    for d in s:
        n *= d
    return n * itemsize


def _const_specs(arrays, single_buffer):
    """Full-array BlockSpecs for grid-invariant operands (weights/biases)."""
    specs = []
    for a in arrays:
        idx = (lambda nd: (lambda i: (0,) * nd))(a.ndim)
        if single_buffer:
            # constant index_map -> double buffering only wastes VMEM
            specs.append(pl.BlockSpec(a.shape, idx, pipeline_mode=pl.Buffered(1)))
        else:
            specs.append(pl.BlockSpec(a.shape, idx))
    return specs


# --------------------------------------------------------------------------
# wrapper
# --------------------------------------------------------------------------
def lstm_classifier_pallas(x_ts, x_static, raw_params):
    """x_ts: (B, T, D) batch_first, x_static: (B, S). Returns (B, output_dim)."""
    B, T, D = x_ts.shape
    S = x_static.shape[1]

    packed = _pack_params(raw_params)
    lstm_p = packed["lstm"]
    L = len(lstm_p)
    H = lstm_p[0][1].shape[0]
    w1_h, w1_s, b1 = packed["fc1"]
    w2_pad, b2_pad = packed["fc_final"]
    out_dim = raw_params["fc_final"][0].shape[0]
    out_pad = w2_pad.shape[1]

    # pad the batch to a sublane multiple so recurrent matmuls have an
    # MXU-friendly M and layout collapses are clean.
    b_blk, nb = _pick_batch_block(B)
    B_pad = b_blk * nb
    if B_pad != B:
        x_ts = jnp.pad(x_ts, ((0, B_pad - B), (0, 0), (0, 0)))
        x_static = jnp.pad(x_static, ((0, B_pad - B), (0, 0)))

    x_tm = jnp.transpose(x_ts, (1, 0, 2))            # time-major (T, B_pad, D)

    flat_lstm = [w for layer in lstm_p for w in layer]
    tail = [w1_h, w1_s, b1, w2_pad, b2_pad]
    const_inputs = flat_lstm + tail
    inputs = [x_tm, x_static] + const_inputs

    kernel = _make_kernel(L, H, T)

    # VMEM budget: pipelined IO blocks (x2 buffers) + weights (x2 worst case)
    # + scratch, with headroom; clamped to v7x's 64 MiB physical VMEM.
    io_blocks = [(T, b_blk, D), (b_blk, S), (b_blk, out_pad)]
    scratch_list = [(T, b_blk, 4 * H), (T, b_blk, H)]
    footprint = (2 * sum(_padded_bytes(s) for s in io_blocks)
                 + 2 * sum(_padded_bytes(a.shape) for a in const_inputs)
                 + sum(_padded_bytes(s) for s in scratch_list))
    vmem_limit = int(min(max(2 * footprint + (4 << 20), 32 << 20), 64 << 20))

    def run(single_buffer_weights):
        in_specs = [
            pl.BlockSpec((T, b_blk, D), lambda i: (0, i, 0)),
            pl.BlockSpec((b_blk, S), lambda i: (i, 0)),
        ] + _const_specs(const_inputs, single_buffer_weights)

        return pl.pallas_call(
            kernel,
            out_shape=jax.ShapeDtypeStruct((B_pad, out_pad), jnp.float32),
            grid_spec=pltpu.PrefetchScalarGridSpec(
                num_scalar_prefetch=0,
                grid=(nb,),
                in_specs=in_specs,
                out_specs=pl.BlockSpec((b_blk, out_pad), lambda i: (i, 0)),
                scratch_shapes=[
                    pltpu.VMEM((T, b_blk, 4 * H), jnp.float32),  # gate precompute
                    pltpu.VMEM((T, b_blk, H), jnp.float32),      # per-layer h sequence
                ],
            ),
            compiler_params=pltpu.CompilerParams(
                dimension_semantics=("parallel",),   # batch shards -> 2 TCs on v7x
                vmem_limit_bytes=vmem_limit,
            ),
        )(*inputs)

    try:
        out = run(True)
    except Exception:
        # pipeline_mode=pl.Buffered(1) not accepted by this build; fall back to
        # default (double-buffered) weight specs — costs only a few KB here.
        out = run(False)

    return out[:B, :out_dim]


# --------------------------------------------------------------------------
# pure-JAX reference (mirrors PyTorch forward on the raw params)
# --------------------------------------------------------------------------
def lstm_classifier_ref(x_ts, x_static, raw_params):
    B = x_ts.shape[0]
    inp = x_ts                                   # (B, T, D)
    h = None
    for (w_ih, w_hh, b_ih, b_hh) in raw_params["lstm"]:
        H = w_hh.shape[1]

        def step(carry, xt, w_ih=w_ih, w_hh=w_hh, b_ih=b_ih, b_hh=b_hh, H=H):
            h, c = carry
            gates = xt @ w_ih.T + h @ w_hh.T + b_ih + b_hh
            i = jax.nn.sigmoid(gates[:, 0 * H:1 * H])
            f = jax.nn.sigmoid(gates[:, 1 * H:2 * H])
            g = jnp.tanh(gates[:, 2 * H:3 * H])
            o = jax.nn.sigmoid(gates[:, 3 * H:4 * H])
            c = f * c + i * g
            h = o * jnp.tanh(c)
            return (h, c), h

        init = (jnp.zeros((B, H), jnp.float32), jnp.zeros((B, H), jnp.float32))
        (h, _), hs = lax.scan(step, init, jnp.transpose(inp, (1, 0, 2)))
        inp = jnp.transpose(hs, (1, 0, 2))

    w1, b1 = raw_params["fc1"]
    w2, b2 = raw_params["fc_final"]
    z = jnp.maximum(jnp.concatenate([h, x_static], axis=1) @ w1.T + b1, 0.0)
    return z @ w2.T + b2


# --------------------------------------------------------------------------
# param init (PyTorch-style layout, PyTorch gate order [i, f, g, o])
# --------------------------------------------------------------------------
def init_params(key, ts_input_dim, static_input_dim, hidden_dim, output_dim, num_layers):
    params = {"lstm": []}
    scale = 1.0 / jnp.sqrt(hidden_dim)
    for l in range(num_layers):
        in_l = ts_input_dim if l == 0 else hidden_dim
        key, k1, k2, k3, k4 = jax.random.split(key, 5)
        w_ih = jax.random.uniform(k1, (4 * hidden_dim, in_l), jnp.float32, -scale, scale)
        w_hh = jax.random.uniform(k2, (4 * hidden_dim, hidden_dim), jnp.float32, -scale, scale)
        b_ih = jax.random.uniform(k3, (4 * hidden_dim,), jnp.float32, -scale, scale)
        b_hh = jax.random.uniform(k4, (4 * hidden_dim,), jnp.float32, -scale, scale)
        params["lstm"].append((w_ih, w_hh, b_ih, b_hh))

    key, k1, k2, k3, k4 = jax.random.split(key, 5)
    fc1_in = hidden_dim + static_input_dim
    s1 = 1.0 / jnp.sqrt(fc1_in)
    w1 = jax.random.uniform(k1, (128, fc1_in), jnp.float32, -s1, s1)
    b1 = jax.random.uniform(k2, (128,), jnp.float32, -s1, s1)
    s2 = 1.0 / jnp.sqrt(128.0)
    w2 = jax.random.uniform(k3, (output_dim, 128), jnp.float32, -s2, s2)
    b2 = jax.random.uniform(k4, (output_dim,), jnp.float32, -s2, s2)
    params["fc1"] = (w1, b1)
    params["fc_final"] = (w2, b2)
    return params


if __name__ == "__main__":
    # small, deterministic example shapes
    B, T = 2, 8
    ts_input_dim, static_input_dim = 8, 4
    lstm_hidden_dim, output_dim, lstm_num_layers = 32, 3, 2

    key = jax.random.PRNGKey(0)
    key, kx, ks = jax.random.split(key, 3)
    x_ts = jax.random.normal(kx, (B, T, ts_input_dim), jnp.float32)
    x_static = jax.random.normal(ks, (B, static_input_dim), jnp.float32)

    params = init_params(
        key, ts_input_dim, static_input_dim, lstm_hidden_dim, output_dim, lstm_num_layers
    )

    out = lstm_classifier_pallas(x_ts, x_static, params)
    out = jax.block_until_ready(out)

    ref = jax.block_until_ready(lstm_classifier_ref(x_ts, x_static, params))
    assert out.shape == (B, output_dim)
    assert jnp.allclose(out, ref, atol=1e-2, rtol=1e-2), (out, ref)

    print("KERNEL_OK")
</pallas_src>

<mosaic_0001>
module attributes {stable_mosaic.version = 11 : i64} {
  func.func @kernel(%arg0: i32, %arg1: memref<8x8x8xf32, #tpu.memory_space<vmem>>, %arg2: memref<8x4xf32, #tpu.memory_space<vmem>>, %arg3: memref<8x128xf32, #tpu.memory_space<vmem>>, %arg4: memref<32x128xf32, #tpu.memory_space<vmem>>, %arg5: memref<1x128xf32, #tpu.memory_space<vmem>>, %arg6: memref<32x128xf32, #tpu.memory_space<vmem>>, %arg7: memref<32x128xf32, #tpu.memory_space<vmem>>, %arg8: memref<1x128xf32, #tpu.memory_space<vmem>>, %arg9: memref<32x128xf32, #tpu.memory_space<vmem>>, %arg10: memref<4x128xf32, #tpu.memory_space<vmem>>, %arg11: memref<1x128xf32, #tpu.memory_space<vmem>>, %arg12: memref<128x128xf32, #tpu.memory_space<vmem>>, %arg13: memref<1x128xf32, #tpu.memory_space<vmem>>, %arg14: memref<8x128xf32, #tpu.memory_space<vmem>>, %arg15: memref<8x8x128xf32, #tpu.memory_space<vmem>>, %arg16: memref<8x8x32xf32, #tpu.memory_space<vmem>>) attributes {dimension_semantics = [#tpu.dimension_semantics<parallel>], iteration_bounds = array<i64: 1>, scalar_prefetch = 0 : i64, scratch_operands = 2 : i64, tpu.core_type = #tpu.core_type<tc>, window_params = [{transform_indices = @transform_0, window_bounds = array<i64: 8, 8, 8>}, {transform_indices = @transform_1, window_bounds = array<i64: 8, 4>}, {pipeline_mode = #tpu.pipeline_mode<synchronous>, transform_indices = @transform_2, window_bounds = array<i64: 8, 128>}, {pipeline_mode = #tpu.pipeline_mode<synchronous>, transform_indices = @transform_3, window_bounds = array<i64: 32, 128>}, {pipeline_mode = #tpu.pipeline_mode<synchronous>, transform_indices = @transform_4, window_bounds = array<i64: 1, 128>}, {pipeline_mode = #tpu.pipeline_mode<synchronous>, transform_indices = @transform_5, window_bounds = array<i64: 32, 128>}, {pipeline_mode = #tpu.pipeline_mode<synchronous>, transform_indices = @transform_6, window_bounds = array<i64: 32, 128>}, {pipeline_mode = #tpu.pipeline_mode<synchronous>, transform_indices = @transform_7, window_bounds = array<i64: 1, 128>}, {pipeline_mode = #tpu.pipeline_mode<synchronous>, transform_indices = @transform_8, window_bounds = array<i64: 32, 128>}, {pipeline_mode = #tpu.pipeline_mode<synchronous>, transform_indices = @transform_9, window_bounds = array<i64: 4, 128>}, {pipeline_mode = #tpu.pipeline_mode<synchronous>, transform_indices = @transform_10, window_bounds = array<i64: 1, 128>}, {pipeline_mode = #tpu.pipeline_mode<synchronous>, transform_indices = @transform_11, window_bounds = array<i64: 128, 128>}, {pipeline_mode = #tpu.pipeline_mode<synchronous>, transform_indices = @transform_12, window_bounds = array<i64: 1, 128>}, {transform_indices = @transform_13, window_bounds = array<i64: 8, 128>}]} {
    %c0 = arith.constant 0 : index
    %c0_0 = arith.constant 0 : index
    %c0_1 = arith.constant 0 : index
    %0 = vector.load %arg1[%c0, %c0_0, %c0_1] : memref<8x8x8xf32, #tpu.memory_space<vmem>>, vector<8x8x8xf32>
    %1 = vector.shape_cast %0 : vector<8x8x8xf32> to vector<64x8xf32>
    %c0_2 = arith.constant 0 : index
    %c0_3 = arith.constant 0 : index
    %2 = vector.load %arg3[%c0_2, %c0_3] : memref<8x128xf32, #tpu.memory_space<vmem>>, vector<8x128xf32>
    %cst = arith.constant dense<0.000000e+00> : vector<64x128xf32>
    %3 = tpu.matmul %1, %2, %cst {dimension_numbers = #tpu.dot_dimension_numbers<[1], [0], [0], [1], [0, 0, 1, 1], [], []>} : vector<64x8xf32>, vector<8x128xf32>, vector<64x128xf32> -> vector<64x128xf32>
    %c0_4 = arith.constant 0 : index
    %c0_5 = arith.constant 0 : index
    %4 = vector.load %arg5[%c0_4, %c0_5] : memref<1x128xf32, #tpu.memory_space<vmem>>, vector<1x128xf32>
    %5 = vector.broadcast %4 : vector<1x128xf32> to vector<64x128xf32>
    %6 = arith.addf %3, %5 : vector<64x128xf32>
    %7 = vector.shape_cast %6 : vector<64x128xf32> to vector<8x8x128xf32>
    %c0_6 = arith.constant 0 : index
    %c0_7 = arith.constant 0 : index
    %c0_8 = arith.constant 0 : index
    %8 = vector.load %arg15[%c0_6, %c0_7, %c0_8] : memref<8x8x128xf32, #tpu.memory_space<vmem>>, vector<8x8x128xf32>
    tpu.vector_store %arg15[%c0_6, %c0_7, %c0_8], %7 {strides = array<i32>} : memref<8x8x128xf32, #tpu.memory_space<vmem>>, vector<8x8x128xf32>,
    %cst_9 = arith.constant 0.000000e+00 : f32
    %9 = vector.broadcast %cst_9 : f32 to vector<8x32xf32>
    %c0_i32 = arith.constant 0 : i32
    %10 = arith.index_cast %c0_i32 : i32 to index
    %c0_10 = arith.constant 0 : index
    %c0_11 = arith.constant 0 : index
    %11 = vector.load %arg15[%10, %c0_10, %c0_11] : memref<8x8x128xf32, #tpu.memory_space<vmem>>, vector<1x8x128xf32>
    %12 = vector.shape_cast %11 : vector<1x8x128xf32> to vector<8x128xf32>
    %c0_12 = arith.constant 0 : index
    %c0_13 = arith.constant 0 : index
    %13 = vector.load %arg4[%c0_12, %c0_13] : memref<32x128xf32, #tpu.memory_space<vmem>>, vector<32x128xf32>
    %cst_14 = arith.constant dense<0.000000e+00> : vector<8x128xf32>
    %14 = tpu.matmul %9, %13, %cst_14 {dimension_numbers = #tpu.dot_dimension_numbers<[1], [0], [0], [1], [0, 0, 1, 1], [], []>} : vector<8x32xf32>, vector<32x128xf32>, vector<8x128xf32> -> vector<8x128xf32>
    %15 = arith.addf %12, %14 : vector<8x128xf32>
    %16 = vector.extract_strided_slice %15 {offsets = [0, 0], sizes = [8, 96], strides = [1, 1]} : vector<8x128xf32> to vector<8x96xf32>
    %17 = arith.negf %16 : vector<8x96xf32>
    %18 = math.exp %17 : vector<8x96xf32>
    %cst_15 = arith.constant 1.000000e+00 : f32
    %19 = vector.broadcast %cst_15 : f32 to vector<8x96xf32>
    %20 = arith.addf %19, %18 : vector<8x96xf32>
    %21 = arith.divf %19, %20 : vector<8x96xf32>
    %22 = vector.extract_strided_slice %21 {offsets = [0, 0], sizes = [8, 32], strides = [1, 1]} : vector<8x96xf32> to vector<8x32xf32>
    %23 = vector.extract_strided_slice %21 {offsets = [0, 32], sizes = [8, 32], strides = [1, 1]} : vector<8x96xf32> to vector<8x32xf32>
    %24 = vector.extract_strided_slice %21 {offsets = [0, 64], sizes = [8, 32], strides = [1, 1]} : vector<8x96xf32> to vector<8x32xf32>
    %25 = vector.extract_strided_slice %15 {offsets = [0, 96], sizes = [8, 32], strides = [1, 1]} : vector<8x128xf32> to vector<8x32xf32>
    %26 = math.tanh %25 : vector<8x32xf32>
    %27 = arith.mulf %23, %9 : vector<8x32xf32>
    %28 = arith.mulf %22, %26 : vector<8x32xf32>
    %29 = arith.addf %27, %28 : vector<8x32xf32>
    %30 = math.tanh %29 : vector<8x32xf32>
    %31 = arith.mulf %24, %30 : vector<8x32xf32>
    %32 = arith.index_cast %c0_i32 : i32 to index
    %c0_16 = arith.constant 0 : index
    %c0_17 = arith.constant 0 : index
    %33 = vector.load %arg16[%32, %c0_16, %c0_17] : memref<8x8x32xf32, #tpu.memory_space<vmem>>, vector<1x8x32xf32>
    %34 = vector.shape_cast %33 : vector<1x8x32xf32> to vector<8x32xf32>
    %35 = vector.shape_cast %31 : vector<8x32xf32> to vector<1x8x32xf32>
    tpu.vector_store %arg16[%32, %c0_16, %c0_17], %35 {strides = array<i32>} : memref<8x8x32xf32, #tpu.memory_space<vmem>>, vector<1x8x32xf32>,
    %c1_i32 = arith.constant 1 : i32
    %36 = arith.index_cast %c1_i32 : i32 to index
    %c0_18 = arith.constant 0 : index
    %c0_19 = arith.constant 0 : index
    %37 = vector.load %arg15[%36, %c0_18, %c0_19] : memref<8x8x128xf32, #tpu.memory_space<vmem>>, vector<1x8x128xf32>
    %38 = vector.shape_cast %37 : vector<1x8x128xf32> to vector<8x128xf32>
    %c0_20 = arith.constant 0 : index
    %c0_21 = arith.constant 0 : index
    %39 = vector.load %arg4[%c0_20, %c0_21] : memref<32x128xf32, #tpu.memory_space<vmem>>, vector<32x128xf32>
    %cst_22 = arith.constant dense<0.000000e+00> : vector<8x128xf32>
    %40 = tpu.matmul %31, %39, %cst_22 {dimension_numbers = #tpu.dot_dimension_numbers<[1], [0], [0], [1], [0, 0, 1, 1], [], []>} : vector<8x32xf32>, vector<32x128xf32>, vector<8x128xf32> -> vector<8x128xf32>
    %41 = arith.addf %38, %40 : vector<8x128xf32>
    %42 = vector.extract_strided_slice %41 {offsets = [0, 0], sizes = [8, 96], strides = [1, 1]} : vector<8x128xf32> to vector<8x96xf32>
    %43 = arith.negf %42 : vector<8x96xf32>
    %44 = math.exp %43 : vector<8x96xf32>
    %cst_23 = arith.constant 1.000000e+00 : f32
    %45 = vector.broadcast %cst_23 : f32 to vector<8x96xf32>
    %46 = arith.addf %45, %44 : vector<8x96xf32>
    %47 = arith.divf %45, %46 : vector<8x96xf32>
    %48 = vector.extract_strided_slice %47 {offsets = [0, 0], sizes = [8, 32], strides = [1, 1]} : vector<8x96xf32> to vector<8x32xf32>
    %49 = vector.extract_strided_slice %47 {offsets = [0, 32], sizes = [8, 32], strides = [1, 1]} : vector<8x96xf32> to vector<8x32xf32>
    %50 = vector.extract_strided_slice %47 {offsets = [0, 64], sizes = [8, 32], strides = [1, 1]} : vector<8x96xf32> to vector<8x32xf32>
    %51 = vector.extract_strided_slice %41 {offsets = [0, 96], sizes = [8, 32], strides = [1, 1]} : vector<8x128xf32> to vector<8x32xf32>
    %52 = math.tanh %51 : vector<8x32xf32>
    %53 = arith.mulf %49, %29 : vector<8x32xf32>
    %54 = arith.mulf %48, %52 : vector<8x32xf32>
    %55 = arith.addf %53, %54 : vector<8x32xf32>
    %56 = math.tanh %55 : vector<8x32xf32>
    %57 = arith.mulf %50, %56 : vector<8x32xf32>
    %58 = arith.index_cast %c1_i32 : i32 to index
    %c0_24 = arith.constant 0 : index
    %c0_25 = arith.constant 0 : index
    %59 = vector.load %arg16[%58, %c0_24, %c0_25] : memref<8x8x32xf32, #tpu.memory_space<vmem>>, vector<1x8x32xf32>
    %60 = vector.shape_cast %59 : vector<1x8x32xf32> to vector<8x32xf32>
    %61 = vector.shape_cast %57 : vector<8x32xf32> to vector<1x8x32xf32>
    tpu.vector_store %arg16[%58, %c0_24, %c0_25], %61 {strides = array<i32>} : memref<8x8x32xf32, #tpu.memory_space<vmem>>, vector<1x8x32xf32>,
    %c2_i32 = arith.constant 2 : i32
    %62 = arith.index_cast %c2_i32 : i32 to index
    %c0_26 = arith.constant 0 : index
    %c0_27 = arith.constant 0 : index
    %63 = vector.load %arg15[%62, %c0_26, %c0_27] : memref<8x8x128xf32, #tpu.memory_space<vmem>>, vector<1x8x128xf32>
    %64 = vector.shape_cast %63 : vector<1x8x128xf32> to vector<8x128xf32>
    %c0_28 = arith.constant 0 : index
    %c0_29 = arith.constant 0 : index
    %65 = vector.load %arg4[%c0_28, %c0_29] : memref<32x128xf32, #tpu.memory_space<vmem>>, vector<32x128xf32>
    %cst_30 = arith.constant dense<0.000000e+00> : vector<8x128xf32>
    %66 = tpu.matmul %57, %65, %cst_30 {dimension_numbers = #tpu.dot_dimension_numbers<[1], [0], [0], [1], [0, 0, 1, 1], [], []>} : vector<8x32xf32>, vector<32x128xf32>, vector<8x128xf32> -> vector<8x128xf32>
    %67 = arith.addf %64, %66 : vector<8x128xf32>
    %68 = vector.extract_strided_slice %67 {offsets = [0, 0], sizes = [8, 96], strides = [1, 1]} : vector<8x128xf32> to vector<8x96xf32>
    %69 = arith.negf %68 : vector<8x96xf32>
    %70 = math.exp %69 : vector<8x96xf32>
    %cst_31 = arith.constant 1.000000e+00 : f32
    %71 = vector.broadcast %cst_31 : f32 to vector<8x96xf32>
    %72 = arith.addf %71, %70 : vector<8x96xf32>
    %73 = arith.divf %71, %72 : vector<8x96xf32>
    %74 = vector.extract_strided_slice %73 {offsets = [0, 0], sizes = [8, 32], strides = [1, 1]} : vector<8x96xf32> to vector<8x32xf32>
    %75 = vector.extract_strided_slice %73 {offsets = [0, 32], sizes = [8, 32], strides = [1, 1]} : vector<8x96xf32> to vector<8x32xf32>
    %76 = vector.extract_strided_slice %73 {offsets = [0, 64], sizes = [8, 32], strides = [1, 1]} : vector<8x96xf32> to vector<8x32xf32>
    %77 = vector.extract_strided_slice %67 {offsets = [0, 96], sizes = [8, 32], strides = [1, 1]} : vector<8x128xf32> to vector<8x32xf32>
    %78 = math.tanh %77 : vector<8x32xf32>
    %79 = arith.mulf %75, %55 : vector<8x32xf32>
    %80 = arith.mulf %74, %78 : vector<8x32xf32>
    %81 = arith.addf %79, %80 : vector<8x32xf32>
    %82 = math.tanh %81 : vector<8x32xf32>
    %83 = arith.mulf %76, %82 : vector<8x32xf32>
    %84 = arith.index_cast %c2_i32 : i32 to index
    %c0_32 = arith.constant 0 : index
    %c0_33 = arith.constant 0 : index
    %85 = vector.load %arg16[%84, %c0_32, %c0_33] : memref<8x8x32xf32, #tpu.memory_space<vmem>>, vector<1x8x32xf32>
    %86 = vector.shape_cast %85 : vector<1x8x32xf32> to vector<8x32xf32>
    %87 = vector.shape_cast %83 : vector<8x32xf32> to vector<1x8x32xf32>
    tpu.vector_store %arg16[%84, %c0_32, %c0_33], %87 {strides = array<i32>} : memref<8x8x32xf32, #tpu.memory_space<vmem>>, vector<1x8x32xf32>,
    %c3_i32 = arith.constant 3 : i32
    %88 = arith.index_cast %c3_i32 : i32 to index
    %c0_34 = arith.constant 0 : index
    %c0_35 = arith.constant 0 : index
    %89 = vector.load %arg15[%88, %c0_34, %c0_35] : memref<8x8x128xf32, #tpu.memory_space<vmem>>, vector<1x8x128xf32>
    %90 = vector.shape_cast %89 : vector<1x8x128xf32> to vector<8x128xf32>
    %c0_36 = arith.constant 0 : index
    %c0_37 = arith.constant 0 : index
    %91 = vector.load %arg4[%c0_36, %c0_37] : memref<32x128xf32, #tpu.memory_space<vmem>>, vector<32x128xf32>
    %cst_38 = arith.constant dense<0.000000e+00> : vector<8x128xf32>
    %92 = tpu.matmul %83, %91, %cst_38 {dimension_numbers = #tpu.dot_dimension_numbers<[1], [0], [0], [1], [0, 0, 1, 1], [], []>} : vector<8x32xf32>, vector<32x128xf32>, vector<8x128xf32> -> vector<8x128xf32>
    %93 = arith.addf %90, %92 : vector<8x128xf32>
    %94 = vector.extract_strided_slice %93 {offsets = [0, 0], sizes = [8, 96], strides = [1, 1]} : vector<8x128xf32> to vector<8x96xf32>
    %95 = arith.negf %94 : vector<8x96xf32>
    %96 = math.exp %95 : vector<8x96xf32>
    %cst_39 = arith.constant 1.000000e+00 : f32
    %97 = vector.broadcast %cst_39 : f32 to vector<8x96xf32>
    %98 = arith.addf %97, %96 : vector<8x96xf32>
    %99 = arith.divf %97, %98 : vector<8x96xf32>
    %100 = vector.extract_strided_slice %99 {offsets = [0, 0], sizes = [8, 32], strides = [1, 1]} : vector<8x96xf32> to vector<8x32xf32>
    %101 = vector.extract_strided_slice %99 {offsets = [0, 32], sizes = [8, 32], strides = [1, 1]} : vector<8x96xf32> to vector<8x32xf32>
    %102 = vector.extract_strided_slice %99 {offsets = [0, 64], sizes = [8, 32], strides = [1, 1]} : vector<8x96xf32> to vector<8x32xf32>
    %103 = vector.extract_strided_slice %93 {offsets = [0, 96], sizes = [8, 32], strides = [1, 1]} : vector<8x128xf32> to vector<8x32xf32>
    %104 = math.tanh %103 : vector<8x32xf32>
    %105 = arith.mulf %101, %81 : vector<8x32xf32>
    %106 = arith.mulf %100, %104 : vector<8x32xf32>
    %107 = arith.addf %105, %106 : vector<8x32xf32>
    %108 = math.tanh %107 : vector<8x32xf32>
    %109 = arith.mulf %102, %108 : vector<8x32xf32>
    %110 = arith.index_cast %c3_i32 : i32 to index
    %c0_40 = arith.constant 0 : index
    %c0_41 = arith.constant 0 : index
    %111 = vector.load %arg16[%110, %c0_40, %c0_41] : memref<8x8x32xf32, #tpu.memory_space<vmem>>, vector<1x8x32xf32>
    %112 = vector.shape_cast %111 : vector<1x8x32xf32> to vector<8x32xf32>
    %113 = vector.shape_cast %109 : vector<8x32xf32> to vector<1x8x32xf32>
    tpu.vector_store %arg16[%110, %c0_40, %c0_41], %113 {strides = array<i32>} : memref<8x8x32xf32, #tpu.memory_space<vmem>>, vector<1x8x32xf32>,
    %c4_i32 = arith.constant 4 : i32
    %114 = arith.index_cast %c4_i32 : i32 to index
    %c0_42 = arith.constant 0 : index
    %c0_43 = arith.constant 0 : index
    %115 = vector.load %arg15[%114, %c0_42, %c0_43] : memref<8x8x128xf32, #tpu.memory_space<vmem>>, vector<1x8x128xf32>
    %116 = vector.shape_cast %115 : vector<1x8x128xf32> to vector<8x128xf32>
    %c0_44 = arith.constant 0 : index
    %c0_45 = arith.constant 0 : index
    %117 = vector.load %arg4[%c0_44, %c0_45] : memref<32x128xf32, #tpu.memory_space<vmem>>, vector<32x128xf32>
    %cst_46 = arith.constant dense<0.000000e+00> : vector<8x128xf32>
    %118 = tpu.matmul %109, %117, %cst_46 {dimension_numbers = #tpu.dot_dimension_numbers<[1], [0], [0], [1], [0, 0, 1, 1], [], []>} : vector<8x32xf32>, vector<32x128xf32>, vector<8x128xf32> -> vector<8x128xf32>
    %119 = arith.addf %116, %118 : vector<8x128xf32>
    %120 = vector.extract_strided_slice %119 {offsets = [0, 0], sizes = [8, 96], strides = [1, 1]} : vector<8x128xf32> to vector<8x96xf32>
    %121 = arith.negf %120 : vector<8x96xf32>
    %122 = math.exp %121 : vector<8x96xf32>
    %cst_47 = arith.constant 1.000000e+00 : f32
    %123 = vector.broadcast %cst_47 : f32 to vector<8x96xf32>
    %124 = arith.addf %123, %122 : vector<8x96xf32>
    %125 = arith.divf %123, %124 : vector<8x96xf32>
    %126 = vector.extract_strided_slice %125 {offsets = [0, 0], sizes = [8, 32], strides = [1, 1]} : vector<8x96xf32> to vector<8x32xf32>
    %127 = vector.extract_strided_slice %125 {offsets = [0, 32], sizes = [8, 32], strides = [1, 1]} : vector<8x96xf32> to vector<8x32xf32>
    %128 = vector.extract_strided_slice %125 {offsets = [0, 64], sizes = [8, 32], strides = [1, 1]} : vector<8x96xf32> to vector<8x32xf32>
    %129 = vector.extract_strided_slice %119 {offsets = [0, 96], sizes = [8, 32], strides = [1, 1]} : vector<8x128xf32> to vector<8x32xf32>
    %130 = math.tanh %129 : vector<8x32xf32>
    %131 = arith.mulf %127, %107 : vector<8x32xf32>
    %132 = arith.mulf %126, %130 : vector<8x32xf32>
    %133 = arith.addf %131, %132 : vector<8x32xf32>
    %134 = math.tanh %133 : vector<8x32xf32>
    %135 = arith.mulf %128, %134 : vector<8x32xf32>
    %136 = arith.index_cast %c4_i32 : i32 to index
    %c0_48 = arith.constant 0 : index
    %c0_49 = arith.constant 0 : index
    %137 = vector.load %arg16[%136, %c0_48, %c0_49] : memref<8x8x32xf32, #tpu.memory_space<vmem>>, vector<1x8x32xf32>
    %138 = vector.shape_cast %137 : vector<1x8x32xf32> to vector<8x32xf32>
    %139 = vector.shape_cast %135 : vector<8x32xf32> to vector<1x8x32xf32>
    tpu.vector_store %arg16[%136, %c0_48, %c0_49], %139 {strides = array<i32>} : memref<8x8x32xf32, #tpu.memory_space<vmem>>, vector<1x8x32xf32>,
    %c5_i32 = arith.constant 5 : i32
    %140 = arith.index_cast %c5_i32 : i32 to index
    %c0_50 = arith.constant 0 : index
    %c0_51 = arith.constant 0 : index
    %141 = vector.load %arg15[%140, %c0_50, %c0_51] : memref<8x8x128xf32, #tpu.memory_space<vmem>>, vector<1x8x128xf32>
    %142 = vector.shape_cast %141 : vector<1x8x128xf32> to vector<8x128xf32>
    %c0_52 = arith.constant 0 : index
    %c0_53 = arith.constant 0 : index
    %143 = vector.load %arg4[%c0_52, %c0_53] : memref<32x128xf32, #tpu.memory_space<vmem>>, vector<32x128xf32>
    %cst_54 = arith.constant dense<0.000000e+00> : vector<8x128xf32>
    %144 = tpu.matmul %135, %143, %cst_54 {dimension_numbers = #tpu.dot_dimension_numbers<[1], [0], [0], [1], [0, 0, 1, 1], [], []>} : vector<8x32xf32>, vector<32x128xf32>, vector<8x128xf32> -> vector<8x128xf32>
    %145 = arith.addf %142, %144 : vector<8x128xf32>
    %146 = vector.extract_strided_slice %145 {offsets = [0, 0], sizes = [8, 96], strides = [1, 1]} : vector<8x128xf32> to vector<8x96xf32>
    %147 = arith.negf %146 : vector<8x96xf32>
    %148 = math.exp %147 : vector<8x96xf32>
    %cst_55 = arith.constant 1.000000e+00 : f32
    %149 = vector.broadcast %cst_55 : f32 to vector<8x96xf32>
    %150 = arith.addf %149, %148 : vector<8x96xf32>
    %151 = arith.divf %149, %150 : vector<8x96xf32>
    %152 = vector.extract_strided_slice %151 {offsets = [0, 0], sizes = [8, 32], strides = [1, 1]} : vector<8x96xf32> to vector<8x32xf32>
    %153 = vector.extract_strided_slice %151 {offsets = [0, 32], sizes = [8, 32], strides = [1, 1]} : vector<8x96xf32> to vector<8x32xf32>
    %154 = vector.extract_strided_slice %151 {offsets = [0, 64], sizes = [8, 32], strides = [1, 1]} : vector<8x96xf32> to vector<8x32xf32>
    %155 = vector.extract_strided_slice %145 {offsets = [0, 96], sizes = [8, 32], strides = [1, 1]} : vector<8x128xf32> to vector<8x32xf32>
    %156 = math.tanh %155 : vector<8x32xf32>
    %157 = arith.mulf %153, %133 : vector<8x32xf32>
    %158 = arith.mulf %152, %156 : vector<8x32xf32>
    %159 = arith.addf %157, %158 : vector<8x32xf32>
    %160 = math.tanh %159 : vector<8x32xf32>
    %161 = arith.mulf %154, %160 : vector<8x32xf32>
    %162 = arith.index_cast %c5_i32 : i32 to index
    %c0_56 = arith.constant 0 : index
    %c0_57 = arith.constant 0 : index
    %163 = vector.load %arg16[%162, %c0_56, %c0_57] : memref<8x8x32xf32, #tpu.memory_space<vmem>>, vector<1x8x32xf32>
    %164 = vector.shape_cast %163 : vector<1x8x32xf32> to vector<8x32xf32>
    %165 = vector.shape_cast %161 : vector<8x32xf32> to vector<1x8x32xf32>
    tpu.vector_store %arg16[%162, %c0_56, %c0_57], %165 {strides = array<i32>} : memref<8x8x32xf32, #tpu.memory_space<vmem>>, vector<1x8x32xf32>,
    %c6_i32 = arith.constant 6 : i32
    %166 = arith.index_cast %c6_i32 : i32 to index
    %c0_58 = arith.constant 0 : index
    %c0_59 = arith.constant 0 : index
    %167 = vector.load %arg15[%166, %c0_58, %c0_59] : memref<8x8x128xf32, #tpu.memory_space<vmem>>, vector<1x8x128xf32>
    %168 = vector.shape_cast %167 : vector<1x8x128xf32> to vector<8x128xf32>
    %c0_60 = arith.constant 0 : index
    %c0_61 = arith.constant 0 : index
    %169 = vector.load %arg4[%c0_60, %c0_61] : memref<32x128xf32, #tpu.memory_space<vmem>>, vector<32x128xf32>
    %cst_62 = arith.constant dense<0.000000e+00> : vector<8x128xf32>
    %170 = tpu.matmul %161, %169, %cst_62 {dimension_numbers = #tpu.dot_dimension_numbers<[1], [0], [0], [1], [0, 0, 1, 1], [], []>} : vector<8x32xf32>, vector<32x128xf32>, vector<8x128xf32> -> vector<8x128xf32>
    %171 = arith.addf %168, %170 : vector<8x128xf32>
    %172 = vector.extract_strided_slice %171 {offsets = [0, 0], sizes = [8, 96], strides = [1, 1]} : vector<8x128xf32> to vector<8x96xf32>
    %173 = arith.negf %172 : vector<8x96xf32>
    %174 = math.exp %173 : vector<8x96xf32>
    %cst_63 = arith.constant 1.000000e+00 : f32
    %175 = vector.broadcast %cst_63 : f32 to vector<8x96xf32>
    %176 = arith.addf %175, %174 : vector<8x96xf32>
    %177 = arith.divf %175, %176 : vector<8x96xf32>
    %178 = vector.extract_strided_slice %177 {offsets = [0, 0], sizes = [8, 32], strides = [1, 1]} : vector<8x96xf32> to vector<8x32xf32>
    %179 = vector.extract_strided_slice %177 {offsets = [0, 32], sizes = [8, 32], strides = [1, 1]} : vector<8x96xf32> to vector<8x32xf32>
    %180 = vector.extract_strided_slice %177 {offsets = [0, 64], sizes = [8, 32], strides = [1, 1]} : vector<8x96xf32> to vector<8x32xf32>
    %181 = vector.extract_strided_slice %171 {offsets = [0, 96], sizes = [8, 32], strides = [1, 1]} : vector<8x128xf32> to vector<8x32xf32>
    %182 = math.tanh %181 : vector<8x32xf32>
    %183 = arith.mulf %179, %159 : vector<8x32xf32>
    %184 = arith.mulf %178, %182 : vector<8x32xf32>
    %185 = arith.addf %183, %184 : vector<8x32xf32>
    %186 = math.tanh %185 : vector<8x32xf32>
    %187 = arith.mulf %180, %186 : vector<8x32xf32>
    %188 = arith.index_cast %c6_i32 : i32 to index
    %c0_64 = arith.constant 0 : index
    %c0_65 = arith.constant 0 : index
    %189 = vector.load %arg16[%188, %c0_64, %c0_65] : memref<8x8x32xf32, #tpu.memory_space<vmem>>, vector<1x8x32xf32>
    %190 = vector.shape_cast %189 : vector<1x8x32xf32> to vector<8x32xf32>
    %191 = vector.shape_cast %187 : vector<8x32xf32> to vector<1x8x32xf32>
    tpu.vector_store %arg16[%188, %c0_64, %c0_65], %191 {strides = array<i32>} : memref<8x8x32xf32, #tpu.memory_space<vmem>>, vector<1x8x32xf32>,
    %c7_i32 = arith.constant 7 : i32
    %192 = arith.index_cast %c7_i32 : i32 to index
    %c0_66 = arith.constant 0 : index
    %c0_67 = arith.constant 0 : index
    %193 = vector.load %arg15[%192, %c0_66, %c0_67] : memref<8x8x128xf32, #tpu.memory_space<vmem>>, vector<1x8x128xf32>
    %194 = vector.shape_cast %193 : vector<1x8x128xf32> to vector<8x128xf32>
    %c0_68 = arith.constant 0 : index
    %c0_69 = arith.constant 0 : index
    %195 = vector.load %arg4[%c0_68, %c0_69] : memref<32x128xf32, #tpu.memory_space<vmem>>, vector<32x128xf32>
    %cst_70 = arith.constant dense<0.000000e+00> : vector<8x128xf32>
    %196 = tpu.matmul %187, %195, %cst_70 {dimension_numbers = #tpu.dot_dimension_numbers<[1], [0], [0], [1], [0, 0, 1, 1], [], []>} : vector<8x32xf32>, vector<32x128xf32>, vector<8x128xf32> -> vector<8x128xf32>
    %197 = arith.addf %194, %196 : vector<8x128xf32>
    %198 = vector.extract_strided_slice %197 {offsets = [0, 0], sizes = [8, 96], strides = [1, 1]} : vector<8x128xf32> to vector<8x96xf32>
    %199 = arith.negf %198 : vector<8x96xf32>
    %200 = math.exp %199 : vector<8x96xf32>
    %cst_71 = arith.constant 1.000000e+00 : f32
    %201 = vector.broadcast %cst_71 : f32 to vector<8x96xf32>
    %202 = arith.addf %201, %200 : vector<8x96xf32>
    %203 = arith.divf %201, %202 : vector<8x96xf32>
    %204 = vector.extract_strided_slice %203 {offsets = [0, 0], sizes = [8, 32], strides = [1, 1]} : vector<8x96xf32> to vector<8x32xf32>
    %205 = vector.extract_strided_slice %203 {offsets = [0, 32], sizes = [8, 32], strides = [1, 1]} : vector<8x96xf32> to vector<8x32xf32>
    %206 = vector.extract_strided_slice %203 {offsets = [0, 64], sizes = [8, 32], strides = [1, 1]} : vector<8x96xf32> to vector<8x32xf32>
    %207 = vector.extract_strided_slice %197 {offsets = [0, 96], sizes = [8, 32], strides = [1, 1]} : vector<8x128xf32> to vector<8x32xf32>
    %208 = math.tanh %207 : vector<8x32xf32>
    %209 = arith.mulf %205, %185 : vector<8x32xf32>
    %210 = arith.mulf %204, %208 : vector<8x32xf32>
    %211 = arith.addf %209, %210 : vector<8x32xf32>
    %212 = math.tanh %211 : vector<8x32xf32>
    %213 = arith.mulf %206, %212 : vector<8x32xf32>
    %214 = arith.index_cast %c7_i32 : i32 to index
    %c0_72 = arith.constant 0 : index
    %c0_73 = arith.constant 0 : index
    %215 = vector.load %arg16[%214, %c0_72, %c0_73] : memref<8x8x32xf32, #tpu.memory_space<vmem>>, vector<1x8x32xf32>
    %216 = vector.shape_cast %215 : vector<1x8x32xf32> to vector<8x32xf32>
    %217 = vector.shape_cast %213 : vector<8x32xf32> to vector<1x8x32xf32>
    tpu.vector_store %arg16[%214, %c0_72, %c0_73], %217 {strides = array<i32>} : memref<8x8x32xf32, #tpu.memory_space<vmem>>, vector<1x8x32xf32>,
    %c8_i32 = arith.constant 8 : i32
    %c0_74 = arith.constant 0 : index
    %c0_75 = arith.constant 0 : index
    %c0_76 = arith.constant 0 : index
    %218 = vector.load %arg16[%c0_74, %c0_75, %c0_76] : memref<8x8x32xf32, #tpu.memory_space<vmem>>, vector<8x8x32xf32>
    %219 = vector.shape_cast %218 : vector<8x8x32xf32> to vector<64x32xf32>
    %c0_77 = arith.constant 0 : index
    %c0_78 = arith.constant 0 : index
    %220 = vector.load %arg6[%c0_77, %c0_78] : memref<32x128xf32, #tpu.memory_space<vmem>>, vector<32x128xf32>
    %cst_79 = arith.constant dense<0.000000e+00> : vector<64x128xf32>
    %221 = tpu.matmul %219, %220, %cst_79 {dimension_numbers = #tpu.dot_dimension_numbers<[1], [0], [0], [1], [0, 0, 1, 1], [], []>} : vector<64x32xf32>, vector<32x128xf32>, vector<64x128xf32> -> vector<64x128xf32>
    %c0_80 = arith.constant 0 : index
    %c0_81 = arith.constant 0 : index
    %222 = vector.load %arg8[%c0_80, %c0_81] : memref<1x128xf32, #tpu.memory_space<vmem>>, vector<1x128xf32>
    %223 = vector.broadcast %222 : vector<1x128xf32> to vector<64x128xf32>
    %224 = arith.addf %221, %223 : vector<64x128xf32>
    %225 = vector.shape_cast %224 : vector<64x128xf32> to vector<8x8x128xf32>
    %c0_82 = arith.constant 0 : index
    %c0_83 = arith.constant 0 : index
    %c0_84 = arith.constant 0 : index
    %226 = vector.load %arg15[%c0_82, %c0_83, %c0_84] : memref<8x8x128xf32, #tpu.memory_space<vmem>>, vector<8x8x128xf32>
    tpu.vector_store %arg15[%c0_82, %c0_83, %c0_84], %225 {strides = array<i32>} : memref<8x8x128xf32, #tpu.memory_space<vmem>>, vector<8x8x128xf32>,
    %cst_85 = arith.constant 0.000000e+00 : f32
    %227 = vector.broadcast %cst_85 : f32 to vector<8x32xf32>
    %c0_i32_86 = arith.constant 0 : i32
    %228 = arith.index_cast %c0_i32_86 : i32 to index
    %c0_87 = arith.constant 0 : index
    %c0_88 = arith.constant 0 : index
    %229 = vector.load %arg15[%228, %c0_87, %c0_88] : memref<8x8x128xf32, #tpu.memory_space<vmem>>, vector<1x8x128xf32>
    %230 = vector.shape_cast %229 : vector<1x8x128xf32> to vector<8x128xf32>
    %c0_89 = arith.constant 0 : index
    %c0_90 = arith.constant 0 : index
    %231 = vector.load %arg7[%c0_89, %c0_90] : memref<32x128xf32, #tpu.memory_space<vmem>>, vector<32x128xf32>
    %cst_91 = arith.constant dense<0.000000e+00> : vector<8x128xf32>
    %232 = tpu.matmul %227, %231, %cst_91 {dimension_numbers = #tpu.dot_dimension_numbers<[1], [0], [0], [1], [0, 0, 1, 1], [], []>} : vector<8x32xf32>, vector<32x128xf32>, vector<8x128xf32> -> vector<8x128xf32>
    %233 = arith.addf %230, %232 : vector<8x128xf32>
    %234 = vector.extract_strided_slice %233 {offsets = [0, 0], sizes = [8, 96], strides = [1, 1]} : vector<8x128xf32> to vector<8x96xf32>
    %235 = arith.negf %234 : vector<8x96xf32>
    %236 = math.exp %235 : vector<8x96xf32>
    %cst_92 = arith.constant 1.000000e+00 : f32
    %237 = vector.broadcast %cst_92 : f32 to vector<8x96xf32>
    %238 = arith.addf %237, %236 : vector<8x96xf32>
    %239 = arith.divf %237, %238 : vector<8x96xf32>
    %240 = vector.extract_strided_slice %239 {offsets = [0, 0], sizes = [8, 32], strides = [1, 1]} : vector<8x96xf32> to vector<8x32xf32>
    %241 = vector.extract_strided_slice %239 {offsets = [0, 32], sizes = [8, 32], strides = [1, 1]} : vector<8x96xf32> to vector<8x32xf32>
    %242 = vector.extract_strided_slice %239 {offsets = [0, 64], sizes = [8, 32], strides = [1, 1]} : vector<8x96xf32> to vector<8x32xf32>
    %243 = vector.extract_strided_slice %233 {offsets = [0, 96], sizes = [8, 32], strides = [1, 1]} : vector<8x128xf32> to vector<8x32xf32>
    %244 = math.tanh %243 : vector<8x32xf32>
    %245 = arith.mulf %241, %227 : vector<8x32xf32>
    %246 = arith.mulf %240, %244 : vector<8x32xf32>
    %247 = arith.addf %245, %246 : vector<8x32xf32>
    %248 = math.tanh %247 : vector<8x32xf32>
    %249 = arith.mulf %242, %248 : vector<8x32xf32>
    %c1_i32_93 = arith.constant 1 : i32
    %250 = arith.index_cast %c1_i32_93 : i32 to index
    %c0_94 = arith.constant 0 : index
    %c0_95 = arith.constant 0 : index
    %251 = vector.load %arg15[%250, %c0_94, %c0_95] : memref<8x8x128xf32, #tpu.memory_space<vmem>>, vector<1x8x128xf32>
    %252 = vector.shape_cast %251 : vector<1x8x128xf32> to vector<8x128xf32>
    %c0_96 = arith.constant 0 : index
    %c0_97 = arith.constant 0 : index
    %253 = vector.load %arg7[%c0_96, %c0_97] : memref<32x128xf32, #tpu.memory_space<vmem>>, vector<32x128xf32>
    %cst_98 = arith.constant dense<0.000000e+00> : vector<8x128xf32>
    %254 = tpu.matmul %249, %253, %cst_98 {dimension_numbers = #tpu.dot_dimension_numbers<[1], [0], [0], [1], [0, 0, 1, 1], [], []>} : vector<8x32xf32>, vector<32x128xf32>, vector<8x128xf32> -> vector<8x128xf32>
    %255 = arith.addf %252, %254 : vector<8x128xf32>
    %256 = vector.extract_strided_slice %255 {offsets = [0, 0], sizes = [8, 96], strides = [1, 1]} : vector<8x128xf32> to vector<8x96xf32>
    %257 = arith.negf %256 : vector<8x96xf32>
    %258 = math.exp %257 : vector<8x96xf32>
    %cst_99 = arith.constant 1.000000e+00 : f32
    %259 = vector.broadcast %cst_99 : f32 to vector<8x96xf32>
    %260 = arith.addf %259, %258 : vector<8x96xf32>
    %261 = arith.divf %259, %260 : vector<8x96xf32>
    %262 = vector.extract_strided_slice %261 {offsets = [0, 0], sizes = [8, 32], strides = [1, 1]} : vector<8x96xf32> to vector<8x32xf32>
    %263 = vector.extract_strided_slice %261 {offsets = [0, 32], sizes = [8, 32], strides = [1, 1]} : vector<8x96xf32> to vector<8x32xf32>
    %264 = vector.extract_strided_slice %261 {offsets = [0, 64], sizes = [8, 32], strides = [1, 1]} : vector<8x96xf32> to vector<8x32xf32>
    %265 = vector.extract_strided_slice %255 {offsets = [0, 96], sizes = [8, 32], strides = [1, 1]} : vector<8x128xf32> to vector<8x32xf32>
    %266 = math.tanh %265 : vector<8x32xf32>
    %267 = arith.mulf %263, %247 : vector<8x32xf32>
    %268 = arith.mulf %262, %266 : vector<8x32xf32>
    %269 = arith.addf %267, %268 : vector<8x32xf32>
    %270 = math.tanh %269 : vector<8x32xf32>
    %271 = arith.mulf %264, %270 : vector<8x32xf32>
    %c2_i32_100 = arith.constant 2 : i32
    %272 = arith.index_cast %c2_i32_100 : i32 to index
    %c0_101 = arith.constant 0 : index
    %c0_102 = arith.constant 0 : index
    %273 = vector.load %arg15[%272, %c0_101, %c0_102] : memref<8x8x128xf32, #tpu.memory_space<vmem>>, vector<1x8x128xf32>
    %274 = vector.shape_cast %273 : vector<1x8x128xf32> to vector<8x128xf32>
    %c0_103 = arith.constant 0 : index
    %c0_104 = arith.constant 0 : index
    %275 = vector.load %arg7[%c0_103, %c0_104] : memref<32x128xf32, #tpu.memory_space<vmem>>, vector<32x128xf32>
    %cst_105 = arith.constant dense<0.000000e+00> : vector<8x128xf32>
    %276 = tpu.matmul %271, %275, %cst_105 {dimension_numbers = #tpu.dot_dimension_numbers<[1], [0], [0], [1], [0, 0, 1, 1], [], []>} : vector<8x32xf32>, vector<32x128xf32>, vector<8x128xf32> -> vector<8x128xf32>
    %277 = arith.addf %274, %276 : vector<8x128xf32>
    %278 = vector.extract_strided_slice %277 {offsets = [0, 0], sizes = [8, 96], strides = [1, 1]} : vector<8x128xf32> to vector<8x96xf32>
    %279 = arith.negf %278 : vector<8x96xf32>
    %280 = math.exp %279 : vector<8x96xf32>
    %cst_106 = arith.constant 1.000000e+00 : f32
    %281 = vector.broadcast %cst_106 : f32 to vector<8x96xf32>
    %282 = arith.addf %281, %280 : vector<8x96xf32>
    %283 = arith.divf %281, %282 : vector<8x96xf32>
    %284 = vector.extract_strided_slice %283 {offsets = [0, 0], sizes = [8, 32], strides = [1, 1]} : vector<8x96xf32> to vector<8x32xf32>
    %285 = vector.extract_strided_slice %283 {offsets = [0, 32], sizes = [8, 32], strides = [1, 1]} : vector<8x96xf32> to vector<8x32xf32>
    %286 = vector.extract_strided_slice %283 {offsets = [0, 64], sizes = [8, 32], strides = [1, 1]} : vector<8x96xf32> to vector<8x32xf32>
    %287 = vector.extract_strided_slice %277 {offsets = [0, 96], sizes = [8, 32], strides = [1, 1]} : vector<8x128xf32> to vector<8x32xf32>
    %288 = math.tanh %287 : vector<8x32xf32>
    %289 = arith.mulf %285, %269 : vector<8x32xf32>
    %290 = arith.mulf %284, %288 : vector<8x32xf32>
    %291 = arith.addf %289, %290 : vector<8x32xf32>
    %292 = math.tanh %291 : vector<8x32xf32>
    %293 = arith.mulf %286, %292 : vector<8x32xf32>
    %c3_i32_107 = arith.constant 3 : i32
    %294 = arith.index_cast %c3_i32_107 : i32 to index
    %c0_108 = arith.constant 0 : index
    %c0_109 = arith.constant 0 : index
    %295 = vector.load %arg15[%294, %c0_108, %c0_109] : memref<8x8x128xf32, #tpu.memory_space<vmem>>, vector<1x8x128xf32>
    %296 = vector.shape_cast %295 : vector<1x8x128xf32> to vector<8x128xf32>
    %c0_110 = arith.constant 0 : index
    %c0_111 = arith.constant 0 : index
    %297 = vector.load %arg7[%c0_110, %c0_111] : memref<32x128xf32, #tpu.memory_space<vmem>>, vector<32x128xf32>
    %cst_112 = arith.constant dense<0.000000e+00> : vector<8x128xf32>
    %298 = tpu.matmul %293, %297, %cst_112 {dimension_numbers = #tpu.dot_dimension_numbers<[1], [0], [0], [1], [0, 0, 1, 1], [], []>} : vector<8x32xf32>, vector<32x128xf32>, vector<8x128xf32> -> vector<8x128xf32>
    %299 = arith.addf %296, %298 : vector<8x128xf32>
    %300 = vector.extract_strided_slice %299 {offsets = [0, 0], sizes = [8, 96], strides = [1, 1]} : vector<8x128xf32> to vector<8x96xf32>
    %301 = arith.negf %300 : vector<8x96xf32>
    %302 = math.exp %301 : vector<8x96xf32>
    %cst_113 = arith.constant 1.000000e+00 : f32
    %303 = vector.broadcast %cst_113 : f32 to vector<8x96xf32>
    %304 = arith.addf %303, %302 : vector<8x96xf32>
    %305 = arith.divf %303, %304 : vector<8x96xf32>
    %306 = vector.extract_strided_slice %305 {offsets = [0, 0], sizes = [8, 32], strides = [1, 1]} : vector<8x96xf32> to vector<8x32xf32>
    %307 = vector.extract_strided_slice %305 {offsets = [0, 32], sizes = [8, 32], strides = [1, 1]} : vector<8x96xf32> to vector<8x32xf32>
    %308 = vector.extract_strided_slice %305 {offsets = [0, 64], sizes = [8, 32], strides = [1, 1]} : vector<8x96xf32> to vector<8x32xf32>
    %309 = vector.extract_strided_slice %299 {offsets = [0, 96], sizes = [8, 32], strides = [1, 1]} : vector<8x128xf32> to vector<8x32xf32>
    %310 = math.tanh %309 : vector<8x32xf32>
    %311 = arith.mulf %307, %291 : vector<8x32xf32>
    %312 = arith.mulf %306, %310 : vector<8x32xf32>
    %313 = arith.addf %311, %312 : vector<8x32xf32>
    %314 = math.tanh %313 : vector<8x32xf32>
    %315 = arith.mulf %308, %314 : vector<8x32xf32>
    %c4_i32_114 = arith.constant 4 : i32
    %316 = arith.index_cast %c4_i32_114 : i32 to index
    %c0_115 = arith.constant 0 : index
    %c0_116 = arith.constant 0 : index
    %317 = vector.load %arg15[%316, %c0_115, %c0_116] : memref<8x8x128xf32, #tpu.memory_space<vmem>>, vector<1x8x128xf32>
    %318 = vector.shape_cast %317 : vector<1x8x128xf32> to vector<8x128xf32>
    %c0_117 = arith.constant 0 : index
    %c0_118 = arith.constant 0 : index
    %319 = vector.load %arg7[%c0_117, %c0_118] : memref<32x128xf32, #tpu.memory_space<vmem>>, vector<32x128xf32>
    %cst_119 = arith.constant dense<0.000000e+00> : vector<8x128xf32>
    %320 = tpu.matmul %315, %319, %cst_119 {dimension_numbers = #tpu.dot_dimension_numbers<[1], [0], [0], [1], [0, 0, 1, 1], [], []>} : vector<8x32xf32>, vector<32x128xf32>, vector<8x128xf32> -> vector<8x128xf32>
    %321 = arith.addf %318, %320 : vector<8x128xf32>
    %322 = vector.extract_strided_slice %321 {offsets = [0, 0], sizes = [8, 96], strides = [1, 1]} : vector<8x128xf32> to vector<8x96xf32>
    %323 = arith.negf %322 : vector<8x96xf32>
    %324 = math.exp %323 : vector<8x96xf32>
    %cst_120 = arith.constant 1.000000e+00 : f32
    %325 = vector.broadcast %cst_120 : f32 to vector<8x96xf32>
    %326 = arith.addf %325, %324 : vector<8x96xf32>
    %327 = arith.divf %325, %326 : vector<8x96xf32>
    %328 = vector.extract_strided_slice %327 {offsets = [0, 0], sizes = [8, 32], strides = [1, 1]} : vector<8x96xf32> to vector<8x32xf32>
    %329 = vector.extract_strided_slice %327 {offsets = [0, 32], sizes = [8, 32], strides = [1, 1]} : vector<8x96xf32> to vector<8x32xf32>
    %330 = vector.extract_strided_slice %327 {offsets = [0, 64], sizes = [8, 32], strides = [1, 1]} : vector<8x96xf32> to vector<8x32xf32>
    %331 = vector.extract_strided_slice %321 {offsets = [0, 96], sizes = [8, 32], strides = [1, 1]} : vector<8x128xf32> to vector<8x32xf32>
    %332 = math.tanh %331 : vector<8x32xf32>
    %333 = arith.mulf %329, %313 : vector<8x32xf32>
    %334 = arith.mulf %328, %332 : vector<8x32xf32>
    %335 = arith.addf %333, %334 : vector<8x32xf32>
    %336 = math.tanh %335 : vector<8x32xf32>
    %337 = arith.mulf %330, %336 : vector<8x32xf32>
    %c5_i32_121 = arith.constant 5 : i32
    %338 = arith.index_cast %c5_i32_121 : i32 to index
    %c0_122 = arith.constant 0 : index
    %c0_123 = arith.constant 0 : index
    %339 = vector.load %arg15[%338, %c0_122, %c0_123] : memref<8x8x128xf32, #tpu.memory_space<vmem>>, vector<1x8x128xf32>
    %340 = vector.shape_cast %339 : vector<1x8x128xf32> to vector<8x128xf32>
    %c0_124 = arith.constant 0 : index
    %c0_125 = arith.constant 0 : index
    %341 = vector.load %arg7[%c0_124, %c0_125] : memref<32x128xf32, #tpu.memory_space<vmem>>, vector<32x128xf32>
    %cst_126 = arith.constant dense<0.000000e+00> : vector<8x128xf32>
    %342 = tpu.matmul %337, %341, %cst_126 {dimension_numbers = #tpu.dot_dimension_numbers<[1], [0], [0], [1], [0, 0, 1, 1], [], []>} : vector<8x32xf32>, vector<32x128xf32>, vector<8x128xf32> -> vector<8x128xf32>
    %343 = arith.addf %340, %342 : vector<8x128xf32>
    %344 = vector.extract_strided_slice %343 {offsets = [0, 0], sizes = [8, 96], strides = [1, 1]} : vector<8x128xf32> to vector<8x96xf32>
    %345 = arith.negf %344 : vector<8x96xf32>
    %346 = math.exp %345 : vector<8x96xf32>
    %cst_127 = arith.constant 1.000000e+00 : f32
    %347 = vector.broadcast %cst_127 : f32 to vector<8x96xf32>
    %348 = arith.addf %347, %346 : vector<8x96xf32>
    %349 = arith.divf %347, %348 : vector<8x96xf32>
    %350 = vector.extract_strided_slice %349 {offsets = [0, 0], sizes = [8, 32], strides = [1, 1]} : vector<8x96xf32> to vector<8x32xf32>
    %351 = vector.extract_strided_slice %349 {offsets = [0, 32], sizes = [8, 32], strides = [1, 1]} : vector<8x96xf32> to vector<8x32xf32>
    %352 = vector.extract_strided_slice %349 {offsets = [0, 64], sizes = [8, 32], strides = [1, 1]} : vector<8x96xf32> to vector<8x32xf32>
    %353 = vector.extract_strided_slice %343 {offsets = [0, 96], sizes = [8, 32], strides = [1, 1]} : vector<8x128xf32> to vector<8x32xf32>
    %354 = math.tanh %353 : vector<8x32xf32>
    %355 = arith.mulf %351, %335 : vector<8x32xf32>
    %356 = arith.mulf %350, %354 : vector<8x32xf32>
    %357 = arith.addf %355, %356 : vector<8x32xf32>
    %358 = math.tanh %357 : vector<8x32xf32>
    %359 = arith.mulf %352, %358 : vector<8x32xf32>
    %c6_i32_128 = arith.constant 6 : i32
    %360 = arith.index_cast %c6_i32_128 : i32 to index
    %c0_129 = arith.constant 0 : index
    %c0_130 = arith.constant 0 : index
    %361 = vector.load %arg15[%360, %c0_129, %c0_130] : memref<8x8x128xf32, #tpu.memory_space<vmem>>, vector<1x8x128xf32>
    %362 = vector.shape_cast %361 : vector<1x8x128xf32> to vector<8x128xf32>
    %c0_131 = arith.constant 0 : index
    %c0_132 = arith.constant 0 : index
    %363 = vector.load %arg7[%c0_131, %c0_132] : memref<32x128xf32, #tpu.memory_space<vmem>>, vector<32x128xf32>
    %cst_133 = arith.constant dense<0.000000e+00> : vector<8x128xf32>
    %364 = tpu.matmul %359, %363, %cst_133 {dimension_numbers = #tpu.dot_dimension_numbers<[1], [0], [0], [1], [0, 0, 1, 1], [], []>} : vector<8x32xf32>, vector<32x128xf32>, vector<8x128xf32> -> vector<8x128xf32>
    %365 = arith.addf %362, %364 : vector<8x128xf32>
    %366 = vector.extract_strided_slice %365 {offsets = [0, 0], sizes = [8, 96], strides = [1, 1]} : vector<8x128xf32> to vector<8x96xf32>
    %367 = arith.negf %366 : vector<8x96xf32>
    %368 = math.exp %367 : vector<8x96xf32>
    %cst_134 = arith.constant 1.000000e+00 : f32
    %369 = vector.broadcast %cst_134 : f32 to vector<8x96xf32>
    %370 = arith.addf %369, %368 : vector<8x96xf32>
    %371 = arith.divf %369, %370 : vector<8x96xf32>
    %372 = vector.extract_strided_slice %371 {offsets = [0, 0], sizes = [8, 32], strides = [1, 1]} : vector<8x96xf32> to vector<8x32xf32>
    %373 = vector.extract_strided_slice %371 {offsets = [0, 32], sizes = [8, 32], strides = [1, 1]} : vector<8x96xf32> to vector<8x32xf32>
    %374 = vector.extract_strided_slice %371 {offsets = [0, 64], sizes = [8, 32], strides = [1, 1]} : vector<8x96xf32> to vector<8x32xf32>
    %375 = vector.extract_strided_slice %365 {offsets = [0, 96], sizes = [8, 32], strides = [1, 1]} : vector<8x128xf32> to vector<8x32xf32>
    %376 = math.tanh %375 : vector<8x32xf32>
    %377 = arith.mulf %373, %357 : vector<8x32xf32>
    %378 = arith.mulf %372, %376 : vector<8x32xf32>
    %379 = arith.addf %377, %378 : vector<8x32xf32>
    %380 = math.tanh %379 : vector<8x32xf32>
    %381 = arith.mulf %374, %380 : vector<8x32xf32>
    %c7_i32_135 = arith.constant 7 : i32
    %382 = arith.index_cast %c7_i32_135 : i32 to index
    %c0_136 = arith.constant 0 : index
    %c0_137 = arith.constant 0 : index
    %383 = vector.load %arg15[%382, %c0_136, %c0_137] : memref<8x8x128xf32, #tpu.memory_space<vmem>>, vector<1x8x128xf32>
    %384 = vector.shape_cast %383 : vector<1x8x128xf32> to vector<8x128xf32>
    %c0_138 = arith.constant 0 : index
    %c0_139 = arith.constant 0 : index
    %385 = vector.load %arg7[%c0_138, %c0_139] : memref<32x128xf32, #tpu.memory_space<vmem>>, vector<32x128xf32>
    %cst_140 = arith.constant dense<0.000000e+00> : vector<8x128xf32>
    %386 = tpu.matmul %381, %385, %cst_140 {dimension_numbers = #tpu.dot_dimension_numbers<[1], [0], [0], [1], [0, 0, 1, 1], [], []>} : vector<8x32xf32>, vector<32x128xf32>, vector<8x128xf32> -> vector<8x128xf32>
    %387 = arith.addf %384, %386 : vector<8x128xf32>
    %388 = vector.extract_strided_slice %387 {offsets = [0, 0], sizes = [8, 96], strides = [1, 1]} : vector<8x128xf32> to vector<8x96xf32>
    %389 = arith.negf %388 : vector<8x96xf32>
    %390 = math.exp %389 : vector<8x96xf32>
    %cst_141 = arith.constant 1.000000e+00 : f32
    %391 = vector.broadcast %cst_141 : f32 to vector<8x96xf32>
    %392 = arith.addf %391, %390 : vector<8x96xf32>
    %393 = arith.divf %391, %392 : vector<8x96xf32>
    %394 = vector.extract_strided_slice %393 {offsets = [0, 0], sizes = [8, 32], strides = [1, 1]} : vector<8x96xf32> to vector<8x32xf32>
    %395 = vector.extract_strided_slice %393 {offsets = [0, 32], sizes = [8, 32], strides = [1, 1]} : vector<8x96xf32> to vector<8x32xf32>
    %396 = vector.extract_strided_slice %393 {offsets = [0, 64], sizes = [8, 32], strides = [1, 1]} : vector<8x96xf32> to vector<8x32xf32>
    %397 = vector.extract_strided_slice %387 {offsets = [0, 96], sizes = [8, 32], strides = [1, 1]} : vector<8x128xf32> to vector<8x32xf32>
    %398 = math.tanh %397 : vector<8x32xf32>
    %399 = arith.mulf %395, %379 : vector<8x32xf32>
    %400 = arith.mulf %394, %398 : vector<8x32xf32>
    %401 = arith.addf %399, %400 : vector<8x32xf32>
    %402 = math.tanh %401 : vector<8x32xf32>
    %403 = arith.mulf %396, %402 : vector<8x32xf32>
    %c8_i32_142 = arith.constant 8 : i32
    %c0_143 = arith.constant 0 : index
    %c0_144 = arith.constant 0 : index
    %404 = vector.load %arg2[%c0_143, %c0_144] : memref<8x4xf32, #tpu.memory_space<vmem>>, vector<8x4xf32>
    %c0_145 = arith.constant 0 : index
    %c0_146 = arith.constant 0 : index
    %405 = vector.load %arg9[%c0_145, %c0_146] : memref<32x128xf32, #tpu.memory_space<vmem>>, vector<32x128xf32>
    %cst_147 = arith.constant dense<0.000000e+00> : vector<8x128xf32>
    %406 = tpu.matmul %403, %405, %cst_147 {dimension_numbers = #tpu.dot_dimension_numbers<[1], [0], [0], [1], [0, 0, 1, 1], [], []>} : vector<8x32xf32>, vector<32x128xf32>, vector<8x128xf32> -> vector<8x128xf32>
    %c0_148 = arith.constant 0 : index
    %c0_149 = arith.constant 0 : index
    %407 = vector.load %arg10[%c0_148, %c0_149] : memref<4x128xf32, #tpu.memory_space<vmem>>, vector<4x128xf32>
    %cst_150 = arith.constant dense<0.000000e+00> : vector<8x128xf32>
    %408 = tpu.matmul %404, %407, %cst_150 {dimension_numbers = #tpu.dot_dimension_numbers<[1], [0], [0], [1], [0, 0, 1, 1], [], []>} : vector<8x4xf32>, vector<4x128xf32>, vector<8x128xf32> -> vector<8x128xf32>
    %409 = arith.addf %406, %408 : vector<8x128xf32>
    %c0_151 = arith.constant 0 : index
    %c0_152 = arith.constant 0 : index
    %410 = vector.load %arg11[%c0_151, %c0_152] : memref<1x128xf32, #tpu.memory_space<vmem>>, vector<1x128xf32>
    %411 = vector.broadcast %410 : vector<1x128xf32> to vector<8x128xf32>
    %412 = arith.addf %409, %411 : vector<8x128xf32>
    %cst_153 = arith.constant 0.000000e+00 : f32
    %413 = vector.broadcast %cst_153 : f32 to vector<8x128xf32>
    %414 = arith.maximumf %412, %413 : vector<8x128xf32>
    %c0_154 = arith.constant 0 : index
    %c0_155 = arith.constant 0 : index
    %415 = vector.load %arg12[%c0_154, %c0_155] : memref<128x128xf32, #tpu.memory_space<vmem>>, vector<128x128xf32>
    %cst_156 = arith.constant dense<0.000000e+00> : vector<8x128xf32>
    %416 = tpu.matmul %414, %415, %cst_156 {dimension_numbers = #tpu.dot_dimension_numbers<[1], [0], [0], [1], [0, 0, 1, 1], [], []>} : vector<8x128xf32>, vector<128x128xf32>, vector<8x128xf32> -> vector<8x128xf32>
    %c0_157 = arith.constant 0 : index
    %c0_158 = arith.constant 0 : index
    %417 = vector.load %arg13[%c0_157, %c0_158] : memref<1x128xf32, #tpu.memory_space<vmem>>, vector<1x128xf32>
    %418 = vector.broadcast %417 : vector<1x128xf32> to vector<8x128xf32>
    %419 = arith.addf %416, %418 : vector<8x128xf32>
    %c0_159 = arith.constant 0 : index
    %c0_160 = arith.constant 0 : index
    %420 = vector.load %arg14[%c0_159, %c0_160] : memref<8x128xf32, #tpu.memory_space<vmem>>, vector<8x128xf32>
    tpu.vector_store %arg14[%c0_159, %c0_160], %419 {strides = array<i32>} : memref<8x128xf32, #tpu.memory_space<vmem>>, vector<8x128xf32>,
    return
  }
  func.func @transform_0(%arg0: i32) -> (i32, i32, i32) {
    %c0_i32 = arith.constant 0 : i32
    %c0_i32_0 = arith.constant 0 : i32
    %c0_i32_1 = arith.constant 0 : i32
    return %c0_i32, %arg0, %c0_i32_0 : i32, i32, i32
  }
  func.func @transform_1(%arg0: i32) -> (i32, i32) {
    %c0_i32 = arith.constant 0 : i32
    %c0_i32_0 = arith.constant 0 : i32
    return %arg0, %c0_i32 : i32, i32
  }
  func.func @transform_2(%arg0: i32) -> (i32, i32) {
    %c0_i32 = arith.constant 0 : i32
    %c0_i32_0 = arith.constant 0 : i32
    %c0_i32_1 = arith.constant 0 : i32
    return %c0_i32, %c0_i32_0 : i32, i32
  }
  func.func @transform_3(%arg0: i32) -> (i32, i32) {
    %c0_i32 = arith.constant 0 : i32
    %c0_i32_0 = arith.constant 0 : i32
    %c0_i32_1 = arith.constant 0 : i32
    return %c0_i32, %c0_i32_0 : i32, i32
  }
  func.func @transform_4(%arg0: i32) -> (i32, i32) {
    %c0_i32 = arith.constant 0 : i32
    %c0_i32_0 = arith.constant 0 : i32
    %c0_i32_1 = arith.constant 0 : i32
    return %c0_i32, %c0_i32_0 : i32, i32
  }
  func.func @transform_5(%arg0: i32) -> (i32, i32) {
    %c0_i32 = arith.constant 0 : i32
    %c0_i32_0 = arith.constant 0 : i32
    %c0_i32_1 = arith.constant 0 : i32
    return %c0_i32, %c0_i32_0 : i32, i32
  }
  func.func @transform_6(%arg0: i32) -> (i32, i32) {
    %c0_i32 = arith.constant 0 : i32
    %c0_i32_0 = arith.constant 0 : i32
    %c0_i32_1 = arith.constant 0 : i32
    return %c0_i32, %c0_i32_0 : i32, i32
  }
  func.func @transform_7(%arg0: i32) -> (i32, i32) {
    %c0_i32 = arith.constant 0 : i32
    %c0_i32_0 = arith.constant 0 : i32
    %c0_i32_1 = arith.constant 0 : i32
    return %c0_i32, %c0_i32_0 : i32, i32
  }
  func.func @transform_8(%arg0: i32) -> (i32, i32) {
    %c0_i32 = arith.constant 0 : i32
    %c0_i32_0 = arith.constant 0 : i32
    %c0_i32_1 = arith.constant 0 : i32
    return %c0_i32, %c0_i32_0 : i32, i32
  }
  func.func @transform_9(%arg0: i32) -> (i32, i32) {
    %c0_i32 = arith.constant 0 : i32
    %c0_i32_0 = arith.constant 0 : i32
    %c0_i32_1 = arith.constant 0 : i32
    return %c0_i32, %c0_i32_0 : i32, i32
  }
  func.func @transform_10(%arg0: i32) -> (i32, i32) {
    %c0_i32 = arith.constant 0 : i32
    %c0_i32_0 = arith.constant 0 : i32
    %c0_i32_1 = arith.constant 0 : i32
    return %c0_i32, %c0_i32_0 : i32, i32
  }
  func.func @transform_11(%arg0: i32) -> (i32, i32) {
    %c0_i32 = arith.constant 0 : i32
    %c0_i32_0 = arith.constant 0 : i32
    %c0_i32_1 = arith.constant 0 : i32
    return %c0_i32, %c0_i32_0 : i32, i32
  }
  func.func @transform_12(%arg0: i32) -> (i32, i32) {
    %c0_i32 = arith.constant 0 : i32
    %c0_i32_0 = arith.constant 0 : i32
    %c0_i32_1 = arith.constant 0 : i32
    return %c0_i32, %c0_i32_0 : i32, i32
  }
  func.func @transform_13(%arg0: i32) -> (i32, i32) {
    %c0_i32 = arith.constant 0 : i32
    %c0_i32_0 = arith.constant 0 : i32
    return %arg0, %c0_i32 : i32, i32
  }
}

module attributes {stable_mosaic.version = 11 : i64} {
  func.func @kernel(%arg0: i32, %arg1: memref<8x8x8xf32, #tpu.memory_space<vmem>>, %arg2: memref<8x4xf32, #tpu.memory_space<vmem>>, %arg3: memref<8x128xf32, #tpu.memory_space<vmem>>, %arg4: memref<32x128xf32, #tpu.memory_space<vmem>>, %arg5: memref<1x128xf32, #tpu.memory_space<vmem>>, %arg6: memref<32x128xf32, #tpu.memory_space<vmem>>, %arg7: memref<32x128xf32, #tpu.memory_space<vmem>>, %arg8: memref<1x128xf32, #tpu.memory_space<vmem>>, %arg9: memref<32x128xf32, #tpu.memory_space<vmem>>, %arg10: memref<4x128xf32, #tpu.memory_space<vmem>>, %arg11: memref<1x128xf32, #tpu.memory_space<vmem>>, %arg12: memref<128x128xf32, #tpu.memory_space<vmem>>, %arg13: memref<1x128xf32, #tpu.memory_space<vmem>>, %arg14: memref<8x128xf32, #tpu.memory_space<vmem>>, %arg15: memref<8x8x128xf32, #tpu.memory_space<vmem>>, %arg16: memref<8x8x32xf32, #tpu.memory_space<vmem>>) attributes {dimension_semantics = [#tpu.dimension_semantics<parallel>], iteration_bounds = array<i64: 1>, scalar_prefetch = 0 : i64, scratch_operands = 2 : i64, tpu.core_type = #tpu.core_type<tc>, window_params = [{transform_indices = @transform_0, window_bounds = array<i64: 8, 8, 8>}, {transform_indices = @transform_1, window_bounds = array<i64: 8, 4>}, {pipeline_mode = #tpu.pipeline_mode<synchronous>, transform_indices = @transform_2, window_bounds = array<i64: 8, 128>}, {pipeline_mode = #tpu.pipeline_mode<synchronous>, transform_indices = @transform_3, window_bounds = array<i64: 32, 128>}, {pipeline_mode = #tpu.pipeline_mode<synchronous>, transform_indices = @transform_4, window_bounds = array<i64: 1, 128>}, {pipeline_mode = #tpu.pipeline_mode<synchronous>, transform_indices = @transform_5, window_bounds = array<i64: 32, 128>}, {pipeline_mode = #tpu.pipeline_mode<synchronous>, transform_indices = @transform_6, window_bounds = array<i64: 32, 128>}, {pipeline_mode = #tpu.pipeline_mode<synchronous>, transform_indices = @transform_7, window_bounds = array<i64: 1, 128>}, {pipeline_mode = #tpu.pipeline_mode<synchronous>, transform_indices = @transform_8, window_bounds = array<i64: 32, 128>}, {pipeline_mode = #tpu.pipeline_mode<synchronous>, transform_indices = @transform_9, window_bounds = array<i64: 4, 128>}, {pipeline_mode = #tpu.pipeline_mode<synchronous>, transform_indices = @transform_10, window_bounds = array<i64: 1, 128>}, {pipeline_mode = #tpu.pipeline_mode<synchronous>, transform_indices = @transform_11, window_bounds = array<i64: 128, 128>}, {pipeline_mode = #tpu.pipeline_mode<synchronous>, transform_indices = @transform_12, window_bounds = array<i64: 1, 128>}, {transform_indices = @transform_13, window_bounds = array<i64: 8, 128>}]} {
    %c0 = arith.constant 0 : index
    %c0_0 = arith.constant 0 : index
    %c0_1 = arith.constant 0 : index
    %0 = vector.load %arg1[%c0, %c0_0, %c0_1] : memref<8x8x8xf32, #tpu.memory_space<vmem>>, vector<8x8x8xf32>
    %1 = vector.shape_cast %0 : vector<8x8x8xf32> to vector<64x8xf32>
    %c0_2 = arith.constant 0 : index
    %c0_3 = arith.constant 0 : index
    %2 = vector.load %arg3[%c0_2, %c0_3] : memref<8x128xf32, #tpu.memory_space<vmem>>, vector<8x128xf32>
    %cst = arith.constant dense<0.000000e+00> : vector<64x128xf32>
    %3 = tpu.matmul %1, %2, %cst {dimension_numbers = #tpu.dot_dimension_numbers<[1], [0], [0], [1], [0, 0, 1, 1], [], []>} : vector<64x8xf32>, vector<8x128xf32>, vector<64x128xf32> -> vector<64x128xf32>
    %c0_4 = arith.constant 0 : index
    %c0_5 = arith.constant 0 : index
    %4 = vector.load %arg5[%c0_4, %c0_5] : memref<1x128xf32, #tpu.memory_space<vmem>>, vector<1x128xf32>
    %5 = vector.broadcast %4 : vector<1x128xf32> to vector<64x128xf32>
    %6 = arith.addf %3, %5 : vector<64x128xf32>
    %7 = vector.shape_cast %6 : vector<64x128xf32> to vector<8x8x128xf32>
    %c0_6 = arith.constant 0 : index
    %c0_7 = arith.constant 0 : index
    %c0_8 = arith.constant 0 : index
    %8 = vector.load %arg15[%c0_6, %c0_7, %c0_8] : memref<8x8x128xf32, #tpu.memory_space<vmem>>, vector<8x8x128xf32>
    tpu.vector_store %arg15[%c0_6, %c0_7, %c0_8], %7 {strides = array<i32>} : memref<8x8x128xf32, #tpu.memory_space<vmem>>, vector<8x8x128xf32>,
    %cst_9 = arith.constant 0.000000e+00 : f32
    %9 = vector.broadcast %cst_9 : f32 to vector<8x32xf32>
    %c0_i32 = arith.constant 0 : i32
    %10 = arith.index_cast %c0_i32 : i32 to index
    %c0_10 = arith.constant 0 : index
    %c0_11 = arith.constant 0 : index
    %11 = vector.load %arg15[%10, %c0_10, %c0_11] : memref<8x8x128xf32, #tpu.memory_space<vmem>>, vector<1x8x128xf32>
    %12 = vector.shape_cast %11 : vector<1x8x128xf32> to vector<8x128xf32>
    %c0_12 = arith.constant 0 : index
    %c0_13 = arith.constant 0 : index
    %13 = vector.load %arg4[%c0_12, %c0_13] : memref<32x128xf32, #tpu.memory_space<vmem>>, vector<32x128xf32>
    %cst_14 = arith.constant dense<0.000000e+00> : vector<8x128xf32>
    %14 = tpu.matmul %9, %13, %cst_14 {dimension_numbers = #tpu.dot_dimension_numbers<[1], [0], [0], [1], [0, 0, 1, 1], [], []>} : vector<8x32xf32>, vector<32x128xf32>, vector<8x128xf32> -> vector<8x128xf32>
    %15 = arith.addf %12, %14 : vector<8x128xf32>
    %16 = vector.extract_strided_slice %15 {offsets = [0, 0], sizes = [8, 96], strides = [1, 1]} : vector<8x128xf32> to vector<8x96xf32>
    %17 = arith.negf %16 : vector<8x96xf32>
    %18 = math.exp %17 : vector<8x96xf32>
    %cst_15 = arith.constant 1.000000e+00 : f32
    %19 = vector.broadcast %cst_15 : f32 to vector<8x96xf32>
    %20 = arith.addf %19, %18 : vector<8x96xf32>
    %21 = arith.divf %19, %20 : vector<8x96xf32>
    %22 = vector.extract_strided_slice %21 {offsets = [0, 0], sizes = [8, 32], strides = [1, 1]} : vector<8x96xf32> to vector<8x32xf32>
    %23 = vector.extract_strided_slice %21 {offsets = [0, 32], sizes = [8, 32], strides = [1, 1]} : vector<8x96xf32> to vector<8x32xf32>
    %24 = vector.extract_strided_slice %21 {offsets = [0, 64], sizes = [8, 32], strides = [1, 1]} : vector<8x96xf32> to vector<8x32xf32>
    %25 = vector.extract_strided_slice %15 {offsets = [0, 96], sizes = [8, 32], strides = [1, 1]} : vector<8x128xf32> to vector<8x32xf32>
    %26 = math.tanh %25 : vector<8x32xf32>
    %27 = arith.mulf %23, %9 : vector<8x32xf32>
    %28 = arith.mulf %22, %26 : vector<8x32xf32>
    %29 = arith.addf %27, %28 : vector<8x32xf32>
    %30 = math.tanh %29 : vector<8x32xf32>
    %31 = arith.mulf %24, %30 : vector<8x32xf32>
    %32 = arith.index_cast %c0_i32 : i32 to index
    %c0_16 = arith.constant 0 : index
    %c0_17 = arith.constant 0 : index
    %33 = vector.load %arg16[%32, %c0_16, %c0_17] : memref<8x8x32xf32, #tpu.memory_space<vmem>>, vector<1x8x32xf32>
    %34 = vector.shape_cast %33 : vector<1x8x32xf32> to vector<8x32xf32>
    %35 = vector.shape_cast %31 : vector<8x32xf32> to vector<1x8x32xf32>
    tpu.vector_store %arg16[%32, %c0_16, %c0_17], %35 {strides = array<i32>} : memref<8x8x32xf32, #tpu.memory_space<vmem>>, vector<1x8x32xf32>,
    %c1_i32 = arith.constant 1 : i32
    %36 = arith.index_cast %c1_i32 : i32 to index
    %c0_18 = arith.constant 0 : index
    %c0_19 = arith.constant 0 : index
    %37 = vector.load %arg15[%36, %c0_18, %c0_19] : memref<8x8x128xf32, #tpu.memory_space<vmem>>, vector<1x8x128xf32>
    %38 = vector.shape_cast %37 : vector<1x8x128xf32> to vector<8x128xf32>
    %c0_20 = arith.constant 0 : index
    %c0_21 = arith.constant 0 : index
    %39 = vector.load %arg4[%c0_20, %c0_21] : memref<32x128xf32, #tpu.memory_space<vmem>>, vector<32x128xf32>
    %cst_22 = arith.constant dense<0.000000e+00> : vector<8x128xf32>
    %40 = tpu.matmul %31, %39, %cst_22 {dimension_numbers = #tpu.dot_dimension_numbers<[1], [0], [0], [1], [0, 0, 1, 1], [], []>} : vector<8x32xf32>, vector<32x128xf32>, vector<8x128xf32> -> vector<8x128xf32>
    %41 = arith.addf %38, %40 : vector<8x128xf32>
    %42 = vector.extract_strided_slice %41 {offsets = [0, 0], sizes = [8, 96], strides = [1, 1]} : vector<8x128xf32> to vector<8x96xf32>
    %43 = arith.negf %42 : vector<8x96xf32>
    %44 = math.exp %43 : vector<8x96xf32>
    %cst_23 = arith.constant 1.000000e+00 : f32
    %45 = vector.broadcast %cst_23 : f32 to vector<8x96xf32>
    %46 = arith.addf %45, %44 : vector<8x96xf32>
    %47 = arith.divf %45, %46 : vector<8x96xf32>
    %48 = vector.extract_strided_slice %47 {offsets = [0, 0], sizes = [8, 32], strides = [1, 1]} : vector<8x96xf32> to vector<8x32xf32>
    %49 = vector.extract_strided_slice %47 {offsets = [0, 32], sizes = [8, 32], strides = [1, 1]} : vector<8x96xf32> to vector<8x32xf32>
    %50 = vector.extract_strided_slice %47 {offsets = [0, 64], sizes = [8, 32], strides = [1, 1]} : vector<8x96xf32> to vector<8x32xf32>
    %51 = vector.extract_strided_slice %41 {offsets = [0, 96], sizes = [8, 32], strides = [1, 1]} : vector<8x128xf32> to vector<8x32xf32>
    %52 = math.tanh %51 : vector<8x32xf32>
    %53 = arith.mulf %49, %29 : vector<8x32xf32>
    %54 = arith.mulf %48, %52 : vector<8x32xf32>
    %55 = arith.addf %53, %54 : vector<8x32xf32>
    %56 = math.tanh %55 : vector<8x32xf32>
    %57 = arith.mulf %50, %56 : vector<8x32xf32>
    %58 = arith.index_cast %c1_i32 : i32 to index
    %c0_24 = arith.constant 0 : index
    %c0_25 = arith.constant 0 : index
    %59 = vector.load %arg16[%58, %c0_24, %c0_25] : memref<8x8x32xf32, #tpu.memory_space<vmem>>, vector<1x8x32xf32>
    %60 = vector.shape_cast %59 : vector<1x8x32xf32> to vector<8x32xf32>
    %61 = vector.shape_cast %57 : vector<8x32xf32> to vector<1x8x32xf32>
    tpu.vector_store %arg16[%58, %c0_24, %c0_25], %61 {strides = array<i32>} : memref<8x8x32xf32, #tpu.memory_space<vmem>>, vector<1x8x32xf32>,
    %c2_i32 = arith.constant 2 : i32
    %62 = arith.index_cast %c2_i32 : i32 to index
    %c0_26 = arith.constant 0 : index
    %c0_27 = arith.constant 0 : index
    %63 = vector.load %arg15[%62, %c0_26, %c0_27] : memref<8x8x128xf32, #tpu.memory_space<vmem>>, vector<1x8x128xf32>
    %64 = vector.shape_cast %63 : vector<1x8x128xf32> to vector<8x128xf32>
    %c0_28 = arith.constant 0 : index
    %c0_29 = arith.constant 0 : index
    %65 = vector.load %arg4[%c0_28, %c0_29] : memref<32x128xf32, #tpu.memory_space<vmem>>, vector<32x128xf32>
    %cst_30 = arith.constant dense<0.000000e+00> : vector<8x128xf32>
    %66 = tpu.matmul %57, %65, %cst_30 {dimension_numbers = #tpu.dot_dimension_numbers<[1], [0], [0], [1], [0, 0, 1, 1], [], []>} : vector<8x32xf32>, vector<32x128xf32>, vector<8x128xf32> -> vector<8x128xf32>
    %67 = arith.addf %64, %66 : vector<8x128xf32>
    %68 = vector.extract_strided_slice %67 {offsets = [0, 0], sizes = [8, 96], strides = [1, 1]} : vector<8x128xf32> to vector<8x96xf32>
    %69 = arith.negf %68 : vector<8x96xf32>
    %70 = math.exp %69 : vector<8x96xf32>
    %cst_31 = arith.constant 1.000000e+00 : f32
    %71 = vector.broadcast %cst_31 : f32 to vector<8x96xf32>
    %72 = arith.addf %71, %70 : vector<8x96xf32>
    %73 = arith.divf %71, %72 : vector<8x96xf32>
    %74 = vector.extract_strided_slice %73 {offsets = [0, 0], sizes = [8, 32], strides = [1, 1]} : vector<8x96xf32> to vector<8x32xf32>
    %75 = vector.extract_strided_slice %73 {offsets = [0, 32], sizes = [8, 32], strides = [1, 1]} : vector<8x96xf32> to vector<8x32xf32>
    %76 = vector.extract_strided_slice %73 {offsets = [0, 64], sizes = [8, 32], strides = [1, 1]} : vector<8x96xf32> to vector<8x32xf32>
    %77 = vector.extract_strided_slice %67 {offsets = [0, 96], sizes = [8, 32], strides = [1, 1]} : vector<8x128xf32> to vector<8x32xf32>
    %78 = math.tanh %77 : vector<8x32xf32>
    %79 = arith.mulf %75, %55 : vector<8x32xf32>
    %80 = arith.mulf %74, %78 : vector<8x32xf32>
    %81 = arith.addf %79, %80 : vector<8x32xf32>
    %82 = math.tanh %81 : vector<8x32xf32>
    %83 = arith.mulf %76, %82 : vector<8x32xf32>
    %84 = arith.index_cast %c2_i32 : i32 to index
    %c0_32 = arith.constant 0 : index
    %c0_33 = arith.constant 0 : index
    %85 = vector.load %arg16[%84, %c0_32, %c0_33] : memref<8x8x32xf32, #tpu.memory_space<vmem>>, vector<1x8x32xf32>
    %86 = vector.shape_cast %85 : vector<1x8x32xf32> to vector<8x32xf32>
    %87 = vector.shape_cast %83 : vector<8x32xf32> to vector<1x8x32xf32>
    tpu.vector_store %arg16[%84, %c0_32, %c0_33], %87 {strides = array<i32>} : memref<8x8x32xf32, #tpu.memory_space<vmem>>, vector<1x8x32xf32>,
    %c3_i32 = arith.constant 3 : i32
    %88 = arith.index_cast %c3_i32 : i32 to index
    %c0_34 = arith.constant 0 : index
    %c0_35 = arith.constant 0 : index
    %89 = vector.load %arg15[%88, %c0_34, %c0_35] : memref<8x8x128xf32, #tpu.memory_space<vmem>>, vector<1x8x128xf32>
    %90 = vector.shape_cast %89 : vector<1x8x128xf32> to vector<8x128xf32>
    %c0_36 = arith.constant 0 : index
    %c0_37 = arith.constant 0 : index
    %91 = vector.load %arg4[%c0_36, %c0_37] : memref<32x128xf32, #tpu.memory_space<vmem>>, vector<32x128xf32>
    %cst_38 = arith.constant dense<0.000000e+00> : vector<8x128xf32>
    %92 = tpu.matmul %83, %91, %cst_38 {dimension_numbers = #tpu.dot_dimension_numbers<[1], [0], [0], [1], [0, 0, 1, 1], [], []>} : vector<8x32xf32>, vector<32x128xf32>, vector<8x128xf32> -> vector<8x128xf32>
    %93 = arith.addf %90, %92 : vector<8x128xf32>
    %94 = vector.extract_strided_slice %93 {offsets = [0, 0], sizes = [8, 96], strides = [1, 1]} : vector<8x128xf32> to vector<8x96xf32>
    %95 = arith.negf %94 : vector<8x96xf32>
    %96 = math.exp %95 : vector<8x96xf32>
    %cst_39 = arith.constant 1.000000e+00 : f32
    %97 = vector.broadcast %cst_39 : f32 to vector<8x96xf32>
    %98 = arith.addf %97, %96 : vector<8x96xf32>
    %99 = arith.divf %97, %98 : vector<8x96xf32>
    %100 = vector.extract_strided_slice %99 {offsets = [0, 0], sizes = [8, 32], strides = [1, 1]} : vector<8x96xf32> to vector<8x32xf32>
    %101 = vector.extract_strided_slice %99 {offsets = [0, 32], sizes = [8, 32], strides = [1, 1]} : vector<8x96xf32> to vector<8x32xf32>
    %102 = vector.extract_strided_slice %99 {offsets = [0, 64], sizes = [8, 32], strides = [1, 1]} : vector<8x96xf32> to vector<8x32xf32>
    %103 = vector.extract_strided_slice %93 {offsets = [0, 96], sizes = [8, 32], strides = [1, 1]} : vector<8x128xf32> to vector<8x32xf32>
    %104 = math.tanh %103 : vector<8x32xf32>
    %105 = arith.mulf %101, %81 : vector<8x32xf32>
    %106 = arith.mulf %100, %104 : vector<8x32xf32>
    %107 = arith.addf %105, %106 : vector<8x32xf32>
    %108 = math.tanh %107 : vector<8x32xf32>
    %109 = arith.mulf %102, %108 : vector<8x32xf32>
    %110 = arith.index_cast %c3_i32 : i32 to index
    %c0_40 = arith.constant 0 : index
    %c0_41 = arith.constant 0 : index
    %111 = vector.load %arg16[%110, %c0_40, %c0_41] : memref<8x8x32xf32, #tpu.memory_space<vmem>>, vector<1x8x32xf32>
    %112 = vector.shape_cast %111 : vector<1x8x32xf32> to vector<8x32xf32>
    %113 = vector.shape_cast %109 : vector<8x32xf32> to vector<1x8x32xf32>
    tpu.vector_store %arg16[%110, %c0_40, %c0_41], %113 {strides = array<i32>} : memref<8x8x32xf32, #tpu.memory_space<vmem>>, vector<1x8x32xf32>,
    %c4_i32 = arith.constant 4 : i32
    %114 = arith.index_cast %c4_i32 : i32 to index
    %c0_42 = arith.constant 0 : index
    %c0_43 = arith.constant 0 : index
    %115 = vector.load %arg15[%114, %c0_42, %c0_43] : memref<8x8x128xf32, #tpu.memory_space<vmem>>, vector<1x8x128xf32>
    %116 = vector.shape_cast %115 : vector<1x8x128xf32> to vector<8x128xf32>
    %c0_44 = arith.constant 0 : index
    %c0_45 = arith.constant 0 : index
    %117 = vector.load %arg4[%c0_44, %c0_45] : memref<32x128xf32, #tpu.memory_space<vmem>>, vector<32x128xf32>
    %cst_46 = arith.constant dense<0.000000e+00> : vector<8x128xf32>
    %118 = tpu.matmul %109, %117, %cst_46 {dimension_numbers = #tpu.dot_dimension_numbers<[1], [0], [0], [1], [0, 0, 1, 1], [], []>} : vector<8x32xf32>, vector<32x128xf32>, vector<8x128xf32> -> vector<8x128xf32>
    %119 = arith.addf %116, %118 : vector<8x128xf32>
    %120 = vector.extract_strided_slice %119 {offsets = [0, 0], sizes = [8, 96], strides = [1, 1]} : vector<8x128xf32> to vector<8x96xf32>
    %121 = arith.negf %120 : vector<8x96xf32>
    %122 = math.exp %121 : vector<8x96xf32>
    %cst_47 = arith.constant 1.000000e+00 : f32
    %123 = vector.broadcast %cst_47 : f32 to vector<8x96xf32>
    %124 = arith.addf %123, %122 : vector<8x96xf32>
    %125 = arith.divf %123, %124 : vector<8x96xf32>
    %126 = vector.extract_strided_slice %125 {offsets = [0, 0], sizes = [8, 32], strides = [1, 1]} : vector<8x96xf32> to vector<8x32xf32>
    %127 = vector.extract_strided_slice %125 {offsets = [0, 32], sizes = [8, 32], strides = [1, 1]} : vector<8x96xf32> to vector<8x32xf32>
    %128 = vector.extract_strided_slice %125 {offsets = [0, 64], sizes = [8, 32], strides = [1, 1]} : vector<8x96xf32> to vector<8x32xf32>
    %129 = vector.extract_strided_slice %119 {offsets = [0, 96], sizes = [8, 32], strides = [1, 1]} : vector<8x128xf32> to vector<8x32xf32>
    %130 = math.tanh %129 : vector<8x32xf32>
    %131 = arith.mulf %127, %107 : vector<8x32xf32>
    %132 = arith.mulf %126, %130 : vector<8x32xf32>
    %133 = arith.addf %131, %132 : vector<8x32xf32>
    %134 = math.tanh %133 : vector<8x32xf32>
    %135 = arith.mulf %128, %134 : vector<8x32xf32>
    %136 = arith.index_cast %c4_i32 : i32 to index
    %c0_48 = arith.constant 0 : index
    %c0_49 = arith.constant 0 : index
    %137 = vector.load %arg16[%136, %c0_48, %c0_49] : memref<8x8x32xf32, #tpu.memory_space<vmem>>, vector<1x8x32xf32>
    %138 = vector.shape_cast %137 : vector<1x8x32xf32> to vector<8x32xf32>
    %139 = vector.shape_cast %135 : vector<8x32xf32> to vector<1x8x32xf32>
    tpu.vector_store %arg16[%136, %c0_48, %c0_49], %139 {strides = array<i32>} : memref<8x8x32xf32, #tpu.memory_space<vmem>>, vector<1x8x32xf32>,
    %c5_i32 = arith.constant 5 : i32
    %140 = arith.index_cast %c5_i32 : i32 to index
    %c0_50 = arith.constant 0 : index
    %c0_51 = arith.constant 0 : index
    %141 = vector.load %arg15[%140, %c0_50, %c0_51] : memref<8x8x128xf32, #tpu.memory_space<vmem>>, vector<1x8x128xf32>
    %142 = vector.shape_cast %141 : vector<1x8x128xf32> to vector<8x128xf32>
    %c0_52 = arith.constant 0 : index
    %c0_53 = arith.constant 0 : index
    %143 = vector.load %arg4[%c0_52, %c0_53] : memref<32x128xf32, #tpu.memory_space<vmem>>, vector<32x128xf32>
    %cst_54 = arith.constant dense<0.000000e+00> : vector<8x128xf32>
    %144 = tpu.matmul %135, %143, %cst_54 {dimension_numbers = #tpu.dot_dimension_numbers<[1], [0], [0], [1], [0, 0, 1, 1], [], []>} : vector<8x32xf32>, vector<32x128xf32>, vector<8x128xf32> -> vector<8x128xf32>
    %145 = arith.addf %142, %144 : vector<8x128xf32>
    %146 = vector.extract_strided_slice %145 {offsets = [0, 0], sizes = [8, 96], strides = [1, 1]} : vector<8x128xf32> to vector<8x96xf32>
    %147 = arith.negf %146 : vector<8x96xf32>
    %148 = math.exp %147 : vector<8x96xf32>
    %cst_55 = arith.constant 1.000000e+00 : f32
    %149 = vector.broadcast %cst_55 : f32 to vector<8x96xf32>
    %150 = arith.addf %149, %148 : vector<8x96xf32>
    %151 = arith.divf %149, %150 : vector<8x96xf32>
    %152 = vector.extract_strided_slice %151 {offsets = [0, 0], sizes = [8, 32], strides = [1, 1]} : vector<8x96xf32> to vector<8x32xf32>
    %153 = vector.extract_strided_slice %151 {offsets = [0, 32], sizes = [8, 32], strides = [1, 1]} : vector<8x96xf32> to vector<8x32xf32>
    %154 = vector.extract_strided_slice %151 {offsets = [0, 64], sizes = [8, 32], strides = [1, 1]} : vector<8x96xf32> to vector<8x32xf32>
    %155 = vector.extract_strided_slice %145 {offsets = [0, 96], sizes = [8, 32], strides = [1, 1]} : vector<8x128xf32> to vector<8x32xf32>
    %156 = math.tanh %155 : vector<8x32xf32>
    %157 = arith.mulf %153, %133 : vector<8x32xf32>
    %158 = arith.mulf %152, %156 : vector<8x32xf32>
    %159 = arith.addf %157, %158 : vector<8x32xf32>
    %160 = math.tanh %159 : vector<8x32xf32>
    %161 = arith.mulf %154, %160 : vector<8x32xf32>
    %162 = arith.index_cast %c5_i32 : i32 to index
    %c0_56 = arith.constant 0 : index
    %c0_57 = arith.constant 0 : index
    %163 = vector.load %arg16[%162, %c0_56, %c0_57] : memref<8x8x32xf32, #tpu.memory_space<vmem>>, vector<1x8x32xf32>
    %164 = vector.shape_cast %163 : vector<1x8x32xf32> to vector<8x32xf32>
    %165 = vector.shape_cast %161 : vector<8x32xf32> to vector<1x8x32xf32>
    tpu.vector_store %arg16[%162, %c0_56, %c0_57], %165 {strides = array<i32>} : memref<8x8x32xf32, #tpu.memory_space<vmem>>, vector<1x8x32xf32>,
    %c6_i32 = arith.constant 6 : i32
    %166 = arith.index_cast %c6_i32 : i32 to index
    %c0_58 = arith.constant 0 : index
    %c0_59 = arith.constant 0 : index
    %167 = vector.load %arg15[%166, %c0_58, %c0_59] : memref<8x8x128xf32, #tpu.memory_space<vmem>>, vector<1x8x128xf32>
    %168 = vector.shape_cast %167 : vector<1x8x128xf32> to vector<8x128xf32>
    %c0_60 = arith.constant 0 : index
    %c0_61 = arith.constant 0 : index
    %169 = vector.load %arg4[%c0_60, %c0_61] : memref<32x128xf32, #tpu.memory_space<vmem>>, vector<32x128xf32>
    %cst_62 = arith.constant dense<0.000000e+00> : vector<8x128xf32>
    %170 = tpu.matmul %161, %169, %cst_62 {dimension_numbers = #tpu.dot_dimension_numbers<[1], [0], [0], [1], [0, 0, 1, 1], [], []>} : vector<8x32xf32>, vector<32x128xf32>, vector<8x128xf32> -> vector<8x128xf32>
    %171 = arith.addf %168, %170 : vector<8x128xf32>
    %172 = vector.extract_strided_slice %171 {offsets = [0, 0], sizes = [8, 96], strides = [1, 1]} : vector<8x128xf32> to vector<8x96xf32>
    %173 = arith.negf %172 : vector<8x96xf32>
    %174 = math.exp %173 : vector<8x96xf32>
    %cst_63 = arith.constant 1.000000e+00 : f32
    %175 = vector.broadcast %cst_63 : f32 to vector<8x96xf32>
    %176 = arith.addf %175, %174 : vector<8x96xf32>
    %177 = arith.divf %175, %176 : vector<8x96xf32>
    %178 = vector.extract_strided_slice %177 {offsets = [0, 0], sizes = [8, 32], strides = [1, 1]} : vector<8x96xf32> to vector<8x32xf32>
    %179 = vector.extract_strided_slice %177 {offsets = [0, 32], sizes = [8, 32], strides = [1, 1]} : vector<8x96xf32> to vector<8x32xf32>
    %180 = vector.extract_strided_slice %177 {offsets = [0, 64], sizes = [8, 32], strides = [1, 1]} : vector<8x96xf32> to vector<8x32xf32>
    %181 = vector.extract_strided_slice %171 {offsets = [0, 96], sizes = [8, 32], strides = [1, 1]} : vector<8x128xf32> to vector<8x32xf32>
    %182 = math.tanh %181 : vector<8x32xf32>
    %183 = arith.mulf %179, %159 : vector<8x32xf32>
    %184 = arith.mulf %178, %182 : vector<8x32xf32>
    %185 = arith.addf %183, %184 : vector<8x32xf32>
    %186 = math.tanh %185 : vector<8x32xf32>
    %187 = arith.mulf %180, %186 : vector<8x32xf32>
    %188 = arith.index_cast %c6_i32 : i32 to index
    %c0_64 = arith.constant 0 : index
    %c0_65 = arith.constant 0 : index
    %189 = vector.load %arg16[%188, %c0_64, %c0_65] : memref<8x8x32xf32, #tpu.memory_space<vmem>>, vector<1x8x32xf32>
    %190 = vector.shape_cast %189 : vector<1x8x32xf32> to vector<8x32xf32>
    %191 = vector.shape_cast %187 : vector<8x32xf32> to vector<1x8x32xf32>
    tpu.vector_store %arg16[%188, %c0_64, %c0_65], %191 {strides = array<i32>} : memref<8x8x32xf32, #tpu.memory_space<vmem>>, vector<1x8x32xf32>,
    %c7_i32 = arith.constant 7 : i32
    %192 = arith.index_cast %c7_i32 : i32 to index
    %c0_66 = arith.constant 0 : index
    %c0_67 = arith.constant 0 : index
    %193 = vector.load %arg15[%192, %c0_66, %c0_67] : memref<8x8x128xf32, #tpu.memory_space<vmem>>, vector<1x8x128xf32>
    %194 = vector.shape_cast %193 : vector<1x8x128xf32> to vector<8x128xf32>
    %c0_68 = arith.constant 0 : index
    %c0_69 = arith.constant 0 : index
    %195 = vector.load %arg4[%c0_68, %c0_69] : memref<32x128xf32, #tpu.memory_space<vmem>>, vector<32x128xf32>
    %cst_70 = arith.constant dense<0.000000e+00> : vector<8x128xf32>
    %196 = tpu.matmul %187, %195, %cst_70 {dimension_numbers = #tpu.dot_dimension_numbers<[1], [0], [0], [1], [0, 0, 1, 1], [], []>} : vector<8x32xf32>, vector<32x128xf32>, vector<8x128xf32> -> vector<8x128xf32>
    %197 = arith.addf %194, %196 : vector<8x128xf32>
    %198 = vector.extract_strided_slice %197 {offsets = [0, 0], sizes = [8, 96], strides = [1, 1]} : vector<8x128xf32> to vector<8x96xf32>
    %199 = arith.negf %198 : vector<8x96xf32>
    %200 = math.exp %199 : vector<8x96xf32>
    %cst_71 = arith.constant 1.000000e+00 : f32
    %201 = vector.broadcast %cst_71 : f32 to vector<8x96xf32>
    %202 = arith.addf %201, %200 : vector<8x96xf32>
    %203 = arith.divf %201, %202 : vector<8x96xf32>
    %204 = vector.extract_strided_slice %203 {offsets = [0, 0], sizes = [8, 32], strides = [1, 1]} : vector<8x96xf32> to vector<8x32xf32>
    %205 = vector.extract_strided_slice %203 {offsets = [0, 32], sizes = [8, 32], strides = [1, 1]} : vector<8x96xf32> to vector<8x32xf32>
    %206 = vector.extract_strided_slice %203 {offsets = [0, 64], sizes = [8, 32], strides = [1, 1]} : vector<8x96xf32> to vector<8x32xf32>
    %207 = vector.extract_strided_slice %197 {offsets = [0, 96], sizes = [8, 32], strides = [1, 1]} : vector<8x128xf32> to vector<8x32xf32>
    %208 = math.tanh %207 : vector<8x32xf32>
    %209 = arith.mulf %205, %185 : vector<8x32xf32>
    %210 = arith.mulf %204, %208 : vector<8x32xf32>
    %211 = arith.addf %209, %210 : vector<8x32xf32>
    %212 = math.tanh %211 : vector<8x32xf32>
    %213 = arith.mulf %206, %212 : vector<8x32xf32>
    %214 = arith.index_cast %c7_i32 : i32 to index
    %c0_72 = arith.constant 0 : index
    %c0_73 = arith.constant 0 : index
    %215 = vector.load %arg16[%214, %c0_72, %c0_73] : memref<8x8x32xf32, #tpu.memory_space<vmem>>, vector<1x8x32xf32>
    %216 = vector.shape_cast %215 : vector<1x8x32xf32> to vector<8x32xf32>
    %217 = vector.shape_cast %213 : vector<8x32xf32> to vector<1x8x32xf32>
    tpu.vector_store %arg16[%214, %c0_72, %c0_73], %217 {strides = array<i32>} : memref<8x8x32xf32, #tpu.memory_space<vmem>>, vector<1x8x32xf32>,
    %c8_i32 = arith.constant 8 : i32
    %c0_74 = arith.constant 0 : index
    %c0_75 = arith.constant 0 : index
    %c0_76 = arith.constant 0 : index
    %218 = vector.load %arg16[%c0_74, %c0_75, %c0_76] : memref<8x8x32xf32, #tpu.memory_space<vmem>>, vector<8x8x32xf32>
    %219 = vector.shape_cast %218 : vector<8x8x32xf32> to vector<64x32xf32>
    %c0_77 = arith.constant 0 : index
    %c0_78 = arith.constant 0 : index
    %220 = vector.load %arg6[%c0_77, %c0_78] : memref<32x128xf32, #tpu.memory_space<vmem>>, vector<32x128xf32>
    %cst_79 = arith.constant dense<0.000000e+00> : vector<64x128xf32>
    %221 = tpu.matmul %219, %220, %cst_79 {dimension_numbers = #tpu.dot_dimension_numbers<[1], [0], [0], [1], [0, 0, 1, 1], [], []>} : vector<64x32xf32>, vector<32x128xf32>, vector<64x128xf32> -> vector<64x128xf32>
    %c0_80 = arith.constant 0 : index
    %c0_81 = arith.constant 0 : index
    %222 = vector.load %arg8[%c0_80, %c0_81] : memref<1x128xf32, #tpu.memory_space<vmem>>, vector<1x128xf32>
    %223 = vector.broadcast %222 : vector<1x128xf32> to vector<64x128xf32>
    %224 = arith.addf %221, %223 : vector<64x128xf32>
    %225 = vector.shape_cast %224 : vector<64x128xf32> to vector<8x8x128xf32>
    %c0_82 = arith.constant 0 : index
    %c0_83 = arith.constant 0 : index
    %c0_84 = arith.constant 0 : index
    %226 = vector.load %arg15[%c0_82, %c0_83, %c0_84] : memref<8x8x128xf32, #tpu.memory_space<vmem>>, vector<8x8x128xf32>
    tpu.vector_store %arg15[%c0_82, %c0_83, %c0_84], %225 {strides = array<i32>} : memref<8x8x128xf32, #tpu.memory_space<vmem>>, vector<8x8x128xf32>,
    %cst_85 = arith.constant 0.000000e+00 : f32
    %227 = vector.broadcast %cst_85 : f32 to vector<8x32xf32>
    %c0_i32_86 = arith.constant 0 : i32
    %228 = arith.index_cast %c0_i32_86 : i32 to index
    %c0_87 = arith.constant 0 : index
    %c0_88 = arith.constant 0 : index
    %229 = vector.load %arg15[%228, %c0_87, %c0_88] : memref<8x8x128xf32, #tpu.memory_space<vmem>>, vector<1x8x128xf32>
    %230 = vector.shape_cast %229 : vector<1x8x128xf32> to vector<8x128xf32>
    %c0_89 = arith.constant 0 : index
    %c0_90 = arith.constant 0 : index
    %231 = vector.load %arg7[%c0_89, %c0_90] : memref<32x128xf32, #tpu.memory_space<vmem>>, vector<32x128xf32>
    %cst_91 = arith.constant dense<0.000000e+00> : vector<8x128xf32>
    %232 = tpu.matmul %227, %231, %cst_91 {dimension_numbers = #tpu.dot_dimension_numbers<[1], [0], [0], [1], [0, 0, 1, 1], [], []>} : vector<8x32xf32>, vector<32x128xf32>, vector<8x128xf32> -> vector<8x128xf32>
    %233 = arith.addf %230, %232 : vector<8x128xf32>
    %234 = vector.extract_strided_slice %233 {offsets = [0, 0], sizes = [8, 96], strides = [1, 1]} : vector<8x128xf32> to vector<8x96xf32>
    %235 = arith.negf %234 : vector<8x96xf32>
    %236 = math.exp %235 : vector<8x96xf32>
    %cst_92 = arith.constant 1.000000e+00 : f32
    %237 = vector.broadcast %cst_92 : f32 to vector<8x96xf32>
    %238 = arith.addf %237, %236 : vector<8x96xf32>
    %239 = arith.divf %237, %238 : vector<8x96xf32>
    %240 = vector.extract_strided_slice %239 {offsets = [0, 0], sizes = [8, 32], strides = [1, 1]} : vector<8x96xf32> to vector<8x32xf32>
    %241 = vector.extract_strided_slice %239 {offsets = [0, 32], sizes = [8, 32], strides = [1, 1]} : vector<8x96xf32> to vector<8x32xf32>
    %242 = vector.extract_strided_slice %239 {offsets = [0, 64], sizes = [8, 32], strides = [1, 1]} : vector<8x96xf32> to vector<8x32xf32>
    %243 = vector.extract_strided_slice %233 {offsets = [0, 96], sizes = [8, 32], strides = [1, 1]} : vector<8x128xf32> to vector<8x32xf32>
    %244 = math.tanh %243 : vector<8x32xf32>
    %245 = arith.mulf %241, %227 : vector<8x32xf32>
    %246 = arith.mulf %240, %244 : vector<8x32xf32>
    %247 = arith.addf %245, %246 : vector<8x32xf32>
    %248 = math.tanh %247 : vector<8x32xf32>
    %249 = arith.mulf %242, %248 : vector<8x32xf32>
    %c1_i32_93 = arith.constant 1 : i32
    %250 = arith.index_cast %c1_i32_93 : i32 to index
    %c0_94 = arith.constant 0 : index
    %c0_95 = arith.constant 0 : index
    %251 = vector.load %arg15[%250, %c0_94, %c0_95] : memref<8x8x128xf32, #tpu.memory_space<vmem>>, vector<1x8x128xf32>
    %252 = vector.shape_cast %251 : vector<1x8x128xf32> to vector<8x128xf32>
    %c0_96 = arith.constant 0 : index
    %c0_97 = arith.constant 0 : index
    %253 = vector.load %arg7[%c0_96, %c0_97] : memref<32x128xf32, #tpu.memory_space<vmem>>, vector<32x128xf32>
    %cst_98 = arith.constant dense<0.000000e+00> : vector<8x128xf32>
    %254 = tpu.matmul %249, %253, %cst_98 {dimension_numbers = #tpu.dot_dimension_numbers<[1], [0], [0], [1], [0, 0, 1, 1], [], []>} : vector<8x32xf32>, vector<32x128xf32>, vector<8x128xf32> -> vector<8x128xf32>
    %255 = arith.addf %252, %254 : vector<8x128xf32>
    %256 = vector.extract_strided_slice %255 {offsets = [0, 0], sizes = [8, 96], strides = [1, 1]} : vector<8x128xf32> to vector<8x96xf32>
    %257 = arith.negf %256 : vector<8x96xf32>
    %258 = math.exp %257 : vector<8x96xf32>
    %cst_99 = arith.constant 1.000000e+00 : f32
    %259 = vector.broadcast %cst_99 : f32 to vector<8x96xf32>
    %260 = arith.addf %259, %258 : vector<8x96xf32>
    %261 = arith.divf %259, %260 : vector<8x96xf32>
    %262 = vector.extract_strided_slice %261 {offsets = [0, 0], sizes = [8, 32], strides = [1, 1]} : vector<8x96xf32> to vector<8x32xf32>
    %263 = vector.extract_strided_slice %261 {offsets = [0, 32], sizes = [8, 32], strides = [1, 1]} : vector<8x96xf32> to vector<8x32xf32>
    %264 = vector.extract_strided_slice %261 {offsets = [0, 64], sizes = [8, 32], strides = [1, 1]} : vector<8x96xf32> to vector<8x32xf32>
    %265 = vector.extract_strided_slice %255 {offsets = [0, 96], sizes = [8, 32], strides = [1, 1]} : vector<8x128xf32> to vector<8x32xf32>
    %266 = math.tanh %265 : vector<8x32xf32>
    %267 = arith.mulf %263, %247 : vector<8x32xf32>
    %268 = arith.mulf %262, %266 : vector<8x32xf32>
    %269 = arith.addf %267, %268 : vector<8x32xf32>
    %270 = math.tanh %269 : vector<8x32xf32>
    %271 = arith.mulf %264, %270 : vector<8x32xf32>
    %c2_i32_100 = arith.constant 2 : i32
    %272 = arith.index_cast %c2_i32_100 : i32 to index
    %c0_101 = arith.constant 0 : index
    %c0_102 = arith.constant 0 : index
    %273 = vector.load %arg15[%272, %c0_101, %c0_102] : memref<8x8x128xf32, #tpu.memory_space<vmem>>, vector<1x8x128xf32>
    %274 = vector.shape_cast %273 : vector<1x8x128xf32> to vector<8x128xf32>
    %c0_103 = arith.constant 0 : index
    %c0_104 = arith.constant 0 : index
    %275 = vector.load %arg7[%c0_103, %c0_104] : memref<32x128xf32, #tpu.memory_space<vmem>>, vector<32x128xf32>
    %cst_105 = arith.constant dense<0.000000e+00> : vector<8x128xf32>
    %276 = tpu.matmul %271, %275, %cst_105 {dimension_numbers = #tpu.dot_dimension_numbers<[1], [0], [0], [1], [0, 0, 1, 1], [], []>} : vector<8x32xf32>, vector<32x128xf32>, vector<8x128xf32> -> vector<8x128xf32>
    %277 = arith.addf %274, %276 : vector<8x128xf32>
    %278 = vector.extract_strided_slice %277 {offsets = [0, 0], sizes = [8, 96], strides = [1, 1]} : vector<8x128xf32> to vector<8x96xf32>
    %279 = arith.negf %278 : vector<8x96xf32>
    %280 = math.exp %279 : vector<8x96xf32>
    %cst_106 = arith.constant 1.000000e+00 : f32
    %281 = vector.broadcast %cst_106 : f32 to vector<8x96xf32>
    %282 = arith.addf %281, %280 : vector<8x96xf32>
    %283 = arith.divf %281, %282 : vector<8x96xf32>
    %284 = vector.extract_strided_slice %283 {offsets = [0, 0], sizes = [8, 32], strides = [1, 1]} : vector<8x96xf32> to vector<8x32xf32>
    %285 = vector.extract_strided_slice %283 {offsets = [0, 32], sizes = [8, 32], strides = [1, 1]} : vector<8x96xf32> to vector<8x32xf32>
    %286 = vector.extract_strided_slice %283 {offsets = [0, 64], sizes = [8, 32], strides = [1, 1]} : vector<8x96xf32> to vector<8x32xf32>
    %287 = vector.extract_strided_slice %277 {offsets = [0, 96], sizes = [8, 32], strides = [1, 1]} : vector<8x128xf32> to vector<8x32xf32>
    %288 = math.tanh %287 : vector<8x32xf32>
    %289 = arith.mulf %285, %269 : vector<8x32xf32>
    %290 = arith.mulf %284, %288 : vector<8x32xf32>
    %291 = arith.addf %289, %290 : vector<8x32xf32>
    %292 = math.tanh %291 : vector<8x32xf32>
    %293 = arith.mulf %286, %292 : vector<8x32xf32>
    %c3_i32_107 = arith.constant 3 : i32
    %294 = arith.index_cast %c3_i32_107 : i32 to index
    %c0_108 = arith.constant 0 : index
    %c0_109 = arith.constant 0 : index
    %295 = vector.load %arg15[%294, %c0_108, %c0_109] : memref<8x8x128xf32, #tpu.memory_space<vmem>>, vector<1x8x128xf32>
    %296 = vector.shape_cast %295 : vector<1x8x128xf32> to vector<8x128xf32>
    %c0_110 = arith.constant 0 : index
    %c0_111 = arith.constant 0 : index
    %297 = vector.load %arg7[%c0_110, %c0_111] : memref<32x128xf32, #tpu.memory_space<vmem>>, vector<32x128xf32>
    %cst_112 = arith.constant dense<0.000000e+00> : vector<8x128xf32>
    %298 = tpu.matmul %293, %297, %cst_112 {dimension_numbers = #tpu.dot_dimension_numbers<[1], [0], [0], [1], [0, 0, 1, 1], [], []>} : vector<8x32xf32>, vector<32x128xf32>, vector<8x128xf32> -> vector<8x128xf32>
    %299 = arith.addf %296, %298 : vector<8x128xf32>
    %300 = vector.extract_strided_slice %299 {offsets = [0, 0], sizes = [8, 96], strides = [1, 1]} : vector<8x128xf32> to vector<8x96xf32>
    %301 = arith.negf %300 : vector<8x96xf32>
    %302 = math.exp %301 : vector<8x96xf32>
    %cst_113 = arith.constant 1.000000e+00 : f32
    %303 = vector.broadcast %cst_113 : f32 to vector<8x96xf32>
    %304 = arith.addf %303, %302 : vector<8x96xf32>
    %305 = arith.divf %303, %304 : vector<8x96xf32>
    %306 = vector.extract_strided_slice %305 {offsets = [0, 0], sizes = [8, 32], strides = [1, 1]} : vector<8x96xf32> to vector<8x32xf32>
    %307 = vector.extract_strided_slice %305 {offsets = [0, 32], sizes = [8, 32], strides = [1, 1]} : vector<8x96xf32> to vector<8x32xf32>
    %308 = vector.extract_strided_slice %305 {offsets = [0, 64], sizes = [8, 32], strides = [1, 1]} : vector<8x96xf32> to vector<8x32xf32>
    %309 = vector.extract_strided_slice %299 {offsets = [0, 96], sizes = [8, 32], strides = [1, 1]} : vector<8x128xf32> to vector<8x32xf32>
    %310 = math.tanh %309 : vector<8x32xf32>
    %311 = arith.mulf %307, %291 : vector<8x32xf32>
    %312 = arith.mulf %306, %310 : vector<8x32xf32>
    %313 = arith.addf %311, %312 : vector<8x32xf32>
    %314 = math.tanh %313 : vector<8x32xf32>
    %315 = arith.mulf %308, %314 : vector<8x32xf32>
    %c4_i32_114 = arith.constant 4 : i32
    %316 = arith.index_cast %c4_i32_114 : i32 to index
    %c0_115 = arith.constant 0 : index
    %c0_116 = arith.constant 0 : index
    %317 = vector.load %arg15[%316, %c0_115, %c0_116] : memref<8x8x128xf32, #tpu.memory_space<vmem>>, vector<1x8x128xf32>
    %318 = vector.shape_cast %317 : vector<1x8x128xf32> to vector<8x128xf32>
    %c0_117 = arith.constant 0 : index
    %c0_118 = arith.constant 0 : index
    %319 = vector.load %arg7[%c0_117, %c0_118] : memref<32x128xf32, #tpu.memory_space<vmem>>, vector<32x128xf32>
    %cst_119 = arith.constant dense<0.000000e+00> : vector<8x128xf32>
    %320 = tpu.matmul %315, %319, %cst_119 {dimension_numbers = #tpu.dot_dimension_numbers<[1], [0], [0], [1], [0, 0, 1, 1], [], []>} : vector<8x32xf32>, vector<32x128xf32>, vector<8x128xf32> -> vector<8x128xf32>
    %321 = arith.addf %318, %320 : vector<8x128xf32>
    %322 = vector.extract_strided_slice %321 {offsets = [0, 0], sizes = [8, 96], strides = [1, 1]} : vector<8x128xf32> to vector<8x96xf32>
    %323 = arith.negf %322 : vector<8x96xf32>
    %324 = math.exp %323 : vector<8x96xf32>
    %cst_120 = arith.constant 1.000000e+00 : f32
    %325 = vector.broadcast %cst_120 : f32 to vector<8x96xf32>
    %326 = arith.addf %325, %324 : vector<8x96xf32>
    %327 = arith.divf %325, %326 : vector<8x96xf32>
    %328 = vector.extract_strided_slice %327 {offsets = [0, 0], sizes = [8, 32], strides = [1, 1]} : vector<8x96xf32> to vector<8x32xf32>
    %329 = vector.extract_strided_slice %327 {offsets = [0, 32], sizes = [8, 32], strides = [1, 1]} : vector<8x96xf32> to vector<8x32xf32>
    %330 = vector.extract_strided_slice %327 {offsets = [0, 64], sizes = [8, 32], strides = [1, 1]} : vector<8x96xf32> to vector<8x32xf32>
    %331 = vector.extract_strided_slice %321 {offsets = [0, 96], sizes = [8, 32], strides = [1, 1]} : vector<8x128xf32> to vector<8x32xf32>
    %332 = math.tanh %331 : vector<8x32xf32>
    %333 = arith.mulf %329, %313 : vector<8x32xf32>
    %334 = arith.mulf %328, %332 : vector<8x32xf32>
    %335 = arith.addf %333, %334 : vector<8x32xf32>
    %336 = math.tanh %335 : vector<8x32xf32>
    %337 = arith.mulf %330, %336 : vector<8x32xf32>
    %c5_i32_121 = arith.constant 5 : i32
    %338 = arith.index_cast %c5_i32_121 : i32 to index
    %c0_122 = arith.constant 0 : index
    %c0_123 = arith.constant 0 : index
    %339 = vector.load %arg15[%338, %c0_122, %c0_123] : memref<8x8x128xf32, #tpu.memory_space<vmem>>, vector<1x8x128xf32>
    %340 = vector.shape_cast %339 : vector<1x8x128xf32> to vector<8x128xf32>
    %c0_124 = arith.constant 0 : index
    %c0_125 = arith.constant 0 : index
    %341 = vector.load %arg7[%c0_124, %c0_125] : memref<32x128xf32, #tpu.memory_space<vmem>>, vector<32x128xf32>
    %cst_126 = arith.constant dense<0.000000e+00> : vector<8x128xf32>
    %342 = tpu.matmul %337, %341, %cst_126 {dimension_numbers = #tpu.dot_dimension_numbers<[1], [0], [0], [1], [0, 0, 1, 1], [], []>} : vector<8x32xf32>, vector<32x128xf32>, vector<8x128xf32> -> vector<8x128xf32>
    %343 = arith.addf %340, %342 : vector<8x128xf32>
    %344 = vector.extract_strided_slice %343 {offsets = [0, 0], sizes = [8, 96], strides = [1, 1]} : vector<8x128xf32> to vector<8x96xf32>
    %345 = arith.negf %344 : vector<8x96xf32>
    %346 = math.exp %345 : vector<8x96xf32>
    %cst_127 = arith.constant 1.000000e+00 : f32
    %347 = vector.broadcast %cst_127 : f32 to vector<8x96xf32>
    %348 = arith.addf %347, %346 : vector<8x96xf32>
    %349 = arith.divf %347, %348 : vector<8x96xf32>
    %350 = vector.extract_strided_slice %349 {offsets = [0, 0], sizes = [8, 32], strides = [1, 1]} : vector<8x96xf32> to vector<8x32xf32>
    %351 = vector.extract_strided_slice %349 {offsets = [0, 32], sizes = [8, 32], strides = [1, 1]} : vector<8x96xf32> to vector<8x32xf32>
    %352 = vector.extract_strided_slice %349 {offsets = [0, 64], sizes = [8, 32], strides = [1, 1]} : vector<8x96xf32> to vector<8x32xf32>
    %353 = vector.extract_strided_slice %343 {offsets = [0, 96], sizes = [8, 32], strides = [1, 1]} : vector<8x128xf32> to vector<8x32xf32>
    %354 = math.tanh %353 : vector<8x32xf32>
    %355 = arith.mulf %351, %335 : vector<8x32xf32>
    %356 = arith.mulf %350, %354 : vector<8x32xf32>
    %357 = arith.addf %355, %356 : vector<8x32xf32>
    %358 = math.tanh %357 : vector<8x32xf32>
    %359 = arith.mulf %352, %358 : vector<8x32xf32>
    %c6_i32_128 = arith.constant 6 : i32
    %360 = arith.index_cast %c6_i32_128 : i32 to index
    %c0_129 = arith.constant 0 : index
    %c0_130 = arith.constant 0 : index
    %361 = vector.load %arg15[%360, %c0_129, %c0_130] : memref<8x8x128xf32, #tpu.memory_space<vmem>>, vector<1x8x128xf32>
    %362 = vector.shape_cast %361 : vector<1x8x128xf32> to vector<8x128xf32>
    %c0_131 = arith.constant 0 : index
    %c0_132 = arith.constant 0 : index
    %363 = vector.load %arg7[%c0_131, %c0_132] : memref<32x128xf32, #tpu.memory_space<vmem>>, vector<32x128xf32>
    %cst_133 = arith.constant dense<0.000000e+00> : vector<8x128xf32>
    %364 = tpu.matmul %359, %363, %cst_133 {dimension_numbers = #tpu.dot_dimension_numbers<[1], [0], [0], [1], [0, 0, 1, 1], [], []>} : vector<8x32xf32>, vector<32x128xf32>, vector<8x128xf32> -> vector<8x128xf32>
    %365 = arith.addf %362, %364 : vector<8x128xf32>
    %366 = vector.extract_strided_slice %365 {offsets = [0, 0], sizes = [8, 96], strides = [1, 1]} : vector<8x128xf32> to vector<8x96xf32>
    %367 = arith.negf %366 : vector<8x96xf32>
    %368 = math.exp %367 : vector<8x96xf32>
    %cst_134 = arith.constant 1.000000e+00 : f32
    %369 = vector.broadcast %cst_134 : f32 to vector<8x96xf32>
    %370 = arith.addf %369, %368 : vector<8x96xf32>
    %371 = arith.divf %369, %370 : vector<8x96xf32>
    %372 = vector.extract_strided_slice %371 {offsets = [0, 0], sizes = [8, 32], strides = [1, 1]} : vector<8x96xf32> to vector<8x32xf32>
    %373 = vector.extract_strided_slice %371 {offsets = [0, 32], sizes = [8, 32], strides = [1, 1]} : vector<8x96xf32> to vector<8x32xf32>
    %374 = vector.extract_strided_slice %371 {offsets = [0, 64], sizes = [8, 32], strides = [1, 1]} : vector<8x96xf32> to vector<8x32xf32>
    %375 = vector.extract_strided_slice %365 {offsets = [0, 96], sizes = [8, 32], strides = [1, 1]} : vector<8x128xf32> to vector<8x32xf32>
    %376 = math.tanh %375 : vector<8x32xf32>
    %377 = arith.mulf %373, %357 : vector<8x32xf32>
    %378 = arith.mulf %372, %376 : vector<8x32xf32>
    %379 = arith.addf %377, %378 : vector<8x32xf32>
    %380 = math.tanh %379 : vector<8x32xf32>
    %381 = arith.mulf %374, %380 : vector<8x32xf32>
    %c7_i32_135 = arith.constant 7 : i32
    %382 = arith.index_cast %c7_i32_135 : i32 to index
    %c0_136 = arith.constant 0 : index
    %c0_137 = arith.constant 0 : index
    %383 = vector.load %arg15[%382, %c0_136, %c0_137] : memref<8x8x128xf32, #tpu.memory_space<vmem>>, vector<1x8x128xf32>
    %384 = vector.shape_cast %383 : vector<1x8x128xf32> to vector<8x128xf32>
    %c0_138 = arith.constant 0 : index
    %c0_139 = arith.constant 0 : index
    %385 = vector.load %arg7[%c0_138, %c0_139] : memref<32x128xf32, #tpu.memory_space<vmem>>, vector<32x128xf32>
    %cst_140 = arith.constant dense<0.000000e+00> : vector<8x128xf32>
    %386 = tpu.matmul %381, %385, %cst_140 {dimension_numbers = #tpu.dot_dimension_numbers<[1], [0], [0], [1], [0, 0, 1, 1], [], []>} : vector<8x32xf32>, vector<32x128xf32>, vector<8x128xf32> -> vector<8x128xf32>
    %387 = arith.addf %384, %386 : vector<8x128xf32>
    %388 = vector.extract_strided_slice %387 {offsets = [0, 0], sizes = [8, 96], strides = [1, 1]} : vector<8x128xf32> to vector<8x96xf32>
    %389 = arith.negf %388 : vector<8x96xf32>
    %390 = math.exp %389 : vector<8x96xf32>
    %cst_141 = arith.constant 1.000000e+00 : f32
    %391 = vector.broadcast %cst_141 : f32 to vector<8x96xf32>
    %392 = arith.addf %391, %390 : vector<8x96xf32>
    %393 = arith.divf %391, %392 : vector<8x96xf32>
    %394 = vector.extract_strided_slice %393 {offsets = [0, 0], sizes = [8, 32], strides = [1, 1]} : vector<8x96xf32> to vector<8x32xf32>
    %395 = vector.extract_strided_slice %393 {offsets = [0, 32], sizes = [8, 32], strides = [1, 1]} : vector<8x96xf32> to vector<8x32xf32>
    %396 = vector.extract_strided_slice %393 {offsets = [0, 64], sizes = [8, 32], strides = [1, 1]} : vector<8x96xf32> to vector<8x32xf32>
    %397 = vector.extract_strided_slice %387 {offsets = [0, 96], sizes = [8, 32], strides = [1, 1]} : vector<8x128xf32> to vector<8x32xf32>
    %398 = math.tanh %397 : vector<8x32xf32>
    %399 = arith.mulf %395, %379 : vector<8x32xf32>
    %400 = arith.mulf %394, %398 : vector<8x32xf32>
    %401 = arith.addf %399, %400 : vector<8x32xf32>
    %402 = math.tanh %401 : vector<8x32xf32>
    %403 = arith.mulf %396, %402 : vector<8x32xf32>
    %c8_i32_142 = arith.constant 8 : i32
    %c0_143 = arith.constant 0 : index
    %c0_144 = arith.constant 0 : index
    %404 = vector.load %arg2[%c0_143, %c0_144] : memref<8x4xf32, #tpu.memory_space<vmem>>, vector<8x4xf32>
    %c0_145 = arith.constant 0 : index
    %c0_146 = arith.constant 0 : index
    %405 = vector.load %arg9[%c0_145, %c0_146] : memref<32x128xf32, #tpu.memory_space<vmem>>, vector<32x128xf32>
    %cst_147 = arith.constant dense<0.000000e+00> : vector<8x128xf32>
    %406 = tpu.matmul %403, %405, %cst_147 {dimension_numbers = #tpu.dot_dimension_numbers<[1], [0], [0], [1], [0, 0, 1, 1], [], []>} : vector<8x32xf32>, vector<32x128xf32>, vector<8x128xf32> -> vector<8x128xf32>
    %c0_148 = arith.constant 0 : index
    %c0_149 = arith.constant 0 : index
    %407 = vector.load %arg10[%c0_148, %c0_149] : memref<4x128xf32, #tpu.memory_space<vmem>>, vector<4x128xf32>
    %cst_150 = arith.constant dense<0.000000e+00> : vector<8x128xf32>
    %408 = tpu.matmul %404, %407, %cst_150 {dimension_numbers = #tpu.dot_dimension_numbers<[1], [0], [0], [1], [0, 0, 1, 1], [], []>} : vector<8x4xf32>, vector<4x128xf32>, vector<8x128xf32> -> vector<8x128xf32>
    %409 = arith.addf %406, %408 : vector<8x128xf32>
    %c0_151 = arith.constant 0 : index
    %c0_152 = arith.constant 0 : index
    %410 = vector.load %arg11[%c0_151, %c0_152] : memref<1x128xf32, #tpu.memory_space<vmem>>, vector<1x128xf32>
    %411 = vector.broadcast %410 : vector<1x128xf32> to vector<8x128xf32>
    %412 = arith.addf %409, %411 : vector<8x128xf32>
    %cst_153 = arith.constant 0.000000e+00 : f32
    %413 = vector.broadcast %cst_153 : f32 to vector<8x128xf32>
    %414 = arith.maximumf %412, %413 : vector<8x128xf32>
    %c0_154 = arith.constant 0 : index
    %c0_155 = arith.constant 0 : index
    %415 = vector.load %arg12[%c0_154, %c0_155] : memref<128x128xf32, #tpu.memory_space<vmem>>, vector<128x128xf32>
    %cst_156 = arith.constant dense<0.000000e+00> : vector<8x128xf32>
    %416 = tpu.matmul %414, %415, %cst_156 {dimension_numbers = #tpu.dot_dimension_numbers<[1], [0], [0], [1], [0, 0, 1, 1], [], []>} : vector<8x128xf32>, vector<128x128xf32>, vector<8x128xf32> -> vector<8x128xf32>
    %c0_157 = arith.constant 0 : index
    %c0_158 = arith.constant 0 : index
    %417 = vector.load %arg13[%c0_157, %c0_158] : memref<1x128xf32, #tpu.memory_space<vmem>>, vector<1x128xf32>
    %418 = vector.broadcast %417 : vector<1x128xf32> to vector<8x128xf32>
    %419 = arith.addf %416, %418 : vector<8x128xf32>
    %c0_159 = arith.constant 0 : index
    %c0_160 = arith.constant 0 : index
    %420 = vector.load %arg14[%c0_159, %c0_160] : memref<8x128xf32, #tpu.memory_space<vmem>>, vector<8x128xf32>
    tpu.vector_store %arg14[%c0_159, %c0_160], %419 {strides = array<i32>} : memref<8x128xf32, #tpu.memory_space<vmem>>, vector<8x128xf32>,
    return
  }
  func.func @transform_0(%arg0: i32) -> (i32, i32, i32) {
    %c0_i32 = arith.constant 0 : i32
    %c0_i32_0 = arith.constant 0 : i32
    %c0_i32_1 = arith.constant 0 : i32
    return %c0_i32, %arg0, %c0_i32_0 : i32, i32, i32
  }
  func.func @transform_1(%arg0: i32) -> (i32, i32) {
    %c0_i32 = arith.constant 0 : i32
    %c0_i32_0 = arith.constant 0 : i32
    return %arg0, %c0_i32 : i32, i32
  }
  func.func @transform_2(%arg0: i32) -> (i32, i32) {
    %c0_i32 = arith.constant 0 : i32
    %c0_i32_0 = arith.constant 0 : i32
    %c0_i32_1 = arith.constant 0 : i32
    return %c0_i32, %c0_i32_0 : i32, i32
  }
  func.func @transform_3(%arg0: i32) -> (i32, i32) {
    %c0_i32 = arith.constant 0 : i32
    %c0_i32_0 = arith.constant 0 : i32
    %c0_i32_1 = arith.constant 0 : i32
    return %c0_i32, %c0_i32_0 : i32, i32
  }
  func.func @transform_4(%arg0: i32) -> (i32, i32) {
    %c0_i32 = arith.constant 0 : i32
    %c0_i32_0 = arith.constant 0 : i32
    %c0_i32_1 = arith.constant 0 : i32
    return %c0_i32, %c0_i32_0 : i32, i32
  }
  func.func @transform_5(%arg0: i32) -> (i32, i32) {
    %c0_i32 = arith.constant 0 : i32
    %c0_i32_0 = arith.constant 0 : i32
    %c0_i32_1 = arith.constant 0 : i32
    return %c0_i32, %c0_i32_0 : i32, i32
  }
  func.func @transform_6(%arg0: i32) -> (i32, i32) {
    %c0_i32 = arith.constant 0 : i32
    %c0_i32_0 = arith.constant 0 : i32
    %c0_i32_1 = arith.constant 0 : i32
    return %c0_i32, %c0_i32_0 : i32, i32
  }
  func.func @transform_7(%arg0: i32) -> (i32, i32) {
    %c0_i32 = arith.constant 0 : i32
    %c0_i32_0 = arith.constant 0 : i32
    %c0_i32_1 = arith.constant 0 : i32
    return %c0_i32, %c0_i32_0 : i32, i32
  }
  func.func @transform_8(%arg0: i32) -> (i32, i32) {
    %c0_i32 = arith.constant 0 : i32
    %c0_i32_0 = arith.constant 0 : i32
    %c0_i32_1 = arith.constant 0 : i32
    return %c0_i32, %c0_i32_0 : i32, i32
  }
  func.func @transform_9(%arg0: i32) -> (i32, i32) {
    %c0_i32 = arith.constant 0 : i32
    %c0_i32_0 = arith.constant 0 : i32
    %c0_i32_1 = arith.constant 0 : i32
    return %c0_i32, %c0_i32_0 : i32, i32
  }
  func.func @transform_10(%arg0: i32) -> (i32, i32) {
    %c0_i32 = arith.constant 0 : i32
    %c0_i32_0 = arith.constant 0 : i32
    %c0_i32_1 = arith.constant 0 : i32
    return %c0_i32, %c0_i32_0 : i32, i32
  }
  func.func @transform_11(%arg0: i32) -> (i32, i32) {
    %c0_i32 = arith.constant 0 : i32
    %c0_i32_0 = arith.constant 0 : i32
    %c0_i32_1 = arith.constant 0 : i32
    return %c0_i32, %c0_i32_0 : i32, i32
  }
  func.func @transform_12(%arg0: i32) -> (i32, i32) {
    %c0_i32 = arith.constant 0 : i32
    %c0_i32_0 = arith.constant 0 : i32
    %c0_i32_1 = arith.constant 0 : i32
    return %c0_i32, %c0_i32_0 : i32, i32
  }
  func.func @transform_13(%arg0: i32) -> (i32, i32) {
    %c0_i32 = arith.constant 0 : i32
    %c0_i32_0 = arith.constant 0 : i32
    return %arg0, %c0_i32 : i32, i32
  }
}

</mosaic_0001>

<bundles_post_ra>
// kernel: tpu_custom_call.1
= control target key start
LH: loop header
LB: loop body
LE: loop exit
PB: predicated region body
PF: predicated region fallthrough
CT: control target
= control target key end

     0   :  { %18 = vsyncpa [#allocation5], 0  ;;  %s3774_s0 = inlined_call_operand.hbm [shape: f32[8,8,8], index: 0, kind: input, shape index: {}]   ;;  %s3775_s1 = inlined_call_operand.vmem [shape: f32[8,4], index: 1, kind: input, shape index: {}]   ;;  %s3776_s2 = inlined_call_operand.hbm [shape: f32[8,128], index: 2, kind: input, shape index: {}]   ;;  %s3777_s3 = inlined_call_operand.hbm [shape: f32[32,128], index: 3, kind: input, shape index: {}]   ;;  %s3778_s4 = inlined_call_operand.vmem [shape: f32[1,128], index: 4, kind: input, shape index: {}]   ;;  %s3779_s5 = inlined_call_operand.hbm [shape: f32[32,128], index: 5, kind: input, shape index: {}]   ;;  %s3780_s6 = inlined_call_operand.vmem [shape: f32[32,128], index: 6, kind: input, shape index: {}]   ;;  %s3781_s7 = inlined_call_operand.vmem [shape: f32[1,128], index: 7, kind: input, shape index: {}]   ;;  %s3782_s8 = inlined_call_operand.hbm [shape: f32[32,128], index: 8, kind: input, shape index: {}]   ;;  %s3783_s9 = inlined_call_operand.vmem [shape: f32[4,128], index: 9, kind: input, shape index: {}]   ;;  %s3784_s10 = inlined_call_operand.vmem [shape: f32[1,128], index: 10, kind: input, shape index: {}]   ;;  %s3785_s11 = inlined_call_operand.hbm [shape: f32[128,128], index: 11, kind: input, shape index: {}]   ;;  %s3786_s12 = inlined_call_operand.vmem [shape: f32[1,128], index: 12, kind: input, shape index: {}]   ;;  %s3787_s13 = inlined_call_operand.hbm [shape: f32[8,128], index: 13, kind: output, shape index: {}]  }
   0x1   :  { %19 = vsyncpa [#allocation8], 0 }
   0x2   :  { %20 = vsyncpa [#allocation11], 0 }
   0x3   :  { %21 = vsyncpa [#allocation14], 0 }
   0x4   :  { %22 = vsyncpa [#allocation6], 0  ;;  %s3275_s25 = smov [#allocation7]   ;;  %s3111_s29 = scalar_lea.hbm %s3776_s2, 128 }
   0x5   :  { %s43_s26 = sshll.u32 %s3275_s25, 4  ;;  %p3112_p0 = scmp.ne.s32.totalorder %s3776_s2, %s3111_s29  ;;  %s44_s26 = int_to_ptr.vmem [resolvable:$true] %s43_s26 }
   0x6   :  { %p3115_p1 = scmp.lt.u32.totalorder %s3111_s29, %s3776_s2 }
   0x8   :  { %p3117_p2 = pnand %p3115_p1, %p3112_p0 }
   0xa   :  { %3120 = shalt.err (!%p3117_p2)
}
   0xb   :  { %s3121_s17 = scalar_lea.vmem %s44_s26, 128  ;;  %p3126_p4 = scmp.lt.s32.totalorder %s44_s26, %s44_s26 }
   0xc   :  { %p3122_p3 = scmp.ne.s32.totalorder %s44_s26, %s3121_s17  ;;  %p3127_p5 = scmp.lt.s32.totalorder %s3121_s17, %s3121_s17 }
   0xe   :  { %p3128_p6 = por %p3127_p5, %p3126_p4 }
  0x10   :  { %p3129_p7 = pnand %p3128_p6, %p3122_p3 }
  0x12   :  { %3132 = shalt.err (!%p3129_p7)
}
  0x13   :  { %46 = dma.hbm_to_vmem [thread:$0]  %s3776_s2, 128, %s44_s26, [#allocation8]  }
  0x14   :  { %s3276_s20 = smov [#allocation10]   ;;  %s3277_s22 = smov [#allocation4]  }
  0x15   :  { %s66_s21 = sshll.u32 %s3276_s20, 4  ;;  %s28_s23 = sshll.u32 %s3277_s22, 4  ;;  %s67_s21 = int_to_ptr.vmem [resolvable:$true] %s66_s21  ;;  %s29_s23 = int_to_ptr.vmem [resolvable:$true] %s28_s23 }
  0x16   :  { %s3133_s27 = scalar_lea.hbm %s3779_s5, 512 }
  0x17   :  { %p3134_p8 = scmp.ne.s32.totalorder %s3779_s5, %s3133_s27  ;;  %p3137_p9 = scmp.lt.u32.totalorder %s3133_s27, %s3779_s5 }
  0x19   :  { %p3139_p10 = pnand %p3137_p9, %p3134_p8 }
  0x1b   :  { %3142 = shalt.err (!%p3139_p10)
}
  0x1c   :  { %s3143_s2 = scalar_lea.vmem %s67_s21, 512  ;;  %p3148_p12 = scmp.lt.s32.totalorder %s67_s21, %s67_s21 }
  0x1d   :  { %p3144_p11 = scmp.ne.s32.totalorder %s67_s21, %s3143_s2  ;;  %p3149_p13 = scmp.lt.s32.totalorder %s3143_s2, %s3143_s2 }
  0x1f   :  { %p3150_p0 = por %p3149_p13, %p3148_p12 }
  0x21   :  { %p3151_p1 = pnand %p3150_p0, %p3144_p11 }
  0x23   :  { %3154 = shalt.err (!%p3151_p1)
}
  0x24   :  { %s3278_s26 = smov 128   ;;  %s3279_s15 = smov 8  }
  0x25   :  { %72 = dma.hbm_to_vmem [thread:$0]  %s3779_s5, 512, %s67_s21, [#allocation11], %s3278_s26, %s3278_s26, %s3279_s15  }
  0x26   :  { %s3155_s20 = scalar_lea.hbm %s3774_s0, 1024 }
  0x27   :  { %p3156_p2 = scmp.ne.s32.totalorder %s3774_s0, %s3155_s20  ;;  %p3159_p3 = scmp.lt.u32.totalorder %s3155_s20, %s3774_s0 }
  0x29   :  { %p3161_p4 = pnand %p3159_p3, %p3156_p2 }
  0x2b   :  { %3164 = shalt.err (!%p3161_p4)
}
  0x2c   :  { %s3165_s28 = scalar_lea.vmem %s29_s23, 1024  ;;  %p3170_p6 = scmp.lt.s32.totalorder %s29_s23, %s29_s23 }
  0x2d   :  { %p3166_p5 = scmp.ne.s32.totalorder %s29_s23, %s3165_s28  ;;  %p3171_p7 = scmp.lt.s32.totalorder %s3165_s28, %s3165_s28 }
  0x2f   :  { %p3172_p8 = por %p3171_p7, %p3170_p6 }
  0x31   :  { %p3173_p9 = pnand %p3172_p8, %p3166_p5 }
  0x33   :  { %3176 = shalt.err (!%p3173_p9)
}
  0x34   :  { %34 = dma.hbm_to_vmem [thread:$0]  %s3774_s0, 1024, %s29_s23, [#allocation5], %s3278_s26, %s3278_s26, %s3279_s15  }
  0x35   :  { %s3280_s29 = smov [#allocation9]   ;;  %s3281_s14 = smov [#allocation12]  }
  0x36   :  { %s52_s30 = sshll.u32 %s3280_s29, 4  ;;  %s82_s2 = sshll.u32 %s3281_s14, 4  ;;  %s53_s30 = int_to_ptr.vmem [resolvable:$true] %s52_s30  ;;  %s83_s2 = int_to_ptr.vmem [resolvable:$true] %s82_s2 }
  0x37   :  { %s3177_s18 = scalar_lea.hbm %s3777_s3, 512 }
  0x38   :  { %p3178_p10 = scmp.ne.s32.totalorder %s3777_s3, %s3177_s18  ;;  %p3181_p11 = scmp.lt.u32.totalorder %s3177_s18, %s3777_s3 }
  0x3a   :  { %p3183_p12 = pnand %p3181_p11, %p3178_p10 }
  0x3c   :  { %3186 = shalt.err (!%p3183_p12)
}
  0x3d   :  { %s3187_s0 = scalar_lea.vmem %s53_s30, 512  ;;  %p3192_p0 = scmp.lt.s32.totalorder %s53_s30, %s53_s30 }
  0x3e   :  { %p3188_p13 = scmp.ne.s32.totalorder %s53_s30, %s3187_s0  ;;  %p3193_p1 = scmp.lt.s32.totalorder %s3187_s0, %s3187_s0 }
  0x40   :  { %p3194_p2 = por %p3193_p1, %p3192_p0 }
  0x42   :  { %p3195_p3 = pnand %p3194_p2, %p3188_p13 }
  0x44   :  { %3198 = shalt.err (!%p3195_p3)
}
  0x45   :  { %58 = dma.hbm_to_vmem [thread:$0]  %s3777_s3, 512, %s53_s30, [#allocation8], %s3278_s26, %s3278_s26, %s3279_s15  }
  0x46   :  { %s3199_s5 = scalar_lea.hbm %s3782_s8, 512 }
  0x47   :  { %p3200_p4 = scmp.ne.s32.totalorder %s3782_s8, %s3199_s5  ;;  %p3203_p5 = scmp.lt.u32.totalorder %s3199_s5, %s3782_s8 }
  0x49   :  { %p3205_p6 = pnand %p3203_p5, %p3200_p4 }
  0x4b   :  { %3208 = shalt.err (!%p3205_p6)
}
  0x4c   :  { %s3209_s17 = scalar_lea.vmem %s83_s2, 512  ;;  %p3214_p8 = scmp.lt.s32.totalorder %s83_s2, %s83_s2 }
  0x4d   :  { %p3210_p7 = scmp.ne.s32.totalorder %s83_s2, %s3209_s17  ;;  %p3215_p9 = scmp.lt.s32.totalorder %s3209_s17, %s3209_s17 }
  0x4f   :  { %p3216_p10 = por %p3215_p9, %p3214_p8 }
  0x51   :  { %p3217_p11 = pnand %p3216_p10, %p3210_p7 }
  0x53   :  { %3220 = shalt.err (!%p3217_p11)
}
  0x54   :  { %88 = dma.hbm_to_vmem [thread:$0]  %s3782_s8, 512, %s83_s2, [#allocation11], %s3278_s26, %s3278_s26, %s3279_s15  }
  0x55   :  { %s3282_s18 = smov [#allocation13]   ;;  %s3221_s24 = scalar_lea.hbm %s3785_s11, 2048 }
  0x56   :  { %s98_s19 = sshll.u32 %s3282_s18, 4  ;;  %p3222_p12 = scmp.ne.s32.totalorder %s3785_s11, %s3221_s24  ;;  %s99_s19 = int_to_ptr.vmem [resolvable:$true] %s98_s19 }
  0x57   :  { %p3225_p13 = scmp.lt.u32.totalorder %s3221_s24, %s3785_s11 }
  0x59   :  { %p3227_p0 = pnand %p3225_p13, %p3222_p12 }
  0x5b   :  { %3230 = shalt.err (!%p3227_p0)
}
  0x5c   :  { %s3231_s28 = scalar_lea.vmem %s99_s19, 2048  ;;  %p3236_p2 = scmp.lt.s32.totalorder %s99_s19, %s99_s19 }
  0x5d   :  { %p3232_p1 = scmp.ne.s32.totalorder %s99_s19, %s3231_s28  ;;  %p3237_p3 = scmp.lt.s32.totalorder %s3231_s28, %s3231_s28 }
  0x5f   :  { %p3238_p4 = por %p3237_p3, %p3236_p2 }
  0x61   :  { %p3239_p5 = pnand %p3238_p4, %p3232_p1 }
  0x63   :  { %3242 = shalt.err (!%p3239_p5)
}
  0x64   :  { %104 = dma.hbm_to_vmem [thread:$0]  %s3785_s11, 2048, %s99_s19, [#allocation14], %s3278_s26, %s3278_s26, %s3279_s15  }
  0x65   :  { %3265 = dma.done.wait [#allocation5], 1024  }
  0x66   :  { %3266 = vsyncadd [#allocation5], 4294966272 }
  0x67   :  { %3267 = dma.done.wait [#allocation8], 640  }
  0x68   :  { %3268 = vsyncadd [#allocation8], 4294966656 }
  0x69   :  { %3269 = dma.done.wait [#allocation11], 1024  }
  0x6a   :  { %3270 = vsyncadd [#allocation11], 4294966272 }
  0x6b   :  { %3271 = dma.done.wait [#allocation14], 2048  }
  0x6c   :  { %3272 = vsyncadd [#allocation14], 4294965248  ;;  %vm141_vm0 = vcmask 64512   ;;  %v133_v0 = vld [vmem:[#allocation7] sm:$0xff]  ;;  %v126_v2 = vld [vmem:[#allocation4 + $0x8] sm:$0xff]  ;;  %v3283_v9 = vmov 0.0|0.0  }
  0x6d   :  { %v125_v1 = vld [vmem:[#allocation4] sm:$0xff]  ;;  %2572 = vmatprep.subr.mxu0 %v133_v0  ;;  %v280_v3 = vld [vmem:[#allocation9] sm:$0xff]  ;;  %v281_v4 = vld [vmem:[#allocation9 + $0x8] sm:$0xff]  ;;  %2967 = vmatprep.subr.mxu1 %v133_v0  ;;  %vm3284_vm1 = vmmov 0   ;;  %v3285_v12 = vmov 0.0   ;;  %s3286_s15 = smov 32  }
  0x6e   :  { %2574 = vmatprep.mubr.msk.f32.mxu0 %vm141_vm0, %v125_v1  ;;  %v127_v5 = vld [vmem:[#allocation4 + $0x10] sm:$0xff]  ;;  %2573 = vmatpush3.msra.mxu0 %v133_v0  ;;  %v3447_v6 = vpack.c.bf16 %v281_v4, %v280_v3  ;;  %v282_v7 = vld [vmem:[#allocation9 + $0x10] sm:$0xff]  ;;  %v283_v8 = vld [vmem:[#allocation9 + $0x18] sm:$0xff]  ;;  %vm284_vm2 = vcmask 261120   ;;  %vm2124_vm3 = vcmask 1043456   ;;  %vm2120_vm4 = vcmask 31744  }
  0x6f   :  { %2575 = vmatmul.mubr.msk.f32.vlgmr.msra.gmra.mrb[0].mxu0 %vm141_vm0, %v126_v2  ;;  %2833 = vmatprep.subr.bf16.mxu0 %v3283_v9  ;;  %v128_v10 = vld [vmem:[#allocation4 + $0x18] sm:$0xff]  ;;  %v3453_v11 = vpack.c.bf16 %v283_v8, %v282_v7  ;;  %v3472_v15 = vld [vmem:[%s3778_s4] ss:$0 sm:$0xff]  ;;  %s3287_s4 = smov 64   ;;  %v131_v7 = vld [vmem:[#allocation4 + $0x30] sm:$0xff]  ;;  %s3288_s23 = smov [#allocation15]  }
  0x70   :  { %2835 = vmatpush3.bf16.msra.mxu0 %v3447_v6  ;;  %2577 = vmatprep.mubr.msk.f32.mxu0 %vm141_vm0, %v127_v5  ;;  %v129_v4 = vld [vmem:[#allocation4 + $0x20] sm:$0xff]  ;;  %v130_v5 = vld [vmem:[#allocation4 + $0x28] sm:$0xff]  ;;  %v132_v8 = vld [vmem:[#allocation4 + $0x38] sm:$0xff]  ;;  %s2382_s25 = sshll.u32 %s3288_s23, 4  ;;  %s2383_s25 = int_to_ptr.vmem [resolvable:$true] %s2382_s25 }
  0x71   :  { %2836 = vmatprep.subr.bf16.mxu0 %v3283_v9  ;;  %2968 = vmatpush3.msra.mxu1 %v133_v0  ;;  %s3243_s27 = scalar_lea.vmem %s2383_s25, 128  ;;  %p3248_p7 = scmp.lt.s32.totalorder %s2383_s25, %s2383_s25 }
  0x72   :  { %2851 = vmatprep.subr.bf16.mxu1 %v3283_v9  ;;  %2580 = vmatprep.mubr.msk.f32.mxu1 %vm141_vm0, %v129_v4  ;;  %p3244_p6 = scmp.ne.s32.totalorder %s2383_s25, %s3243_s27  ;;  %p3249_p8 = scmp.lt.s32.totalorder %s3243_s27, %s3243_s27 }
  0x73   :  { %2578 = vmatmul.mubr.msk.f32.gmra.mrb[2].mxu0 %vm141_vm0, %v128_v10  ;;  %2581 = vmatmul.mubr.msk.f32.vlgmr.msra.gmra.mrb[0].mxu1 %vm141_vm0, %v130_v5  ;;  %v1159_v5 = vld [vmem:[#allocation10] sm:$0xff] }
  0x74   :  { %2838 = vmatpush3.bf16.msra.mxu0 %v3453_v11  ;;  %2594 = vmatprep.mubr.msk.f32.mxu0 %vm3284_vm1, %v3285_v12  ;;  %p3250_p9 = por %p3249_p8, %p3248_p7 }
  0x75   :  { %2839 = vmatprep.subr.bf16.mxu0 %v3283_v9  ;;  %2853 = vmatpush3.bf16.msra.mxu1 %v3447_v6 }
  0x76   :  { %2583 = vmatprep.mubr.msk.f32.mxu1 %vm141_vm0, %v131_v7  ;;  %2854 = vmatprep.subr.bf16.mxu1 %v3283_v9  ;;  %v1160_v7 = vld [vmem:[#allocation10 + $0x8] sm:$0xff]  ;;  %p3251_p10 = pnand %p3250_p9, %p3244_p6 }
  0x77   :  { %2595 = vmatmul.mubr.f32.vlgmr.msra.gmra.mrb[4].mxu0 %v3285_v12  ;;  %2584 = vmatmul.mubr.msk.f32.gmra.mrb[2].mxu1 %vm141_vm0, %v132_v8  ;;  %v2881_v8 = vpack.c.bf16 %v1160_v7, %v1159_v5 }
  0x78   :  { %2841 = vmatpush3.bf16.msra.mxu0 %v3447_v6  ;;  %2605 = vmatprep.mubr.msk.f32.mxu0 %vm3284_vm1, %v3285_v12 }
  0x79   :  { %2842 = vmatprep.subr.bf16.mxu0 %v3283_v9  ;;  %2856 = vmatpush3.bf16.msra.mxu1 %v3453_v11 }
  0x7a   :  { %2627 = vmatprep.mubr.msk.f32.mxu1 %vm3284_vm1, %v3285_v12  ;;  %2863 = vmatprep.subr.bf16.mxu1 %v3283_v9 }
  0x7c   :  { %2844 = vmatpush3.bf16.msra.mxu0 %v3453_v11 }
  0x7d   :  { %2845 = vmatprep.subr.bf16.mxu0 %v3283_v9 }
 0x142   :  { %v2576_v13 = vpop.f32.mrb[0].mxu0 }
 0x143   :  { %v232_v14 = vpop.f32.mrb[1].mxu0  ;;  %v238_v36 = vadd.f32 %v2576_v13, %v3472_v15 }
 0x144   :  { %v233_v18 = vadd.f32 %v3472_v15, %v232_v14 }
 0x146   :  { %v3474_v16 = vpop.f32.mrb[2].mxu0 }
 0x147   :  { %v3476_v17 = vpop.f32.mrb[3].mxu0 }
 0x148   :  { %v243_v54 = vadd.f32 %v3472_v15, %v3476_v17  ;;  %v3520_v17 = vpop.f32.mrb[0].mxu1 }
 0x14a   :  { %v354_v19 = vpop.f32.mrb[4].mxu0 }
 0x14b   :  { %v358_v20 = vadd.f32 %v354_v19, %v233_v18  ;;  %v2596_v21 = vpop.f32.mrb[5].mxu0  ;;  %v252_v18 = vpop.f32.mrb[1].mxu1 }
 0x14c   :  { %v3522_v19 = vpop.f32.mrb[2].mxu1 }
 0x14d   :  { %2983 = vtanh.f32 %v358_v20  ;;  %v2403_v23 = vmul.f32 -1.442695, %v358_v20  ;;  %v3524_v20 = vpop.f32.mrb[3].mxu1 }
 0x14f   :  { %2985 = vpow2.f32 %v2403_v23 }
 0x157   :  { %v2984_v22 = vpop.eup %2983 }
 0x158   :  { %368 = vrot.lane.b32.xlu0 %v2984_v22, %s3286_s15  ;;  %v248_v22 = vadd.f32 %v3474_v16, %v3472_v15 }
 0x159   :  { %v2986_v24 = vpop.eup %2985 }
 0x15a   :  { %v362_v25 = vadd.f32 1.0, %v2986_v24 }
 0x15c   :  { %2987 = vrcp.f32 %v362_v25 }
 0x166   :  { %v2988_v26 = vpop.eup %2987 }
 0x167   :  { %v366_v29 = vmul.f32 0.0, %v2988_v26 }
 0x1ca   :  { %v369_v27 = vpop.permute.xlu0 %368 }
 0x1cb   :  { %v371_v28 = vmul.f32 %v2988_v26, %v369_v27 }
 0x1cd   :  { %373 = vrot.lane.b32.xlu0 %v371_v28, %s3286_s15 }
 0x23f   :  { %v374_v30 = vpop.permute.xlu0 %373 }
 0x240   :  { %v376_v31 = vadd.f32 %v374_v30, %v366_v29 }
 0x242   :  { %2989 = vtanh.f32 %v376_v31 }
 0x24c   :  { %v2990_v32 = vpop.eup %2989 }
 0x24d   :  { %379 = vrot.lane.b32.xlu1 %v2990_v32, %s3286_s15 }
 0x2bf   :  { %v380_v33 = vpop.permute.xlu1 %379 }
 0x2c0   :  { %v382_v34 = vmul.f32 %v2988_v26, %v380_v33 }
 0x2c2   :  { %384 = vrot.lane.b32.xlu1 %v382_v34, %s3287_s4 }
 0x334   :  { %v385_v35 = vpop.permute.xlu1 %384 }
 0x335   :  { %387 = vst.msk [vmem:[#allocation3] sm:$0xff] %vm284_vm2, %v385_v35  ;;  %2606 = vmatmul.mubr.msk.f32.vlgmr.msra.gmra.mrb[6].mxu0 %vm284_vm2, %v385_v35 }
 0x336   :  { %2847 = vmatpush3.bf16.msra.mxu0 %v3447_v6  ;;  %2616 = vmatprep.mubr.msk.f32.mxu0 %vm3284_vm1, %v3285_v12 }
 0x337   :  { %2848 = vmatprep.subr.bf16.mxu0 %v3283_v9 }
 0x33a   :  { %2850 = vmatpush3.bf16.msra.mxu0 %v3453_v11 }
 0x33b   :  { %2857 = vmatprep.subr.bf16.mxu0 %v3283_v9 }
 0x408   :  { %v462_v37 = vpop.f32.mrb[6].mxu0 }
 0x409   :  { %v466_v38 = vadd.f32 %v462_v37, %v238_v36  ;;  %v2607_v39 = vpop.f32.mrb[7].mxu0 }
 0x40a   :  { %v253_v39 = vadd.f32 %v3472_v15, %v252_v18  ;;  %v1162_v18 = vld [vmem:[#allocation10 + $0x18] sm:$0xff] }
 0x40b   :  { %2991 = vtanh.f32 %v466_v38  ;;  %v2405_v41 = vmul.f32 -1.442695, %v466_v38 }
 0x40d   :  { %2993 = vpow2.f32 %v2405_v41 }
 0x415   :  { %v2992_v40 = vpop.eup %2991 }
 0x416   :  { %476 = vrot.lane.b32.xlu0 %v2992_v40, %s3286_s15 }
 0x417   :  { %v2994_v42 = vpop.eup %2993 }
 0x418   :  { %v470_v43 = vadd.f32 1.0, %v2994_v42 }
 0x41a   :  { %2995 = vrcp.f32 %v470_v43 }
 0x424   :  { %v2996_v44 = vpop.eup %2995 }
 0x425   :  { %v474_v47 = vmul.f32 %v2996_v44, %v376_v31 }
 0x488   :  { %v477_v45 = vpop.permute.xlu0 %476 }
 0x489   :  { %v479_v46 = vmul.f32 %v2996_v44, %v477_v45 }
 0x48b   :  { %481 = vrot.lane.b32.xlu1 %v479_v46, %s3286_s15 }
 0x4fd   :  { %v482_v48 = vpop.permute.xlu1 %481 }
 0x4fe   :  { %v484_v49 = vadd.f32 %v482_v48, %v474_v47 }
 0x500   :  { %2997 = vtanh.f32 %v484_v49 }
 0x50a   :  { %v2998_v50 = vpop.eup %2997 }
 0x50b   :  { %487 = vrot.lane.b32.xlu0 %v2998_v50, %s3286_s15 }
 0x57d   :  { %v488_v51 = vpop.permute.xlu0 %487 }
 0x57e   :  { %v490_v52 = vmul.f32 %v2996_v44, %v488_v51 }
 0x580   :  { %492 = vrot.lane.b32.xlu1 %v490_v52, %s3287_s4 }
 0x5f2   :  { %v493_v53 = vpop.permute.xlu1 %492 }
 0x5f3   :  { %496 = vst.msk [vmem:[#allocation3 + $0x8] sm:$0xff] %vm284_vm2, %v493_v53  ;;  %2617 = vmatmul.mubr.msk.f32.vlgmr.msra.gmra.mrb[8].mxu0 %vm284_vm2, %v493_v53 }
 0x5f4   :  { %2859 = vmatpush3.bf16.msra.mxu0 %v3447_v6  ;;  %2638 = vmatprep.mubr.msk.f32.mxu0 %vm3284_vm1, %v3285_v12 }
 0x5f5   :  { %2860 = vmatprep.subr.bf16.mxu0 %v3283_v9 }
 0x5f8   :  { %2862 = vmatpush3.bf16.msra.mxu0 %v3453_v11 }
 0x5f9   :  { %2869 = vmatprep.subr.bf16.mxu0 %v3283_v9 }
 0x6c6   :  { %v571_v55 = vpop.f32.mrb[8].mxu0 }
 0x6c7   :  { %v575_v56 = vadd.f32 %v571_v55, %v243_v54  ;;  %v2618_v57 = vpop.f32.mrb[9].mxu0 }
 0x6c8   :  { %v258_v57 = vadd.f32 %v3520_v17, %v3472_v15  ;;  %v1161_v17 = vld [vmem:[#allocation10 + $0x10] sm:$0xff] }
 0x6c9   :  { %2999 = vtanh.f32 %v575_v56  ;;  %v2407_v59 = vmul.f32 -1.442695, %v575_v56 }
 0x6cb   :  { %3001 = vpow2.f32 %v2407_v59 }
 0x6d3   :  { %v3000_v58 = vpop.eup %2999 }
 0x6d4   :  { %585 = vrot.lane.b32.xlu0 %v3000_v58, %s3286_s15 }
 0x6d5   :  { %v3002_v60 = vpop.eup %3001 }
 0x6d6   :  { %v579_v61 = vadd.f32 1.0, %v3002_v60 }
 0x6d8   :  { %3003 = vrcp.f32 %v579_v61 }
 0x6e2   :  { %v3004_v62 = vpop.eup %3003 }
 0x6e3   :  { %v583_v1 = vmul.f32 %v3004_v62, %v484_v49 }
 0x746   :  { %v586_v63 = vpop.permute.xlu0 %585 }
 0x747   :  { %v588_v0 = vmul.f32 %v3004_v62, %v586_v63 }
 0x749   :  { %590 = vrot.lane.b32.xlu1 %v588_v0, %s3286_s15 }
 0x7bb   :  { %v591_v2 = vpop.permute.xlu1 %590 }
 0x7bc   :  { %v593_v3 = vadd.f32 %v591_v2, %v583_v1 }
 0x7be   :  { %3005 = vtanh.f32 %v593_v3 }
 0x7c8   :  { %v3006_v10 = vpop.eup %3005 }
 0x7c9   :  { %596 = vrot.lane.b32.xlu0 %v3006_v10, %s3286_s15 }
 0x83b   :  { %v597_v13 = vpop.permute.xlu0 %596 }
 0x83c   :  { %v599_v14 = vmul.f32 %v3004_v62, %v597_v13 }
 0x83e   :  { %601 = vrot.lane.b32.xlu1 %v599_v14, %s3287_s4 }
 0x8b0   :  { %v602_v21 = vpop.permute.xlu1 %601 }
 0x8b1   :  { %605 = vst.msk [vmem:[#allocation3 + $0x10] sm:$0xff] %vm284_vm2, %v602_v21  ;;  %2628 = vmatmul.mubr.msk.f32.vlgmr.msra.gmra.mrb[4].mxu1 %vm284_vm2, %v602_v21  ;;  %v2885_v21 = vpack.c.bf16 %v1162_v18, %v1161_v17 }
 0x8b2   :  { %2865 = vmatpush3.bf16.msra.mxu1 %v3447_v6  ;;  %2649 = vmatprep.mubr.msk.f32.mxu1 %vm3284_vm1, %v3285_v12 }
 0x8b3   :  { %2866 = vmatprep.subr.bf16.mxu1 %v3283_v9 }
 0x8b6   :  { %2868 = vmatpush3.bf16.msra.mxu1 %v3453_v11 }
 0x8b7   :  { %2875 = vmatprep.subr.bf16.mxu1 %v3283_v9 }
 0x984   :  { %v680_v23 = vpop.f32.mrb[4].mxu1 }
 0x985   :  { %v684_v24 = vadd.f32 %v680_v23, %v248_v22  ;;  %v2629_v25 = vpop.f32.mrb[5].mxu1  ;;  %v1151_v23 = vld [vmem:[#allocation3] sm:$0xff] }
 0x986   :  { %v1153_v25 = vld [vmem:[#allocation3 + $0x10] sm:$0xff] }
 0x987   :  { %3007 = vtanh.f32 %v684_v24  ;;  %v2409_v27 = vmul.f32 -1.442695, %v684_v24  ;;  %v1152_v24 = vld [vmem:[#allocation3 + $0x8] sm:$0xff] }
 0x989   :  { %3009 = vpow2.f32 %v2409_v27 }
 0x991   :  { %v3008_v26 = vpop.eup %3007 }
 0x992   :  { %694 = vrot.lane.b32.xlu0 %v3008_v26, %s3286_s15 }
 0x993   :  { %v3010_v28 = vpop.eup %3009 }
 0x994   :  { %v688_v29 = vadd.f32 1.0, %v3010_v28 }
 0x996   :  { %3011 = vrcp.f32 %v688_v29  ;;  %v263_v29 = vadd.f32 %v3472_v15, %v3524_v20 }
 0x9a0   :  { %v3012_v30 = vpop.eup %3011 }
 0x9a1   :  { %v692_v33 = vmul.f32 %v3012_v30, %v593_v3 }
 0xa04   :  { %v695_v31 = vpop.permute.xlu0 %694 }
 0xa05   :  { %v697_v32 = vmul.f32 %v3012_v30, %v695_v31 }
 0xa07   :  { %699 = vrot.lane.b32.xlu1 %v697_v32, %s3286_s15 }
 0xa79   :  { %v700_v34 = vpop.permute.xlu1 %699 }
 0xa7a   :  { %v702_v16 = vadd.f32 %v700_v34, %v692_v33 }
 0xa7c   :  { %3013 = vtanh.f32 %v702_v16 }
 0xa86   :  { %v3014_v35 = vpop.eup %3013 }
 0xa87   :  { %705 = vrot.lane.b32.xlu0 %v3014_v35, %s3286_s15 }
 0xaf9   :  { %v706_v36 = vpop.permute.xlu0 %705 }
 0xafa   :  { %v708_v37 = vmul.f32 %v3012_v30, %v706_v36 }
 0xafc   :  { %710 = vrot.lane.b32.xlu1 %v708_v37, %s3287_s4 }
 0xb6e   :  { %v711_v38 = vpop.permute.xlu1 %710 }
 0xb6f   :  { %714 = vst.msk [vmem:[#allocation3 + $0x18] sm:$0xff] %vm284_vm2, %v711_v38  ;;  %2639 = vmatmul.mubr.msk.f32.vlgmr.msra.gmra.mrb[10].mxu0 %vm284_vm2, %v711_v38 }
 0xb70   :  { %2871 = vmatpush3.bf16.msra.mxu0 %v3447_v6  ;;  %2660 = vmatprep.mubr.msk.f32.mxu0 %vm3284_vm1, %v3285_v12 }
 0xb71   :  { %2872 = vmatprep.subr.bf16.mxu0 %v3283_v9 }
 0xb74   :  { %2874 = vmatpush3.bf16.msra.mxu0 %v3453_v11 }
 0xb75   :  { %2882 = vmatprep.subr.bf16.mxu0 %v2881_v8 }
 0xb76   :  { %v1154_v26 = vld [vmem:[#allocation3 + $0x18] sm:$0xff] }
 0xc42   :  { %v789_v40 = vpop.f32.mrb[10].mxu0 }
 0xc43   :  { %v793_v41 = vadd.f32 %v789_v40, %v253_v39  ;;  %v2640_v42 = vpop.f32.mrb[11].mxu0 }
 0xc45   :  { %3015 = vtanh.f32 %v793_v41  ;;  %v2411_v44 = vmul.f32 -1.442695, %v793_v41 }
 0xc47   :  { %3017 = vpow2.f32 %v2411_v44 }
 0xc4f   :  { %v3016_v43 = vpop.eup %3015 }
 0xc50   :  { %803 = vrot.lane.b32.xlu0 %v3016_v43, %s3286_s15 }
 0xc51   :  { %v3018_v45 = vpop.eup %3017 }
 0xc52   :  { %v797_v46 = vadd.f32 1.0, %v3018_v45 }
 0xc54   :  { %3019 = vrcp.f32 %v797_v46 }
 0xc5e   :  { %v3020_v47 = vpop.eup %3019 }
 0xc5f   :  { %v801_v50 = vmul.f32 %v3020_v47, %v702_v16 }
 0xcc2   :  { %v804_v48 = vpop.permute.xlu0 %803 }
 0xcc3   :  { %v806_v49 = vmul.f32 %v3020_v47, %v804_v48  ;;  %v1308_v48 = vld [vmem:[%s3780_s6] sm:$0xff] }
 0xcc5   :  { %808 = vrot.lane.b32.xlu1 %v806_v49, %s3286_s15  ;;  %v1309_v49 = vld [vmem:[%s3780_s6 + $0x8] sm:$0xff] }
 0xd37   :  { %v809_v51 = vpop.permute.xlu1 %808 }
 0xd38   :  { %v811_v52 = vadd.f32 %v809_v51, %v801_v50  ;;  %v3599_v50 = vpack.c.bf16 %v1309_v49, %v1308_v48  ;;  %v1310_v51 = vld [vmem:[%s3780_s6 + $0x10] sm:$0xff] }
 0xd3a   :  { %3021 = vtanh.f32 %v811_v52 }
 0xd44   :  { %v3022_v53 = vpop.eup %3021 }
 0xd45   :  { %814 = vrot.lane.b32.xlu0 %v3022_v53, %s3286_s15 }
 0xdb7   :  { %v815_v54 = vpop.permute.xlu0 %814 }
 0xdb8   :  { %v817_v55 = vmul.f32 %v3020_v47, %v815_v54 }
 0xdba   :  { %819 = vrot.lane.b32.xlu1 %v817_v55, %s3287_s4 }
 0xe2c   :  { %v820_v56 = vpop.permute.xlu1 %819 }
 0xe2d   :  { %823 = vst.msk [vmem:[#allocation3 + $0x20] sm:$0xff] %vm284_vm2, %v820_v56  ;;  %2650 = vmatmul.mubr.msk.f32.vlgmr.msra.gmra.mrb[6].mxu1 %vm284_vm2, %v820_v56 }
 0xe2e   :  { %2877 = vmatpush3.bf16.msra.mxu1 %v3447_v6  ;;  %2671 = vmatprep.mubr.msk.f32.mxu1 %vm3284_vm1, %v3285_v12 }
 0xe2f   :  { %2878 = vmatprep.subr.bf16.mxu1 %v3283_v9 }
 0xe32   :  { %2880 = vmatpush3.bf16.msra.mxu1 %v3453_v11 }
 0xe33   :  { %2889 = vmatprep.subr.bf16.mxu1 %v3283_v9 }
 0xe34   :  { %v1155_v27 = vld [vmem:[#allocation3 + $0x20] sm:$0xff] }
 0xf00   :  { %v898_v58 = vpop.f32.mrb[6].mxu1 }
 0xf01   :  { %v902_v59 = vadd.f32 %v898_v58, %v258_v57  ;;  %v2651_v60 = vpop.f32.mrb[7].mxu1  ;;  %v268_v58 = vadd.f32 %v3522_v19, %v3472_v15 }
 0xf03   :  { %3023 = vtanh.f32 %v902_v59  ;;  %v2413_v6 = vmul.f32 -1.442695, %v902_v59 }
 0xf05   :  { %3025 = vpow2.f32 %v2413_v6  ;;  %v3635_v6 = vld [vmem:[%s3781_s7] ss:$0 sm:$0xff] }
 0xf0d   :  { %v3024_v61 = vpop.eup %3023 }
 0xf0e   :  { %912 = vrot.lane.b32.xlu0 %v3024_v61, %s3286_s15 }
 0xf0f   :  { %v3026_v62 = vpop.eup %3025 }
 0xf10   :  { %v906_v63 = vadd.f32 1.0, %v3026_v62 }
 0xf12   :  { %3027 = vrcp.f32 %v906_v63 }
 0xf1c   :  { %v3028_v0 = vpop.eup %3027 }
 0xf1d   :  { %v910_v2 = vmul.f32 %v3028_v0, %v811_v52  ;;  %v1311_v52 = vld [vmem:[%s3780_s6 + $0x18] sm:$0xff] }
 0xf1e   :  { %v3609_v53 = vpack.c.bf16 %v1311_v52, %v1310_v51 }
 0xf80   :  { %v913_v1 = vpop.permute.xlu0 %912 }
 0xf81   :  { %v915_v11 = vmul.f32 %v3028_v0, %v913_v1 }
 0xf83   :  { %917 = vrot.lane.b32.xlu1 %v915_v11, %s3286_s15 }
 0xff5   :  { %v918_v3 = vpop.permute.xlu1 %917 }
 0xff6   :  { %v920_v4 = vadd.f32 %v918_v3, %v910_v2 }
 0xff8   :  { %3029 = vtanh.f32 %v920_v4 }
0x1002   :  { %v3030_v10 = vpop.eup %3029 }
0x1003   :  { %923 = vrot.lane.b32.xlu0 %v3030_v10, %s3286_s15 }
0x1075   :  { %v924_v13 = vpop.permute.xlu0 %923 }
0x1076   :  { %v926_v14 = vmul.f32 %v3028_v0, %v924_v13 }
0x1078   :  { %928 = vrot.lane.b32.xlu1 %v926_v14, %s3287_s4 }
0x10ea   :  { %v929_v22 = vpop.permute.xlu1 %928 }
0x10eb   :  { %932 = vst.msk [vmem:[#allocation3 + $0x28] sm:$0xff] %vm284_vm2, %v929_v22  ;;  %2661 = vmatmul.mubr.msk.f32.vlgmr.msra.gmra.mrb[12].mxu0 %vm284_vm2, %v929_v22 }
0x10ec   :  { %2884 = vmatpush3.bf16.msra.mxu0 %v2881_v8  ;;  %2682 = vmatprep.mubr.msk.f32.mxu0 %vm284_vm2, %v1151_v23 }
0x10ed   :  { %2886 = vmatprep.subr.bf16.mxu0 %v2885_v21 }
0x10f0   :  { %2888 = vmatpush3.bf16.msra.mxu0 %v2885_v21 }
0x10f1   :  { %2901 = vmatprep.subr.bf16.mxu0 %v3283_v9 }
0x10f2   :  { %v1156_v28 = vld [vmem:[#allocation3 + $0x28] sm:$0xff] }
0x10f3   :  { %2683 = vmatmul.mubr.msk.f32.vlgmr.msra.gmra.mrb[14].mxu0 %vm284_vm2, %v1152_v24 }
0x10f4   :  { %2685 = vmatprep.mubr.msk.f32.mxu0 %vm284_vm2, %v1153_v25  ;;  %2903 = vmatpush3.bf16.msra.mxu0 %v3599_v50 }
0x10f5   :  { %2904 = vmatprep.subr.bf16.mxu0 %v3283_v9 }
0x10f7   :  { %2686 = vmatmul.mubr.msk.f32.gmra.mrb[16].mxu0 %vm284_vm2, %v1154_v26 }
0x10f8   :  { %2688 = vmatprep.mubr.msk.f32.mxu0 %vm284_vm2, %v1155_v27  ;;  %2906 = vmatpush3.bf16.msra.mxu0 %v3609_v53 }
0x10f9   :  { %2913 = vmatprep.subr.bf16.mxu0 %v3283_v9 }
0x10fb   :  { %2689 = vmatmul.mubr.msk.f32.gmra.mrb[18].mxu0 %vm284_vm2, %v1156_v28 }
0x11be   :  { %v1007_v30 = vpop.f32.mrb[12].mxu0 }
0x11bf   :  { %v1011_v31 = vadd.f32 %v1007_v30, %v263_v29  ;;  %v2662_v32 = vpop.f32.mrb[13].mxu0 }
0x11c1   :  { %3031 = vtanh.f32 %v1011_v31  ;;  %v2415_v39 = vmul.f32 -1.442695, %v1011_v31 }
0x11c3   :  { %3033 = vpow2.f32 %v2415_v39 }
0x11c6   :  { %v3577_v33 = vpop.f32.mrb[14].mxu0 }
0x11c7   :  { %v1260_v34 = vpop.f32.mrb[15].mxu0 }
0x11c8   :  { %v1261_v62 = vadd.f32 %v3635_v6, %v1260_v34 }
0x11ca   :  { %v3579_v16 = vpop.f32.mrb[16].mxu0 }
0x11cb   :  { %v3032_v35 = vpop.eup %3031  ;;  %v3581_v36 = vpop.f32.mrb[17].mxu0 }
0x11cc   :  { %1021 = vrot.lane.b32.xlu0 %v3032_v35, %s3286_s15  ;;  %v1266_v35 = vadd.f32 %v3577_v33, %v3635_v6 }
0x11cd   :  { %v3034_v20 = vpop.eup %3033 }
0x11ce   :  { %v3584_v37 = vpop.f32.mrb[18].mxu0  ;;  %v1015_v40 = vadd.f32 1.0, %v3034_v20 }
0x11cf   :  { %v3586_v38 = vpop.f32.mrb[19].mxu0 }
0x11d0   :  { %3035 = vrcp.f32 %v1015_v40 }
0x11da   :  { %v3036_v41 = vpop.eup %3035 }
0x11db   :  { %v1019_v44 = vmul.f32 %v3036_v41, %v920_v4 }
0x123e   :  { %v1022_v42 = vpop.permute.xlu0 %1021 }
0x123f   :  { %v1024_v43 = vmul.f32 %v3036_v41, %v1022_v42 }
0x1241   :  { %1026 = vrot.lane.b32.xlu1 %v1024_v43, %s3286_s15 }
0x12b3   :  { %v1027_v45 = vpop.permute.xlu1 %1026 }
0x12b4   :  { %v3589_v46 = vadd.f32 %v1027_v45, %v1019_v44 }
0x12b6   :  { %3037 = vtanh.f32 %v3589_v46 }
0x12c0   :  { %v3038_v47 = vpop.eup %3037 }
0x12c1   :  { %1032 = vrot.lane.b32.xlu0 %v3038_v47, %s3286_s15 }
0x1333   :  { %v1033_v54 = vpop.permute.xlu0 %1032 }
0x1334   :  { %v1035_v55 = vmul.f32 %v3036_v41, %v1033_v54 }
0x1336   :  { %1037 = vrot.lane.b32.xlu1 %v1035_v55, %s3287_s4 }
0x13a8   :  { %v1038_v56 = vpop.permute.xlu1 %1037 }
0x13a9   :  { %1041 = vst.msk [vmem:[#allocation3 + $0x30] sm:$0xff] %vm284_vm2, %v1038_v56  ;;  %2672 = vmatmul.mubr.msk.f32.vlgmr.msra.gmra.mrb[8].mxu1 %vm284_vm2, %v1038_v56 }
0x13aa   :  { %2891 = vmatpush3.bf16.msra.mxu1 %v3599_v50  ;;  %2702 = vmatprep.mubr.msk.f32.mxu1 %vm3284_vm1, %v3285_v12 }
0x13ab   :  { %2892 = vmatprep.subr.bf16.mxu1 %v3283_v9 }
0x13ae   :  { %2894 = vmatpush3.bf16.msra.mxu1 %v3609_v53 }
0x13af   :  { %2895 = vmatprep.subr.bf16.mxu1 %v3283_v9 }
0x13b0   :  { %v1157_v57 = vld [vmem:[#allocation3 + $0x30] sm:$0xff] }
0x13b1   :  { %2703 = vmatmul.mubr.f32.vlgmr.msra.gmra.mrb[10].mxu1 %v3285_v12  ;;  %2691 = vmatprep.mubr.msk.f32.mxu0 %vm284_vm2, %v1157_v57 }
0x13b2   :  { %2897 = vmatpush3.bf16.msra.mxu1 %v3599_v50  ;;  %2713 = vmatprep.mubr.msk.f32.mxu1 %vm3284_vm1, %v3285_v12 }
0x13b3   :  { %2898 = vmatprep.subr.bf16.mxu1 %v3283_v9 }
0x13b6   :  { %2900 = vmatpush3.bf16.msra.mxu1 %v3609_v53 }
0x13b7   :  { %2907 = vmatprep.subr.bf16.mxu1 %v3283_v9 }
0x147c   :  { %v1116_v59 = vpop.f32.mrb[8].mxu1 }
0x147d   :  { %v1120_v60 = vadd.f32 %v1116_v59, %v268_v58  ;;  %v2673_v61 = vpop.f32.mrb[9].mxu1 }
0x147f   :  { %v2417_v17 = vmul.f32 -1.442695, %v1120_v60 }
0x1484   :  { %v1378_v63 = vpop.f32.mrb[10].mxu1 }
0x1485   :  { %v1382_v0 = vadd.f32 %v1378_v63, %v1261_v62  ;;  %v2704_v1 = vpop.f32.mrb[11].mxu1 }
0x1487   :  { %3039 = vtanh.f32 %v1382_v0  ;;  %v2427_v2 = vmul.f32 -1.442695, %v1382_v0 }
0x1489   :  { %3041 = vpow2.f32 %v2427_v2 }
0x1491   :  { %v3040_v11 = vpop.eup %3039 }
0x1492   :  { %1392 = vrot.lane.b32.xlu0 %v3040_v11, %s3286_s15 }
0x1493   :  { %v3042_v15 = vpop.eup %3041 }
0x1494   :  { %v1386_v19 = vadd.f32 1.0, %v3042_v15 }
0x1496   :  { %3043 = vrcp.f32 %v1386_v19 }
0x14a0   :  { %v3044_v3 = vpop.eup %3043 }
0x14a1   :  { %v1390_v7 = vmul.f32 0.0, %v3044_v3 }
0x1504   :  { %v1393_v4 = vpop.permute.xlu0 %1392 }
0x1505   :  { %v1395_v5 = vmul.f32 %v3044_v3, %v1393_v4 }
0x1507   :  { %1397 = vrot.lane.b32.xlu1 %v1395_v5, %s3286_s15 }
0x1579   :  { %v1398_v8 = vpop.permute.xlu1 %1397 }
0x157a   :  { %v1400_v10 = vadd.f32 %v1398_v8, %v1390_v7 }
0x157c   :  { %3045 = vtanh.f32 %v1400_v10 }
0x157d   :  { %3047 = vtanh.f32 %v1120_v60  ;;  %v1271_v60 = vadd.f32 %v3635_v6, %v3581_v36 }
0x157e   :  { %3049 = vpow2.f32 %v2417_v17 }
0x1586   :  { %v3046_v13 = vpop.eup %3045 }
0x1587   :  { %1403 = vrot.lane.b32.xlu0 %v3046_v13, %s3286_s15  ;;  %v3048_v14 = vpop.eup %3047 }
0x1588   :  { %v3050_v18 = vpop.eup %3049 }
0x1589   :  { %v1124_v21 = vadd.f32 1.0, %v3050_v18 }
0x158b   :  { %1130 = vrot.lane.b32.xlu0 %v3048_v14, %s3286_s15  ;;  %3051 = vrcp.f32 %v1124_v21  ;;  %v1276_v14 = vadd.f32 %v3579_v16, %v3635_v6 }
0x1595   :  { %v3052_v24 = vpop.eup %3051 }
0x1596   :  { %v1128_v28 = vmul.f32 %v3052_v24, %v3589_v46 }
0x15f9   :  { %v1404_v22 = vpop.permute.xlu0 %1403 }
0x15fa   :  { %v1406_v23 = vmul.f32 %v3044_v3, %v1404_v22 }
0x15fc   :  { %1409 = vrot.lane.b32.xlu1 %v1406_v23, %s3287_s4 }
0x15fd   :  { %v1131_v25 = vpop.permute.xlu0 %1130 }
0x15fe   :  { %v1133_v26 = vmul.f32 %v3052_v24, %v1131_v25 }
0x1600   :  { %1135 = vrot.lane.b32.xlu0 %v1133_v26, %s3286_s15 }
0x166e   :  { %v1410_v27 = vpop.permute.xlu1 %1409 }
0x166f   :  { %2714 = vmatmul.mubr.msk.f32.vlgmr.msra.gmra.mrb[12].mxu1 %vm284_vm2, %v1410_v27 }
0x1670   :  { %2909 = vmatpush3.bf16.msra.mxu1 %v3599_v50  ;;  %2735 = vmatprep.mubr.msk.f32.mxu1 %vm3284_vm1, %v3285_v12 }
0x1671   :  { %2910 = vmatprep.subr.bf16.mxu1 %v3283_v9 }
0x1672   :  { %v1136_v29 = vpop.permute.xlu0 %1135 }
0x1673   :  { %v1138_v30 = vadd.f32 %v1136_v29, %v1128_v28 }
0x1674   :  { %2912 = vmatpush3.bf16.msra.mxu1 %v3609_v53 }
0x1675   :  { %3053 = vtanh.f32 %v1138_v30  ;;  %2919 = vmatprep.subr.bf16.mxu1 %v3283_v9 }
0x167f   :  { %v3054_v31 = vpop.eup %3053 }
0x1680   :  { %1141 = vrot.lane.b32.xlu0 %v3054_v31, %s3286_s15 }
0x16f2   :  { %v1142_v32 = vpop.permute.xlu0 %1141 }
0x16f3   :  { %v1144_v34 = vmul.f32 %v3052_v24, %v1142_v32 }
0x16f5   :  { %1146 = vrot.lane.b32.xlu0 %v1144_v34, %s3287_s4 }
0x1742   :  { %v1479_v39 = vpop.f32.mrb[12].mxu1 }
0x1743   :  { %v1483_v20 = vadd.f32 %v1479_v39, %v1266_v35  ;;  %v2715_v40 = vpop.f32.mrb[13].mxu1  ;;  %v1281_v39 = vadd.f32 %v3635_v6, %v3586_v38 }
0x1745   :  { %3055 = vtanh.f32 %v1483_v20  ;;  %v2429_v44 = vmul.f32 -1.442695, %v1483_v20 }
0x1747   :  { %3057 = vpow2.f32 %v2429_v44 }
0x174f   :  { %v3056_v41 = vpop.eup %3055 }
0x1750   :  { %1493 = vrot.lane.b32.xlu1 %v3056_v41, %s3286_s15 }
0x1751   :  { %v3058_v45 = vpop.eup %3057 }
0x1752   :  { %v1487_v33 = vadd.f32 1.0, %v3058_v45 }
0x1754   :  { %3059 = vrcp.f32 %v1487_v33 }
0x175e   :  { %v3060_v46 = vpop.eup %3059 }
0x175f   :  { %v1491_v49 = vmul.f32 %v3060_v46, %v1400_v10 }
0x1767   :  { %v1147_v42 = vpop.permute.xlu0 %1146 }
0x1768   :  { %1150 = vst.msk [vmem:[#allocation3 + $0x38] sm:$0xff] %vm284_vm2, %v1147_v42 }
0x176f   :  { %v1158_v43 = vld [vmem:[#allocation3 + $0x38] sm:$0xff] }
0x1770   :  { %2692 = vmatmul.mubr.msk.f32.gmra.mrb[20].mxu0 %vm284_vm2, %v1158_v43 }
0x1771   :  { %2724 = vmatprep.mubr.msk.f32.mxu0 %vm3284_vm1, %v3285_v12 }
0x17c2   :  { %v1494_v47 = vpop.permute.xlu1 %1493 }
0x17c3   :  { %v1496_v48 = vmul.f32 %v3060_v46, %v1494_v47 }
0x17c5   :  { %1498 = vrot.lane.b32.xlu1 %v1496_v48, %s3286_s15 }
0x1837   :  { %v1499_v51 = vpop.permute.xlu1 %1498 }
0x1838   :  { %v1501_v52 = vadd.f32 %v1499_v51, %v1491_v49 }
0x183a   :  { %3061 = vtanh.f32 %v1501_v52 }
0x1843   :  { %v3662_v54 = vpop.f32.mrb[20].mxu0 }
0x1844   :  { %v3062_v55 = vpop.eup %3061  ;;  %v3664_v56 = vpop.f32.mrb[21].mxu0 }
0x1845   :  { %1504 = vrot.lane.b32.xlu1 %v3062_v55, %s3286_s15 }
0x18b7   :  { %v1505_v57 = vpop.permute.xlu1 %1504 }
0x18b8   :  { %v1507_v58 = vmul.f32 %v3060_v46, %v1505_v57 }
0x18ba   :  { %1510 = vrot.lane.b32.xlu1 %v1507_v58, %s3287_s4  ;;  %v1286_v58 = vadd.f32 %v3584_v37, %v3635_v6 }
0x192c   :  { %v1511_v59 = vpop.permute.xlu1 %1510 }
0x192d   :  { %2725 = vmatmul.mubr.msk.f32.vlgmr.msra.gmra.mrb[22].mxu0 %vm284_vm2, %v1511_v59 }
0x192e   :  { %2915 = vmatpush3.bf16.msra.mxu0 %v3599_v50  ;;  %2746 = vmatprep.mubr.msk.f32.mxu0 %vm3284_vm1, %v3285_v12 }
0x192f   :  { %2916 = vmatprep.subr.bf16.mxu0 %v3283_v9 }
0x1932   :  { %2918 = vmatpush3.bf16.msra.mxu0 %v3609_v53 }
0x1933   :  { %2925 = vmatprep.subr.bf16.mxu0 %v3283_v9 }
0x1a00   :  { %v1580_v61 = vpop.f32.mrb[22].mxu0 }
0x1a01   :  { %v1584_v62 = vadd.f32 %v1580_v61, %v1271_v60  ;;  %v2726_v63 = vpop.f32.mrb[23].mxu0 }
0x1a03   :  { %3063 = vtanh.f32 %v1584_v62  ;;  %v2431_v1 = vmul.f32 -1.442695, %v1584_v62 }
0x1a05   :  { %3065 = vpow2.f32 %v2431_v1 }
0x1a0d   :  { %v3064_v0 = vpop.eup %3063 }
0x1a0e   :  { %1594 = vrot.lane.b32.xlu0 %v3064_v0, %s3286_s15 }
0x1a0f   :  { %v3066_v11 = vpop.eup %3065 }
0x1a10   :  { %v1588_v2 = vadd.f32 1.0, %v3066_v11 }
0x1a12   :  { %3067 = vrcp.f32 %v1588_v2 }
0x1a1c   :  { %v3068_v15 = vpop.eup %3067 }
0x1a1d   :  { %v1592_v4 = vmul.f32 %v3068_v15, %v1501_v52 }
0x1a80   :  { %v1595_v19 = vpop.permute.xlu0 %1594 }
0x1a81   :  { %v1597_v3 = vmul.f32 %v3068_v15, %v1595_v19 }
0x1a83   :  { %1599 = vrot.lane.b32.xlu1 %v1597_v3, %s3286_s15 }
0x1af5   :  { %v1600_v5 = vpop.permute.xlu1 %1599 }
0x1af6   :  { %v1602_v36 = vadd.f32 %v1600_v5, %v1592_v4 }
0x1af8   :  { %3069 = vtanh.f32 %v1602_v36 }
0x1b02   :  { %v3070_v7 = vpop.eup %3069 }
0x1b03   :  { %1605 = vrot.lane.b32.xlu0 %v3070_v7, %s3286_s15 }
0x1b75   :  { %v1606_v8 = vpop.permute.xlu0 %1605 }
0x1b76   :  { %v1608_v10 = vmul.f32 %v3068_v15, %v1606_v8 }
0x1b78   :  { %1611 = vrot.lane.b32.xlu1 %v1608_v10, %s3287_s4 }
0x1bea   :  { %v1612_v13 = vpop.permute.xlu1 %1611 }
0x1beb   :  { %2736 = vmatmul.mubr.msk.f32.vlgmr.msra.gmra.mrb[14].mxu1 %vm284_vm2, %v1612_v13 }
0x1bec   :  { %2921 = vmatpush3.bf16.msra.mxu1 %v3599_v50  ;;  %2757 = vmatprep.mubr.msk.f32.mxu1 %vm3284_vm1, %v3285_v12 }
0x1bed   :  { %2922 = vmatprep.subr.bf16.mxu1 %v3283_v9 }
0x1bf0   :  { %2924 = vmatpush3.bf16.msra.mxu1 %v3609_v53 }
0x1bf1   :  { %2931 = vmatprep.subr.bf16.mxu1 %v3283_v9 }
0x1cbe   :  { %v1681_v17 = vpop.f32.mrb[14].mxu1 }
0x1cbf   :  { %v1685_v18 = vadd.f32 %v1681_v17, %v1276_v14  ;;  %v2737_v21 = vpop.f32.mrb[15].mxu1 }
0x1cc1   :  { %3071 = vtanh.f32 %v1685_v18  ;;  %v2433_v23 = vmul.f32 -1.442695, %v1685_v18 }
0x1cc3   :  { %3073 = vpow2.f32 %v2433_v23 }
0x1ccb   :  { %v3072_v22 = vpop.eup %3071 }
0x1ccc   :  { %1695 = vrot.lane.b32.xlu0 %v3072_v22, %s3286_s15 }
0x1ccd   :  { %v3074_v24 = vpop.eup %3073 }
0x1cce   :  { %v1689_v25 = vadd.f32 1.0, %v3074_v24 }
0x1cd0   :  { %3075 = vrcp.f32 %v1689_v25 }
0x1cda   :  { %v3076_v26 = vpop.eup %3075 }
0x1cdb   :  { %v1693_v29 = vmul.f32 %v3076_v26, %v1602_v36  ;;  %v1291_v36 = vadd.f32 %v3635_v6, %v3664_v56 }
0x1d3e   :  { %v1696_v27 = vpop.permute.xlu0 %1695 }
0x1d3f   :  { %v1698_v28 = vmul.f32 %v3076_v26, %v1696_v27 }
0x1d41   :  { %1700 = vrot.lane.b32.xlu1 %v1698_v28, %s3286_s15 }
0x1db3   :  { %v1701_v30 = vpop.permute.xlu1 %1700 }
0x1db4   :  { %v1703_v16 = vadd.f32 %v1701_v30, %v1693_v29  ;;  %v1296_v30 = vadd.f32 %v3662_v54, %v3635_v6  ;;  %v2119_v54 = vld [vmem:[%s3783_s9] sm:$0xf] }
0x1db6   :  { %3077 = vtanh.f32 %v1703_v16 }
0x1dc0   :  { %v3078_v31 = vpop.eup %3077 }
0x1dc1   :  { %1706 = vrot.lane.b32.xlu0 %v3078_v31, %s3286_s15 }
0x1e33   :  { %v1707_v32 = vpop.permute.xlu0 %1706 }
0x1e34   :  { %v1709_v34 = vmul.f32 %v3076_v26, %v1707_v32 }
0x1e36   :  { %1712 = vrot.lane.b32.xlu1 %v1709_v34, %s3287_s4 }
0x1ea8   :  { %v1713_v35 = vpop.permute.xlu1 %1712 }
0x1ea9   :  { %2747 = vmatmul.mubr.msk.f32.vlgmr.msra.gmra.mrb[24].mxu0 %vm284_vm2, %v1713_v35 }
0x1eaa   :  { %2927 = vmatpush3.bf16.msra.mxu0 %v3599_v50  ;;  %2768 = vmatprep.mubr.msk.f32.mxu0 %vm3284_vm1, %v3285_v12 }
0x1eab   :  { %2928 = vmatprep.subr.bf16.mxu0 %v3283_v9 }
0x1eae   :  { %2930 = vmatpush3.bf16.msra.mxu0 %v3609_v53 }
0x1eaf   :  { %2782 = vmatprep.subr.mxu0 %v3285_v12 }
0x1f7c   :  { %v1782_v20 = vpop.f32.mrb[24].mxu0 }
0x1f7d   :  { %v1786_v40 = vadd.f32 %v1782_v20, %v1281_v39  ;;  %v2748_v41 = vpop.f32.mrb[25].mxu0 }
0x1f7f   :  { %3079 = vtanh.f32 %v1786_v40  ;;  %v2435_v43 = vmul.f32 -1.442695, %v1786_v40 }
0x1f81   :  { %3081 = vpow2.f32 %v2435_v43 }
0x1f89   :  { %v3080_v42 = vpop.eup %3079 }
0x1f8a   :  { %1796 = vrot.lane.b32.xlu0 %v3080_v42, %s3286_s15 }
0x1f8b   :  { %v3082_v44 = vpop.eup %3081 }
0x1f8c   :  { %v1790_v45 = vadd.f32 1.0, %v3082_v44 }
0x1f8e   :  { %3083 = vrcp.f32 %v1790_v45  ;;  %v2114_v45 = vld [vmem:[%s3775_s1] sm:$0xff] }
0x1f98   :  { %v3084_v33 = vpop.eup %3083 }
0x1f99   :  { %v1794_v48 = vmul.f32 %v3084_v33, %v1703_v16 }
0x1ffc   :  { %v1797_v46 = vpop.permute.xlu0 %1796 }
0x1ffd   :  { %v1799_v47 = vmul.f32 %v3084_v33, %v1797_v46  ;;  %v2116_v46 = vld [vmem:[#allocation12 + $0x8] sm:$0xff] }
0x1fff   :  { %1801 = vrot.lane.b32.xlu1 %v1799_v47, %s3286_s15  ;;  %v2117_v47 = vld [vmem:[#allocation12 + $0x10] sm:$0xff] }
0x2071   :  { %v1802_v49 = vpop.permute.xlu1 %1801 }
0x2072   :  { %v1804_v38 = vadd.f32 %v1802_v49, %v1794_v48  ;;  %v2118_v48 = vld [vmem:[#allocation12 + $0x18] sm:$0xff] }
0x2074   :  { %3085 = vtanh.f32 %v1804_v38 }
0x207e   :  { %v3086_v51 = vpop.eup %3085 }
0x207f   :  { %1807 = vrot.lane.b32.xlu0 %v3086_v51, %s3286_s15 }
0x20f1   :  { %v1808_v52 = vpop.permute.xlu0 %1807 }
0x20f2   :  { %v1810_v55 = vmul.f32 %v3084_v33, %v1808_v52  ;;  %v2115_v33 = vld [vmem:[#allocation12] sm:$0xff] }
0x20f3   :  { %v2938_v49 = vpack.c.bf16 %v2116_v46, %v2115_v33  ;;  %v2282_v52 = vld [vmem:[#allocation13] sm:$0xff] }
0x20f4   :  { %1813 = vrot.lane.b32.xlu1 %v1810_v55, %s3287_s4  ;;  %v2283_v55 = vld [vmem:[#allocation13 + $0x8] sm:$0xff] }
0x2166   :  { %v1814_v57 = vpop.permute.xlu1 %1813 }
0x2167   :  { %2758 = vmatmul.mubr.msk.f32.vlgmr.msra.gmra.mrb[16].mxu1 %vm284_vm2, %v1814_v57  ;;  %v2284_v57 = vld [vmem:[#allocation13 + $0x10] sm:$0xff] }
0x2168   :  { %2933 = vmatpush3.bf16.msra.mxu1 %v3599_v50  ;;  %2779 = vmatprep.mubr.msk.f32.mxu1 %vm3284_vm1, %v3285_v12 }
0x2169   :  { %2934 = vmatprep.subr.bf16.mxu1 %v3283_v9 }
0x216c   :  { %2936 = vmatpush3.bf16.msra.mxu1 %v3609_v53 }
0x216d   :  { %2943 = vmatprep.subr.bf16.mxu1 %v3283_v9 }
0x223a   :  { %v1883_v59 = vpop.f32.mrb[16].mxu1 }
0x223b   :  { %v1887_v60 = vadd.f32 %v1883_v59, %v1286_v58  ;;  %v2759_v61 = vpop.f32.mrb[17].mxu1  ;;  %v2944_v58 = vpack.c.bf16 %v2283_v55, %v2282_v52  ;;  %v2285_v59 = vld [vmem:[#allocation13 + $0x18] sm:$0xff] }
0x223c   :  { %v2286_v61 = vld [vmem:[#allocation13 + $0x20] sm:$0xff] }
0x223d   :  { %3087 = vtanh.f32 %v1887_v60  ;;  %v2437_v50 = vmul.f32 -1.442695, %v1887_v60  ;;  %v2947_v60 = vpack.c.bf16 %v2285_v59, %v2284_v57 }
0x223f   :  { %3089 = vpow2.f32 %v2437_v50  ;;  %v2288_v50 = vld [vmem:[#allocation13 + $0x30] sm:$0xff] }
0x2247   :  { %v3088_v62 = vpop.eup %3087 }
0x2248   :  { %1897 = vrot.lane.b32.xlu0 %v3088_v62, %s3286_s15  ;;  %v2287_v62 = vld [vmem:[#allocation13 + $0x28] sm:$0xff] }
0x2249   :  { %v3090_v63 = vpop.eup %3089 }
0x224a   :  { %v1891_v0 = vadd.f32 1.0, %v3090_v63  ;;  %v2289_v63 = vld [vmem:[#allocation13 + $0x38] sm:$0xff] }
0x224c   :  { %3091 = vrcp.f32 %v1891_v0 }
0x2256   :  { %v3092_v1 = vpop.eup %3091 }
0x2257   :  { %v1895_v2 = vmul.f32 %v3092_v1, %v1804_v38  ;;  %v2941_v38 = vpack.c.bf16 %v2118_v48, %v2117_v47 }
0x22ba   :  { %v1898_v11 = vpop.permute.xlu0 %1897 }
0x22bb   :  { %v1900_v53 = vmul.f32 %v3092_v1, %v1898_v11  ;;  %v2953_v11 = vpack.c.bf16 %v2289_v63, %v2288_v50 }
0x22bd   :  { %1902 = vrot.lane.b32.xlu1 %v1900_v53, %s3286_s15  ;;  %v2290_v53 = vld [vmem:[#allocation13 + $0x40] sm:$0xff] }
0x232f   :  { %v1903_v15 = vpop.permute.xlu1 %1902 }
0x2330   :  { %v1905_v37 = vadd.f32 %v1903_v15, %v1895_v2  ;;  %v2291_v2 = vld [vmem:[#allocation13 + $0x48] sm:$0xff] }
0x2331   :  { %v2956_v15 = vpack.c.bf16 %v2291_v2, %v2290_v53 }
0x2332   :  { %3093 = vtanh.f32 %v1905_v37 }
0x233c   :  { %v3094_v19 = vpop.eup %3093 }
0x233d   :  { %1908 = vrot.lane.b32.xlu0 %v3094_v19, %s3286_s15  ;;  %v2293_v19 = vld [vmem:[#allocation13 + $0x58] sm:$0xff] }
0x23af   :  { %v1909_v3 = vpop.permute.xlu0 %1908 }
0x23b0   :  { %v1911_v4 = vmul.f32 %v3092_v1, %v1909_v3 }
0x23b2   :  { %1914 = vrot.lane.b32.xlu1 %v1911_v4, %s3287_s4 }
0x2424   :  { %v1915_v5 = vpop.permute.xlu1 %1914 }
0x2425   :  { %2769 = vmatmul.mubr.msk.f32.vlgmr.msra.gmra.mrb[26].mxu0 %vm284_vm2, %v1915_v5 }
0x2426   :  { %2784 = vmatprep.mubr.msk.f32.mxu0 %vm3284_vm1, %v3285_v12  ;;  %2783 = vmatpush3.msk.msra.mxu0 %vm2124_vm3, %v2119_v54 }
0x2427   :  { %2937 = vmatprep.subr.bf16.mxu0 %v3283_v9 }
0x2429   :  { %2785 = vmatmul.mubr.msk.f32.vlgmr.msra.gmra.mrb[28].mxu0 %vm2120_vm4, %v2114_v45 }
0x242a   :  { %2795 = vmatprep.mubr.msk.f32.mxu0 %vm3284_vm1, %v3285_v12  ;;  %2939 = vmatpush3.bf16.msra.mxu0 %v2938_v49 }
0x242b   :  { %2940 = vmatprep.subr.bf16.mxu0 %v3283_v9 }
0x242e   :  { %2942 = vmatpush3.bf16.msra.mxu0 %v2941_v38 }
0x24f8   :  { %v1984_v7 = vpop.f32.mrb[26].mxu0 }
0x24f9   :  { %v1988_v8 = vadd.f32 %v1984_v7, %v1291_v36  ;;  %v2770_v10 = vpop.f32.mrb[27].mxu0  ;;  %v2294_v7 = vld [vmem:[#allocation13 + $0x60] sm:$0xff] }
0x24fb   :  { %3095 = vtanh.f32 %v1988_v8  ;;  %v2439_v14 = vmul.f32 -1.442695, %v1988_v8  ;;  %v2295_v8 = vld [vmem:[#allocation13 + $0x68] sm:$0xff] }
0x24fc   :  { %v2194_v4 = vpop.f32.mrb[28].mxu0  ;;  %v2962_v10 = vpack.c.bf16 %v2295_v8, %v2294_v7 }
0x24fd   :  { %3097 = vpow2.f32 %v2439_v14  ;;  %v2786_v5 = vpop.f32.mrb[29].mxu0  ;;  %v2297_v14 = vld [vmem:[#allocation13 + $0x78] sm:$0xff] }
0x2505   :  { %v3096_v13 = vpop.eup %3095 }
0x2506   :  { %1998 = vrot.lane.b32.xlu0 %v3096_v13, %s3286_s15  ;;  %v2296_v13 = vld [vmem:[#allocation13 + $0x70] sm:$0xff] }
0x2507   :  { %v3098_v17 = vpop.eup %3097 }
0x2508   :  { %v1992_v18 = vadd.f32 1.0, %v3098_v17  ;;  %v2965_v17 = vpack.c.bf16 %v2297_v14, %v2296_v13 }
0x250a   :  { %3099 = vrcp.f32 %v1992_v18 }
0x2514   :  { %v3100_v21 = vpop.eup %3099 }
0x2515   :  { %v1996_v24 = vmul.f32 %v3100_v21, %v1905_v37  ;;  %v2292_v37 = vld [vmem:[#allocation13 + $0x50] sm:$0xff] }
0x2516   :  { %v2959_v3 = vpack.c.bf16 %v2293_v19, %v2292_v37 }
0x2578   :  { %v1999_v22 = vpop.permute.xlu0 %1998 }
0x2579   :  { %v2001_v23 = vmul.f32 %v3100_v21, %v1999_v22 }
0x257b   :  { %2003 = vrot.lane.b32.xlu1 %v2001_v23, %s3286_s15 }
0x25ed   :  { %v2004_v25 = vpop.permute.xlu1 %2003 }
0x25ee   :  { %v2006_v56 = vadd.f32 %v2004_v25, %v1996_v24 }
0x25f0   :  { %3101 = vtanh.f32 %v2006_v56 }
0x25fa   :  { %v3102_v26 = vpop.eup %3101 }
0x25fb   :  { %2009 = vrot.lane.b32.xlu0 %v3102_v26, %s3286_s15 }
0x266d   :  { %v2010_v27 = vpop.permute.xlu0 %2009 }
0x266e   :  { %v2012_v28 = vmul.f32 %v3100_v21, %v2010_v27  ;;  %v2445_v21 = vld [vmem:[%s3784_s10] ss:$0 sm:$0xff] }
0x2670   :  { %2015 = vrot.lane.b32.xlu1 %v2012_v28, %s3287_s4 }
0x26e2   :  { %v2016_v29 = vpop.permute.xlu1 %2015 }
0x26e3   :  { %2780 = vmatmul.mubr.msk.f32.vlgmr.msra.gmra.mrb[18].mxu1 %vm284_vm2, %v2016_v29 }
0x26e4   :  { %2830 = vmatprep.mubr.msk.f32.mxu1 %vm3284_vm1, %v3285_v12  ;;  %2945 = vmatpush3.bf16.msra.mxu1 %v2944_v58  ;;  %v2950_v12 = vpack.c.bf16 %v2287_v62, %v2286_v61 }
0x26e5   :  { %2946 = vmatprep.subr.bf16.mxu1 %v3283_v9 }
0x26e8   :  { %2948 = vmatpush3.bf16.msra.mxu1 %v2947_v60 }
0x26e9   :  { %2949 = vmatprep.subr.bf16.mxu1 %v3283_v9 }
0x26ec   :  { %2951 = vmatpush3.bf16.msra.mxu1 %v2950_v12 }
0x26ed   :  { %2952 = vmatprep.subr.bf16.mxu1 %v3283_v9 }
0x26f0   :  { %2954 = vmatpush3.bf16.msra.mxu1 %v2953_v11 }
0x26f1   :  { %2955 = vmatprep.subr.bf16.mxu1 %v3283_v9 }
0x26f4   :  { %2957 = vmatpush3.bf16.msra.mxu1 %v2956_v15 }
0x26f5   :  { %2958 = vmatprep.subr.bf16.mxu1 %v3283_v9 }
0x26f8   :  { %2960 = vmatpush3.bf16.msra.mxu1 %v2959_v3 }
0x26f9   :  { %2961 = vmatprep.subr.bf16.mxu1 %v3283_v9 }
0x26fc   :  { %2963 = vmatpush3.bf16.msra.mxu1 %v2962_v10 }
0x26fd   :  { %2964 = vmatprep.subr.bf16.mxu1 %v3283_v9 }
0x2700   :  { %2966 = vmatpush3.bf16.msra.mxu1 %v2965_v17 }
0x27b6   :  { %v2085_v16 = vpop.f32.mrb[18].mxu1 }
0x27b7   :  { %v2089_v31 = vadd.f32 %v2085_v16, %v1296_v30  ;;  %v2781_v32 = vpop.f32.mrb[19].mxu1 }
0x27b9   :  { %3103 = vtanh.f32 %v2089_v31  ;;  %v2441_v35 = vmul.f32 -1.442695, %v2089_v31 }
0x27bb   :  { %3105 = vpow2.f32 %v2441_v35 }
0x27c3   :  { %v3104_v34 = vpop.eup %3103 }
0x27c4   :  { %2099 = vrot.lane.b32.xlu0 %v3104_v34, %s3286_s15 }
0x27c5   :  { %v3106_v39 = vpop.eup %3105 }
0x27c6   :  { %v2093_v20 = vadd.f32 1.0, %v3106_v39 }
0x27c8   :  { %3107 = vrcp.f32 %v2093_v20 }
0x27d2   :  { %v3108_v40 = vpop.eup %3107 }
0x27d3   :  { %v2097_v43 = vmul.f32 %v3108_v40, %v2006_v56  ;;  %v2446_v56 = vld [vmem:[%s3786_s12] ss:$0 sm:$0xff] }
0x2836   :  { %v2100_v41 = vpop.permute.xlu0 %2099 }
0x2837   :  { %v2102_v42 = vmul.f32 %v3108_v40, %v2100_v41 }
0x2839   :  { %2104 = vrot.lane.b32.xlu1 %v2102_v42, %s3286_s15 }
0x28ab   :  { %v2105_v44 = vpop.permute.xlu1 %2104 }
0x28ac   :  { %v2107_v6 = vadd.f32 %v2105_v44, %v2097_v43 }
0x28ae   :  { %3109 = vtanh.f32 %v2107_v6 }
0x28b8   :  { %v3110_v51 = vpop.eup %3109 }
0x28b9   :  { %2110 = vrot.lane.b32.xlu0 %v3110_v51, %s3286_s15 }
0x292b   :  { %v2111_v0 = vpop.permute.xlu0 %2110 }
0x292c   :  { %v2113_v1 = vmul.f32 %v3108_v40, %v2111_v0 }
0x292e   :  { %2199 = vrot.lane.b32.xlu1 %v2113_v1, %s3287_s4 }
0x29a0   :  { %v2200_v36 = vpop.permute.xlu1 %2199 }
0x29a1   :  { %2796 = vmatmul.mubr.msk.f32.vlgmr.msra.gmra.mrb[30].mxu0 %vm284_vm2, %v2200_v36 }
0x2a74   :  { %v2269_v18 = vpop.f32.mrb[30].mxu0 }
0x2a75   :  { %v2270_v22 = vadd.f32 %v2269_v18, %v2194_v4  ;;  %v2797_v23 = vpop.f32.mrb[31].mxu0 }
0x2a77   :  { %v2280_v24 = vadd.f32 %v2445_v21, %v2270_v22 }
0x2a79   :  { %v2281_v25 = vmax.f32 %v2280_v24, 0.0 }
0x2a7b   :  { %2831 = vmatmul.mubr.f32.vlgmr.msra.gmra.mrb[20].mxu1 %v2281_v25 }
0x2b4e   :  { %v2371_v9 = vpop.f32.mrb[20].mxu1 }
0x2b4f   :  { %v2372_v26 = vadd.f32 %v2446_v56, %v2371_v9  ;;  %v2832_v27 = vpop.f32.mrb[21].mxu1 }
0x2b51   :  { %2375 = vst [vmem:[#allocation15] sm:$0xff] %v2372_v26 }
0x2b52   :  { %3254 = shalt.err (!%p3251_p10)
}
0x2b53   :  { %s3255_s8 = scalar_lea.hbm %s3787_s13, 128 }
0x2b54   :  { %p3256_p11 = scmp.ne.s32.totalorder %s3787_s13, %s3255_s8  ;;  %p3259_p12 = scmp.lt.u32.totalorder %s3255_s8, %s3787_s13 }
0x2b56   :  { %p3261_p13 = pnand %p3259_p12, %p3256_p11 }
0x2b58   :  { %3264 = shalt.err (!%p3261_p13)
}
0x2b59   :  { %2385 = dma.vmem_to_hbm [thread:$0]  %s2383_s25, 128, %s3787_s13, [#allocation6]  }
0x2b5a   :  { %3273 = dma.done.wait [#allocation6], 128  }
0x2b5b   :  { %3274 = vsyncadd [#allocation6], 4294967168 }
0x2b5c   :  { %2389 = vsyncpa [#allocation5], 1 }
0x2b5d   :  { %2390 = vsyncpa [#allocation8], 1 }
0x2b5e   :  { %2391 = vsyncpa [#allocation11], 1 }
0x2b5f   :  { %2392 = vsyncpa [#allocation14], 1 }
0x2b60   :  { %2393 = vsyncpa [#allocation6], 1 }

// kernel: tpu_custom_call.1
= control target key start
LH: loop header
LB: loop body
LE: loop exit
PB: predicated region body
PF: predicated region fallthrough
CT: control target
= control target key end

     0   :  { %18 = vsyncpa [#allocation5], 0  ;;  %s3774_s0 = inlined_call_operand.hbm [shape: f32[8,8,8], index: 0, kind: input, shape index: {}]   ;;  %s3775_s1 = inlined_call_operand.vmem [shape: f32[8,4], index: 1, kind: input, shape index: {}]   ;;  %s3776_s2 = inlined_call_operand.hbm [shape: f32[8,128], index: 2, kind: input, shape index: {}]   ;;  %s3777_s3 = inlined_call_operand.hbm [shape: f32[32,128], index: 3, kind: input, shape index: {}]   ;;  %s3778_s4 = inlined_call_operand.vmem [shape: f32[1,128], index: 4, kind: input, shape index: {}]   ;;  %s3779_s5 = inlined_call_operand.hbm [shape: f32[32,128], index: 5, kind: input, shape index: {}]   ;;  %s3780_s6 = inlined_call_operand.vmem [shape: f32[32,128], index: 6, kind: input, shape index: {}]   ;;  %s3781_s7 = inlined_call_operand.vmem [shape: f32[1,128], index: 7, kind: input, shape index: {}]   ;;  %s3782_s8 = inlined_call_operand.hbm [shape: f32[32,128], index: 8, kind: input, shape index: {}]   ;;  %s3783_s9 = inlined_call_operand.vmem [shape: f32[4,128], index: 9, kind: input, shape index: {}]   ;;  %s3784_s10 = inlined_call_operand.vmem [shape: f32[1,128], index: 10, kind: input, shape index: {}]   ;;  %s3785_s11 = inlined_call_operand.hbm [shape: f32[128,128], index: 11, kind: input, shape index: {}]   ;;  %s3786_s12 = inlined_call_operand.vmem [shape: f32[1,128], index: 12, kind: input, shape index: {}]   ;;  %s3787_s13 = inlined_call_operand.hbm [shape: f32[8,128], index: 13, kind: output, shape index: {}]  }
   0x1   :  { %19 = vsyncpa [#allocation8], 0 }
   0x2   :  { %20 = vsyncpa [#allocation11], 0 }
   0x3   :  { %21 = vsyncpa [#allocation14], 0 }
   0x4   :  { %22 = vsyncpa [#allocation6], 0  ;;  %s3275_s25 = smov [#allocation7]   ;;  %s3111_s29 = scalar_lea.hbm %s3776_s2, 128 }
   0x5   :  { %s43_s26 = sshll.u32 %s3275_s25, 4  ;;  %p3112_p0 = scmp.ne.s32.totalorder %s3776_s2, %s3111_s29  ;;  %s44_s26 = int_to_ptr.vmem [resolvable:$true] %s43_s26 }
   0x6   :  { %p3115_p1 = scmp.lt.u32.totalorder %s3111_s29, %s3776_s2 }
   0x8   :  { %p3117_p2 = pnand %p3115_p1, %p3112_p0 }
   0xa   :  { %3120 = shalt.err (!%p3117_p2)
}
   0xb   :  { %s3121_s17 = scalar_lea.vmem %s44_s26, 128  ;;  %p3126_p4 = scmp.lt.s32.totalorder %s44_s26, %s44_s26 }
   0xc   :  { %p3122_p3 = scmp.ne.s32.totalorder %s44_s26, %s3121_s17  ;;  %p3127_p5 = scmp.lt.s32.totalorder %s3121_s17, %s3121_s17 }
   0xe   :  { %p3128_p6 = por %p3127_p5, %p3126_p4 }
  0x10   :  { %p3129_p7 = pnand %p3128_p6, %p3122_p3 }
  0x12   :  { %3132 = shalt.err (!%p3129_p7)
}
  0x13   :  { %46 = dma.hbm_to_vmem [thread:$0]  %s3776_s2, 128, %s44_s26, [#allocation8]  }
  0x14   :  { %s3276_s20 = smov [#allocation10]   ;;  %s3277_s22 = smov [#allocation4]  }
  0x15   :  { %s66_s21 = sshll.u32 %s3276_s20, 4  ;;  %s28_s23 = sshll.u32 %s3277_s22, 4  ;;  %s67_s21 = int_to_ptr.vmem [resolvable:$true] %s66_s21  ;;  %s29_s23 = int_to_ptr.vmem [resolvable:$true] %s28_s23 }
  0x16   :  { %s3133_s27 = scalar_lea.hbm %s3779_s5, 512 }
  0x17   :  { %p3134_p8 = scmp.ne.s32.totalorder %s3779_s5, %s3133_s27  ;;  %p3137_p9 = scmp.lt.u32.totalorder %s3133_s27, %s3779_s5 }
  0x19   :  { %p3139_p10 = pnand %p3137_p9, %p3134_p8 }
  0x1b   :  { %3142 = shalt.err (!%p3139_p10)
}
  0x1c   :  { %s3143_s2 = scalar_lea.vmem %s67_s21, 512  ;;  %p3148_p12 = scmp.lt.s32.totalorder %s67_s21, %s67_s21 }
  0x1d   :  { %p3144_p11 = scmp.ne.s32.totalorder %s67_s21, %s3143_s2  ;;  %p3149_p13 = scmp.lt.s32.totalorder %s3143_s2, %s3143_s2 }
  0x1f   :  { %p3150_p0 = por %p3149_p13, %p3148_p12 }
  0x21   :  { %p3151_p1 = pnand %p3150_p0, %p3144_p11 }
  0x23   :  { %3154 = shalt.err (!%p3151_p1)
}
  0x24   :  { %s3278_s26 = smov 128   ;;  %s3279_s15 = smov 8  }
  0x25   :  { %72 = dma.hbm_to_vmem [thread:$0]  %s3779_s5, 512, %s67_s21, [#allocation11], %s3278_s26, %s3278_s26, %s3279_s15  }
  0x26   :  { %s3155_s20 = scalar_lea.hbm %s3774_s0, 1024 }
  0x27   :  { %p3156_p2 = scmp.ne.s32.totalorder %s3774_s0, %s3155_s20  ;;  %p3159_p3 = scmp.lt.u32.totalorder %s3155_s20, %s3774_s0 }
  0x29   :  { %p3161_p4 = pnand %p3159_p3, %p3156_p2 }
  0x2b   :  { %3164 = shalt.err (!%p3161_p4)
}
  0x2c   :  { %s3165_s28 = scalar_lea.vmem %s29_s23, 1024  ;;  %p3170_p6 = scmp.lt.s32.totalorder %s29_s23, %s29_s23 }
  0x2d   :  { %p3166_p5 = scmp.ne.s32.totalorder %s29_s23, %s3165_s28  ;;  %p3171_p7 = scmp.lt.s32.totalorder %s3165_s28, %s3165_s28 }
  0x2f   :  { %p3172_p8 = por %p3171_p7, %p3170_p6 }
  0x31   :  { %p3173_p9 = pnand %p3172_p8, %p3166_p5 }
  0x33   :  { %3176 = shalt.err (!%p3173_p9)
}
  0x34   :  { %34 = dma.hbm_to_vmem [thread:$0]  %s3774_s0, 1024, %s29_s23, [#allocation5], %s3278_s26, %s3278_s26, %s3279_s15  }
  0x35   :  { %s3280_s29 = smov [#allocation9]   ;;  %s3281_s14 = smov [#allocation12]  }
  0x36   :  { %s52_s30 = sshll.u32 %s3280_s29, 4  ;;  %s82_s2 = sshll.u32 %s3281_s14, 4  ;;  %s53_s30 = int_to_ptr.vmem [resolvable:$true] %s52_s30  ;;  %s83_s2 = int_to_ptr.vmem [resolvable:$true] %s82_s2 }
  0x37   :  { %s3177_s18 = scalar_lea.hbm %s3777_s3, 512 }
  0x38   :  { %p3178_p10 = scmp.ne.s32.totalorder %s3777_s3, %s3177_s18  ;;  %p3181_p11 = scmp.lt.u32.totalorder %s3177_s18, %s3777_s3 }
  0x3a   :  { %p3183_p12 = pnand %p3181_p11, %p3178_p10 }
  0x3c   :  { %3186 = shalt.err (!%p3183_p12)
}
  0x3d   :  { %s3187_s0 = scalar_lea.vmem %s53_s30, 512  ;;  %p3192_p0 = scmp.lt.s32.totalorder %s53_s30, %s53_s30 }
  0x3e   :  { %p3188_p13 = scmp.ne.s32.totalorder %s53_s30, %s3187_s0  ;;  %p3193_p1 = scmp.lt.s32.totalorder %s3187_s0, %s3187_s0 }
  0x40   :  { %p3194_p2 = por %p3193_p1, %p3192_p0 }
  0x42   :  { %p3195_p3 = pnand %p3194_p2, %p3188_p13 }
  0x44   :  { %3198 = shalt.err (!%p3195_p3)
}
  0x45   :  { %58 = dma.hbm_to_vmem [thread:$0]  %s3777_s3, 512, %s53_s30, [#allocation8], %s3278_s26, %s3278_s26, %s3279_s15  }
  0x46   :  { %s3199_s5 = scalar_lea.hbm %s3782_s8, 512 }
  0x47   :  { %p3200_p4 = scmp.ne.s32.totalorder %s3782_s8, %s3199_s5  ;;  %p3203_p5 = scmp.lt.u32.totalorder %s3199_s5, %s3782_s8 }
  0x49   :  { %p3205_p6 = pnand %p3203_p5, %p3200_p4 }
  0x4b   :  { %3208 = shalt.err (!%p3205_p6)
}
  0x4c   :  { %s3209_s17 = scalar_lea.vmem %s83_s2, 512  ;;  %p3214_p8 = scmp.lt.s32.totalorder %s83_s2, %s83_s2 }
  0x4d   :  { %p3210_p7 = scmp.ne.s32.totalorder %s83_s2, %s3209_s17  ;;  %p3215_p9 = scmp.lt.s32.totalorder %s3209_s17, %s3209_s17 }
  0x4f   :  { %p3216_p10 = por %p3215_p9, %p3214_p8 }
  0x51   :  { %p3217_p11 = pnand %p3216_p10, %p3210_p7 }
  0x53   :  { %3220 = shalt.err (!%p3217_p11)
}
  0x54   :  { %88 = dma.hbm_to_vmem [thread:$0]  %s3782_s8, 512, %s83_s2, [#allocation11], %s3278_s26, %s3278_s26, %s3279_s15  }
  0x55   :  { %s3282_s18 = smov [#allocation13]   ;;  %s3221_s24 = scalar_lea.hbm %s3785_s11, 2048 }
  0x56   :  { %s98_s19 = sshll.u32 %s3282_s18, 4  ;;  %p3222_p12 = scmp.ne.s32.totalorder %s3785_s11, %s3221_s24  ;;  %s99_s19 = int_to_ptr.vmem [resolvable:$true] %s98_s19 }
  0x57   :  { %p3225_p13 = scmp.lt.u32.totalorder %s3221_s24, %s3785_s11 }
  0x59   :  { %p3227_p0 = pnand %p3225_p13, %p3222_p12 }
  0x5b   :  { %3230 = shalt.err (!%p3227_p0)
}
  0x5c   :  { %s3231_s28 = scalar_lea.vmem %s99_s19, 2048  ;;  %p3236_p2 = scmp.lt.s32.totalorder %s99_s19, %s99_s19 }
  0x5d   :  { %p3232_p1 = scmp.ne.s32.totalorder %s99_s19, %s3231_s28  ;;  %p3237_p3 = scmp.lt.s32.totalorder %s3231_s28, %s3231_s28 }
  0x5f   :  { %p3238_p4 = por %p3237_p3, %p3236_p2 }
  0x61   :  { %p3239_p5 = pnand %p3238_p4, %p3232_p1 }
  0x63   :  { %3242 = shalt.err (!%p3239_p5)
}
  0x64   :  { %104 = dma.hbm_to_vmem [thread:$0]  %s3785_s11, 2048, %s99_s19, [#allocation14], %s3278_s26, %s3278_s26, %s3279_s15  }
  0x65   :  { %3265 = dma.done.wait [#allocation5], 1024  }
  0x66   :  { %3266 = vsyncadd [#allocation5], 4294966272 }
  0x67   :  { %3267 = dma.done.wait [#allocation8], 640  }
  0x68   :  { %3268 = vsyncadd [#allocation8], 4294966656 }
  0x69   :  { %3269 = dma.done.wait [#allocation11], 1024  }
  0x6a   :  { %3270 = vsyncadd [#allocation11], 4294966272 }
  0x6b   :  { %3271 = dma.done.wait [#allocation14], 2048  }
  0x6c   :  { %3272 = vsyncadd [#allocation14], 4294965248  ;;  %vm141_vm0 = vcmask 64512   ;;  %v133_v0 = vld [vmem:[#allocation7] sm:$0xff]  ;;  %v126_v2 = vld [vmem:[#allocation4 + $0x8] sm:$0xff]  ;;  %v3283_v9 = vmov 0.0|0.0  }
  0x6d   :  { %v125_v1 = vld [vmem:[#allocation4] sm:$0xff]  ;;  %2572 = vmatprep.subr.mxu0 %v133_v0  ;;  %v280_v3 = vld [vmem:[#allocation9] sm:$0xff]  ;;  %v281_v4 = vld [vmem:[#allocation9 + $0x8] sm:$0xff]  ;;  %2967 = vmatprep.subr.mxu1 %v133_v0  ;;  %vm3284_vm1 = vmmov 0   ;;  %v3285_v12 = vmov 0.0   ;;  %s3286_s15 = smov 32  }
  0x6e   :  { %2574 = vmatprep.mubr.msk.f32.mxu0 %vm141_vm0, %v125_v1  ;;  %v127_v5 = vld [vmem:[#allocation4 + $0x10] sm:$0xff]  ;;  %2573 = vmatpush3.msra.mxu0 %v133_v0  ;;  %v3447_v6 = vpack.c.bf16 %v281_v4, %v280_v3  ;;  %v282_v7 = vld [vmem:[#allocation9 + $0x10] sm:$0xff]  ;;  %v283_v8 = vld [vmem:[#allocation9 + $0x18] sm:$0xff]  ;;  %vm284_vm2 = vcmask 261120   ;;  %vm2124_vm3 = vcmask 1043456   ;;  %vm2120_vm4 = vcmask 31744  }
  0x6f   :  { %2575 = vmatmul.mubr.msk.f32.vlgmr.msra.gmra.mrb[0].mxu0 %vm141_vm0, %v126_v2  ;;  %2833 = vmatprep.subr.bf16.mxu0 %v3283_v9  ;;  %v128_v10 = vld [vmem:[#allocation4 + $0x18] sm:$0xff]  ;;  %v3453_v11 = vpack.c.bf16 %v283_v8, %v282_v7  ;;  %v3472_v15 = vld [vmem:[%s3778_s4] ss:$0 sm:$0xff]  ;;  %s3287_s4 = smov 64   ;;  %v131_v7 = vld [vmem:[#allocation4 + $0x30] sm:$0xff]  ;;  %s3288_s23 = smov [#allocation15]  }
  0x70   :  { %2835 = vmatpush3.bf16.msra.mxu0 %v3447_v6  ;;  %2577 = vmatprep.mubr.msk.f32.mxu0 %vm141_vm0, %v127_v5  ;;  %v129_v4 = vld [vmem:[#allocation4 + $0x20] sm:$0xff]  ;;  %v130_v5 = vld [vmem:[#allocation4 + $0x28] sm:$0xff]  ;;  %v132_v8 = vld [vmem:[#allocation4 + $0x38] sm:$0xff]  ;;  %s2382_s25 = sshll.u32 %s3288_s23, 4  ;;  %s2383_s25 = int_to_ptr.vmem [resolvable:$true] %s2382_s25 }
  0x71   :  { %2836 = vmatprep.subr.bf16.mxu0 %v3283_v9  ;;  %2968 = vmatpush3.msra.mxu1 %v133_v0  ;;  %s3243_s27 = scalar_lea.vmem %s2383_s25, 128  ;;  %p3248_p7 = scmp.lt.s32.totalorder %s2383_s25, %s2383_s25 }
  0x72   :  { %2851 = vmatprep.subr.bf16.mxu1 %v3283_v9  ;;  %2580 = vmatprep.mubr.msk.f32.mxu1 %vm141_vm0, %v129_v4  ;;  %p3244_p6 = scmp.ne.s32.totalorder %s2383_s25, %s3243_s27  ;;  %p3249_p8 = scmp.lt.s32.totalorder %s3243_s27, %s3243_s27 }
  0x73   :  { %2578 = vmatmul.mubr.msk.f32.gmra.mrb[2].mxu0 %vm141_vm0, %v128_v10  ;;  %2581 = vmatmul.mubr.msk.f32.vlgmr.msra.gmra.mrb[0].mxu1 %vm141_vm0, %v130_v5  ;;  %v1159_v5 = vld [vmem:[#allocation10] sm:$0xff] }
  0x74   :  { %2838 = vmatpush3.bf16.msra.mxu0 %v3453_v11  ;;  %2594 = vmatprep.mubr.msk.f32.mxu0 %vm3284_vm1, %v3285_v12  ;;  %p3250_p9 = por %p3249_p8, %p3248_p7 }
  0x75   :  { %2839 = vmatprep.subr.bf16.mxu0 %v3283_v9  ;;  %2853 = vmatpush3.bf16.msra.mxu1 %v3447_v6 }
  0x76   :  { %2583 = vmatprep.mubr.msk.f32.mxu1 %vm141_vm0, %v131_v7  ;;  %2854 = vmatprep.subr.bf16.mxu1 %v3283_v9  ;;  %v1160_v7 = vld [vmem:[#allocation10 + $0x8] sm:$0xff]  ;;  %p3251_p10 = pnand %p3250_p9, %p3244_p6 }
  0x77   :  { %2595 = vmatmul.mubr.f32.vlgmr.msra.gmra.mrb[4].mxu0 %v3285_v12  ;;  %2584 = vmatmul.mubr.msk.f32.gmra.mrb[2].mxu1 %vm141_vm0, %v132_v8  ;;  %v2881_v8 = vpack.c.bf16 %v1160_v7, %v1159_v5 }
  0x78   :  { %2841 = vmatpush3.bf16.msra.mxu0 %v3447_v6  ;;  %2605 = vmatprep.mubr.msk.f32.mxu0 %vm3284_vm1, %v3285_v12 }
  0x79   :  { %2842 = vmatprep.subr.bf16.mxu0 %v3283_v9  ;;  %2856 = vmatpush3.bf16.msra.mxu1 %v3453_v11 }
  0x7a   :  { %2627 = vmatprep.mubr.msk.f32.mxu1 %vm3284_vm1, %v3285_v12  ;;  %2863 = vmatprep.subr.bf16.mxu1 %v3283_v9 }
  0x7c   :  { %2844 = vmatpush3.bf16.msra.mxu0 %v3453_v11 }
  0x7d   :  { %2845 = vmatprep.subr.bf16.mxu0 %v3283_v9 }
 0x142   :  { %v2576_v13 = vpop.f32.mrb[0].mxu0 }
 0x143   :  { %v232_v14 = vpop.f32.mrb[1].mxu0  ;;  %v238_v36 = vadd.f32 %v2576_v13, %v3472_v15 }
 0x144   :  { %v233_v18 = vadd.f32 %v3472_v15, %v232_v14 }
 0x146   :  { %v3474_v16 = vpop.f32.mrb[2].mxu0 }
 0x147   :  { %v3476_v17 = vpop.f32.mrb[3].mxu0 }
 0x148   :  { %v243_v54 = vadd.f32 %v3472_v15, %v3476_v17  ;;  %v3520_v17 = vpop.f32.mrb[0].mxu1 }
 0x14a   :  { %v354_v19 = vpop.f32.mrb[4].mxu0 }
 0x14b   :  { %v358_v20 = vadd.f32 %v354_v19, %v233_v18  ;;  %v2596_v21 = vpop.f32.mrb[5].mxu0  ;;  %v252_v18 = vpop.f32.mrb[1].mxu1 }
 0x14c   :  { %v3522_v19 = vpop.f32.mrb[2].mxu1 }
 0x14d   :  { %2983 = vtanh.f32 %v358_v20  ;;  %v2403_v23 = vmul.f32 -1.442695, %v358_v20  ;;  %v3524_v20 = vpop.f32.mrb[3].mxu1 }
 0x14f   :  { %2985 = vpow2.f32 %v2403_v23 }
 0x157   :  { %v2984_v22 = vpop.eup %2983 }
 0x158   :  { %368 = vrot.lane.b32.xlu0 %v2984_v22, %s3286_s15  ;;  %v248_v22 = vadd.f32 %v3474_v16, %v3472_v15 }
 0x159   :  { %v2986_v24 = vpop.eup %2985 }
 0x15a   :  { %v362_v25 = vadd.f32 1.0, %v2986_v24 }
 0x15c   :  { %2987 = vrcp.f32 %v362_v25 }
 0x166   :  { %v2988_v26 = vpop.eup %2987 }
 0x167   :  { %v366_v29 = vmul.f32 0.0, %v2988_v26 }
 0x1ca   :  { %v369_v27 = vpop.permute.xlu0 %368 }
 0x1cb   :  { %v371_v28 = vmul.f32 %v2988_v26, %v369_v27 }
 0x1cd   :  { %373 = vrot.lane.b32.xlu0 %v371_v28, %s3286_s15 }
 0x23f   :  { %v374_v30 = vpop.permute.xlu0 %373 }
 0x240   :  { %v376_v31 = vadd.f32 %v374_v30, %v366_v29 }
 0x242   :  { %2989 = vtanh.f32 %v376_v31 }
 0x24c   :  { %v2990_v32 = vpop.eup %2989 }
 0x24d   :  { %379 = vrot.lane.b32.xlu1 %v2990_v32, %s3286_s15 }
 0x2bf   :  { %v380_v33 = vpop.permute.xlu1 %379 }
 0x2c0   :  { %v382_v34 = vmul.f32 %v2988_v26, %v380_v33 }
 0x2c2   :  { %384 = vrot.lane.b32.xlu1 %v382_v34, %s3287_s4 }
 0x334   :  { %v385_v35 = vpop.permute.xlu1 %384 }
 0x335   :  { %387 = vst.msk [vmem:[#allocation3] sm:$0xff] %vm284_vm2, %v385_v35  ;;  %2606 = vmatmul.mubr.msk.f32.vlgmr.msra.gmra.mrb[6].mxu0 %vm284_vm2, %v385_v35 }
 0x336   :  { %2847 = vmatpush3.bf16.msra.mxu0 %v3447_v6  ;;  %2616 = vmatprep.mubr.msk.f32.mxu0 %vm3284_vm1, %v3285_v12 }
 0x337   :  { %2848 = vmatprep.subr.bf16.mxu0 %v3283_v9 }
 0x33a   :  { %2850 = vmatpush3.bf16.msra.mxu0 %v3453_v11 }
 0x33b   :  { %2857 = vmatprep.subr.bf16.mxu0 %v3283_v9 }
 0x408   :  { %v462_v37 = vpop.f32.mrb[6].mxu0 }
 0x409   :  { %v466_v38 = vadd.f32 %v462_v37, %v238_v36  ;;  %v2607_v39 = vpop.f32.mrb[7].mxu0 }
 0x40a   :  { %v253_v39 = vadd.f32 %v3472_v15, %v252_v18  ;;  %v1162_v18 = vld [vmem:[#allocation10 + $0x18] sm:$0xff] }
 0x40b   :  { %2991 = vtanh.f32 %v466_v38  ;;  %v2405_v41 = vmul.f32 -1.442695, %v466_v38 }
 0x40d   :  { %2993 = vpow2.f32 %v2405_v41 }
 0x415   :  { %v2992_v40 = vpop.eup %2991 }
 0x416   :  { %476 = vrot.lane.b32.xlu0 %v2992_v40, %s3286_s15 }
 0x417   :  { %v2994_v42 = vpop.eup %2993 }
 0x418   :  { %v470_v43 = vadd.f32 1.0, %v2994_v42 }
 0x41a   :  { %2995 = vrcp.f32 %v470_v43 }
 0x424   :  { %v2996_v44 = vpop.eup %2995 }
 0x425   :  { %v474_v47 = vmul.f32 %v2996_v44, %v376_v31 }
 0x488   :  { %v477_v45 = vpop.permute.xlu0 %476 }
 0x489   :  { %v479_v46 = vmul.f32 %v2996_v44, %v477_v45 }
 0x48b   :  { %481 = vrot.lane.b32.xlu1 %v479_v46, %s3286_s15 }
 0x4fd   :  { %v482_v48 = vpop.permute.xlu1 %481 }
 0x4fe   :  { %v484_v49 = vadd.f32 %v482_v48, %v474_v47 }
 0x500   :  { %2997 = vtanh.f32 %v484_v49 }
 0x50a   :  { %v2998_v50 = vpop.eup %2997 }
 0x50b   :  { %487 = vrot.lane.b32.xlu0 %v2998_v50, %s3286_s15 }
 0x57d   :  { %v488_v51 = vpop.permute.xlu0 %487 }
 0x57e   :  { %v490_v52 = vmul.f32 %v2996_v44, %v488_v51 }
 0x580   :  { %492 = vrot.lane.b32.xlu1 %v490_v52, %s3287_s4 }
 0x5f2   :  { %v493_v53 = vpop.permute.xlu1 %492 }
 0x5f3   :  { %496 = vst.msk [vmem:[#allocation3 + $0x8] sm:$0xff] %vm284_vm2, %v493_v53  ;;  %2617 = vmatmul.mubr.msk.f32.vlgmr.msra.gmra.mrb[8].mxu0 %vm284_vm2, %v493_v53 }
 0x5f4   :  { %2859 = vmatpush3.bf16.msra.mxu0 %v3447_v6  ;;  %2638 = vmatprep.mubr.msk.f32.mxu0 %vm3284_vm1, %v3285_v12 }
 0x5f5   :  { %2860 = vmatprep.subr.bf16.mxu0 %v3283_v9 }
 0x5f8   :  { %2862 = vmatpush3.bf16.msra.mxu0 %v3453_v11 }
 0x5f9   :  { %2869 = vmatprep.subr.bf16.mxu0 %v3283_v9 }
 0x6c6   :  { %v571_v55 = vpop.f32.mrb[8].mxu0 }
 0x6c7   :  { %v575_v56 = vadd.f32 %v571_v55, %v243_v54  ;;  %v2618_v57 = vpop.f32.mrb[9].mxu0 }
 0x6c8   :  { %v258_v57 = vadd.f32 %v3520_v17, %v3472_v15  ;;  %v1161_v17 = vld [vmem:[#allocation10 + $0x10] sm:$0xff] }
 0x6c9   :  { %2999 = vtanh.f32 %v575_v56  ;;  %v2407_v59 = vmul.f32 -1.442695, %v575_v56 }
 0x6cb   :  { %3001 = vpow2.f32 %v2407_v59 }
 0x6d3   :  { %v3000_v58 = vpop.eup %2999 }
 0x6d4   :  { %585 = vrot.lane.b32.xlu0 %v3000_v58, %s3286_s15 }
 0x6d5   :  { %v3002_v60 = vpop.eup %3001 }
 0x6d6   :  { %v579_v61 = vadd.f32 1.0, %v3002_v60 }
 0x6d8   :  { %3003 = vrcp.f32 %v579_v61 }
 0x6e2   :  { %v3004_v62 = vpop.eup %3003 }
 0x6e3   :  { %v583_v1 = vmul.f32 %v3004_v62, %v484_v49 }
 0x746   :  { %v586_v63 = vpop.permute.xlu0 %585 }
 0x747   :  { %v588_v0 = vmul.f32 %v3004_v62, %v586_v63 }
 0x749   :  { %590 = vrot.lane.b32.xlu1 %v588_v0, %s3286_s15 }
 0x7bb   :  { %v591_v2 = vpop.permute.xlu1 %590 }
 0x7bc   :  { %v593_v3 = vadd.f32 %v591_v2, %v583_v1 }
 0x7be   :  { %3005 = vtanh.f32 %v593_v3 }
 0x7c8   :  { %v3006_v10 = vpop.eup %3005 }
 0x7c9   :  { %596 = vrot.lane.b32.xlu0 %v3006_v10, %s3286_s15 }
 0x83b   :  { %v597_v13 = vpop.permute.xlu0 %596 }
 0x83c   :  { %v599_v14 = vmul.f32 %v3004_v62, %v597_v13 }
 0x83e   :  { %601 = vrot.lane.b32.xlu1 %v599_v14, %s3287_s4 }
 0x8b0   :  { %v602_v21 = vpop.permute.xlu1 %601 }
 0x8b1   :  { %605 = vst.msk [vmem:[#allocation3 + $0x10] sm:$0xff] %vm284_vm2, %v602_v21  ;;  %2628 = vmatmul.mubr.msk.f32.vlgmr.msra.gmra.mrb[4].mxu1 %vm284_vm2, %v602_v21  ;;  %v2885_v21 = vpack.c.bf16 %v1162_v18, %v1161_v17 }
 0x8b2   :  { %2865 = vmatpush3.bf16.msra.mxu1 %v3447_v6  ;;  %2649 = vmatprep.mubr.msk.f32.mxu1 %vm3284_vm1, %v3285_v12 }
 0x8b3   :  { %2866 = vmatprep.subr.bf16.mxu1 %v3283_v9 }
 0x8b6   :  { %2868 = vmatpush3.bf16.msra.mxu1 %v3453_v11 }
 0x8b7   :  { %2875 = vmatprep.subr.bf16.mxu1 %v3283_v9 }
 0x984   :  { %v680_v23 = vpop.f32.mrb[4].mxu1 }
 0x985   :  { %v684_v24 = vadd.f32 %v680_v23, %v248_v22  ;;  %v2629_v25 = vpop.f32.mrb[5].mxu1  ;;  %v1151_v23 = vld [vmem:[#allocation3] sm:$0xff] }
 0x986   :  { %v1153_v25 = vld [vmem:[#allocation3 + $0x10] sm:$0xff] }
 0x987   :  { %3007 = vtanh.f32 %v684_v24  ;;  %v2409_v27 = vmul.f32 -1.442695, %v684_v24  ;;  %v1152_v24 = vld [vmem:[#allocation3 + $0x8] sm:$0xff] }
 0x989   :  { %3009 = vpow2.f32 %v2409_v27 }
 0x991   :  { %v3008_v26 = vpop.eup %3007 }
 0x992   :  { %694 = vrot.lane.b32.xlu0 %v3008_v26, %s3286_s15 }
 0x993   :  { %v3010_v28 = vpop.eup %3009 }
 0x994   :  { %v688_v29 = vadd.f32 1.0, %v3010_v28 }
 0x996   :  { %3011 = vrcp.f32 %v688_v29  ;;  %v263_v29 = vadd.f32 %v3472_v15, %v3524_v20 }
 0x9a0   :  { %v3012_v30 = vpop.eup %3011 }
 0x9a1   :  { %v692_v33 = vmul.f32 %v3012_v30, %v593_v3 }
 0xa04   :  { %v695_v31 = vpop.permute.xlu0 %694 }
 0xa05   :  { %v697_v32 = vmul.f32 %v3012_v30, %v695_v31 }
 0xa07   :  { %699 = vrot.lane.b32.xlu1 %v697_v32, %s3286_s15 }
 0xa79   :  { %v700_v34 = vpop.permute.xlu1 %699 }
 0xa7a   :  { %v702_v16 = vadd.f32 %v700_v34, %v692_v33 }
 0xa7c   :  { %3013 = vtanh.f32 %v702_v16 }
 0xa86   :  { %v3014_v35 = vpop.eup %3013 }
 0xa87   :  { %705 = vrot.lane.b32.xlu0 %v3014_v35, %s3286_s15 }
 0xaf9   :  { %v706_v36 = vpop.permute.xlu0 %705 }
 0xafa   :  { %v708_v37 = vmul.f32 %v3012_v30, %v706_v36 }
 0xafc   :  { %710 = vrot.lane.b32.xlu1 %v708_v37, %s3287_s4 }
 0xb6e   :  { %v711_v38 = vpop.permute.xlu1 %710 }
 0xb6f   :  { %714 = vst.msk [vmem:[#allocation3 + $0x18] sm:$0xff] %vm284_vm2, %v711_v38  ;;  %2639 = vmatmul.mubr.msk.f32.vlgmr.msra.gmra.mrb[10].mxu0 %vm284_vm2, %v711_v38 }
 0xb70   :  { %2871 = vmatpush3.bf16.msra.mxu0 %v3447_v6  ;;  %2660 = vmatprep.mubr.msk.f32.mxu0 %vm3284_vm1, %v3285_v12 }
 0xb71   :  { %2872 = vmatprep.subr.bf16.mxu0 %v3283_v9 }
 0xb74   :  { %2874 = vmatpush3.bf16.msra.mxu0 %v3453_v11 }
 0xb75   :  { %2882 = vmatprep.subr.bf16.mxu0 %v2881_v8 }
 0xb76   :  { %v1154_v26 = vld [vmem:[#allocation3 + $0x18] sm:$0xff] }
 0xc42   :  { %v789_v40 = vpop.f32.mrb[10].mxu0 }
 0xc43   :  { %v793_v41 = vadd.f32 %v789_v40, %v253_v39  ;;  %v2640_v42 = vpop.f32.mrb[11].mxu0 }
 0xc45   :  { %3015 = vtanh.f32 %v793_v41  ;;  %v2411_v44 = vmul.f32 -1.442695, %v793_v41 }
 0xc47   :  { %3017 = vpow2.f32 %v2411_v44 }
 0xc4f   :  { %v3016_v43 = vpop.eup %3015 }
 0xc50   :  { %803 = vrot.lane.b32.xlu0 %v3016_v43, %s3286_s15 }
 0xc51   :  { %v3018_v45 = vpop.eup %3017 }
 0xc52   :  { %v797_v46 = vadd.f32 1.0, %v3018_v45 }
 0xc54   :  { %3019 = vrcp.f32 %v797_v46 }
 0xc5e   :  { %v3020_v47 = vpop.eup %3019 }
 0xc5f   :  { %v801_v50 = vmul.f32 %v3020_v47, %v702_v16 }
 0xcc2   :  { %v804_v48 = vpop.permute.xlu0 %803 }
 0xcc3   :  { %v806_v49 = vmul.f32 %v3020_v47, %v804_v48  ;;  %v1308_v48 = vld [vmem:[%s3780_s6] sm:$0xff] }
 0xcc5   :  { %808 = vrot.lane.b32.xlu1 %v806_v49, %s3286_s15  ;;  %v1309_v49 = vld [vmem:[%s3780_s6 + $0x8] sm:$0xff] }
 0xd37   :  { %v809_v51 = vpop.permute.xlu1 %808 }
 0xd38   :  { %v811_v52 = vadd.f32 %v809_v51, %v801_v50  ;;  %v3599_v50 = vpack.c.bf16 %v1309_v49, %v1308_v48  ;;  %v1310_v51 = vld [vmem:[%s3780_s6 + $0x10] sm:$0xff] }
 0xd3a   :  { %3021 = vtanh.f32 %v811_v52 }
 0xd44   :  { %v3022_v53 = vpop.eup %3021 }
 0xd45   :  { %814 = vrot.lane.b32.xlu0 %v3022_v53, %s3286_s15 }
 0xdb7   :  { %v815_v54 = vpop.permute.xlu0 %814 }
 0xdb8   :  { %v817_v55 = vmul.f32 %v3020_v47, %v815_v54 }
 0xdba   :  { %819 = vrot.lane.b32.xlu1 %v817_v55, %s3287_s4 }
 0xe2c   :  { %v820_v56 = vpop.permute.xlu1 %819 }
 0xe2d   :  { %823 = vst.msk [vmem:[#allocation3 + $0x20] sm:$0xff] %vm284_vm2, %v820_v56  ;;  %2650 = vmatmul.mubr.msk.f32.vlgmr.msra.gmra.mrb[6].mxu1 %vm284_vm2, %v820_v56 }
 0xe2e   :  { %2877 = vmatpush3.bf16.msra.mxu1 %v3447_v6  ;;  %2671 = vmatprep.mubr.msk.f32.mxu1 %vm3284_vm1, %v3285_v12 }
 0xe2f   :  { %2878 = vmatprep.subr.bf16.mxu1 %v3283_v9 }
 0xe32   :  { %2880 = vmatpush3.bf16.msra.mxu1 %v3453_v11 }
 0xe33   :  { %2889 = vmatprep.subr.bf16.mxu1 %v3283_v9 }
 0xe34   :  { %v1155_v27 = vld [vmem:[#allocation3 + $0x20] sm:$0xff] }
 0xf00   :  { %v898_v58 = vpop.f32.mrb[6].mxu1 }
 0xf01   :  { %v902_v59 = vadd.f32 %v898_v58, %v258_v57  ;;  %v2651_v60 = vpop.f32.mrb[7].mxu1  ;;  %v268_v58 = vadd.f32 %v3522_v19, %v3472_v15 }
 0xf03   :  { %3023 = vtanh.f32 %v902_v59  ;;  %v2413_v6 = vmul.f32 -1.442695, %v902_v59 }
 0xf05   :  { %3025 = vpow2.f32 %v2413_v6  ;;  %v3635_v6 = vld [vmem:[%s3781_s7] ss:$0 sm:$0xff] }
 0xf0d   :  { %v3024_v61 = vpop.eup %3023 }
 0xf0e   :  { %912 = vrot.lane.b32.xlu0 %v3024_v61, %s3286_s15 }
 0xf0f   :  { %v3026_v62 = vpop.eup %3025 }
 0xf10   :  { %v906_v63 = vadd.f32 1.0, %v3026_v62 }
 0xf12   :  { %3027 = vrcp.f32 %v906_v63 }
 0xf1c   :  { %v3028_v0 = vpop.eup %3027 }
 0xf1d   :  { %v910_v2 = vmul.f32 %v3028_v0, %v811_v52  ;;  %v1311_v52 = vld [vmem:[%s3780_s6 + $0x18] sm:$0xff] }
 0xf1e   :  { %v3609_v53 = vpack.c.bf16 %v1311_v52, %v1310_v51 }
 0xf80   :  { %v913_v1 = vpop.permute.xlu0 %912 }
 0xf81   :  { %v915_v11 = vmul.f32 %v3028_v0, %v913_v1 }
 0xf83   :  { %917 = vrot.lane.b32.xlu1 %v915_v11, %s3286_s15 }
 0xff5   :  { %v918_v3 = vpop.permute.xlu1 %917 }
 0xff6   :  { %v920_v4 = vadd.f32 %v918_v3, %v910_v2 }
 0xff8   :  { %3029 = vtanh.f32 %v920_v4 }
0x1002   :  { %v3030_v10 = vpop.eup %3029 }
0x1003   :  { %923 = vrot.lane.b32.xlu0 %v3030_v10, %s3286_s15 }
0x1075   :  { %v924_v13 = vpop.permute.xlu0 %923 }
0x1076   :  { %v926_v14 = vmul.f32 %v3028_v0, %v924_v13 }
0x1078   :  { %928 = vrot.lane.b32.xlu1 %v926_v14, %s3287_s4 }
0x10ea   :  { %v929_v22 = vpop.permute.xlu1 %928 }
0x10eb   :  { %932 = vst.msk [vmem:[#allocation3 + $0x28] sm:$0xff] %vm284_vm2, %v929_v22  ;;  %2661 = vmatmul.mubr.msk.f32.vlgmr.msra.gmra.mrb[12].mxu0 %vm284_vm2, %v929_v22 }
0x10ec   :  { %2884 = vmatpush3.bf16.msra.mxu0 %v2881_v8  ;;  %2682 = vmatprep.mubr.msk.f32.mxu0 %vm284_vm2, %v1151_v23 }
0x10ed   :  { %2886 = vmatprep.subr.bf16.mxu0 %v2885_v21 }
0x10f0   :  { %2888 = vmatpush3.bf16.msra.mxu0 %v2885_v21 }
0x10f1   :  { %2901 = vmatprep.subr.bf16.mxu0 %v3283_v9 }
0x10f2   :  { %v1156_v28 = vld [vmem:[#allocation3 + $0x28] sm:$0xff] }
0x10f3   :  { %2683 = vmatmul.mubr.msk.f32.vlgmr.msra.gmra.mrb[14].mxu0 %vm284_vm2, %v1152_v24 }
0x10f4   :  { %2685 = vmatprep.mubr.msk.f32.mxu0 %vm284_vm2, %v1153_v25  ;;  %2903 = vmatpush3.bf16.msra.mxu0 %v3599_v50 }
0x10f5   :  { %2904 = vmatprep.subr.bf16.mxu0 %v3283_v9 }
0x10f7   :  { %2686 = vmatmul.mubr.msk.f32.gmra.mrb[16].mxu0 %vm284_vm2, %v1154_v26 }
0x10f8   :  { %2688 = vmatprep.mubr.msk.f32.mxu0 %vm284_vm2, %v1155_v27  ;;  %2906 = vmatpush3.bf16.msra.mxu0 %v3609_v53 }
0x10f9   :  { %2913 = vmatprep.subr.bf16.mxu0 %v3283_v9 }
0x10fb   :  { %2689 = vmatmul.mubr.msk.f32.gmra.mrb[18].mxu0 %vm284_vm2, %v1156_v28 }
0x11be   :  { %v1007_v30 = vpop.f32.mrb[12].mxu0 }
0x11bf   :  { %v1011_v31 = vadd.f32 %v1007_v30, %v263_v29  ;;  %v2662_v32 = vpop.f32.mrb[13].mxu0 }
0x11c1   :  { %3031 = vtanh.f32 %v1011_v31  ;;  %v2415_v39 = vmul.f32 -1.442695, %v1011_v31 }
0x11c3   :  { %3033 = vpow2.f32 %v2415_v39 }
0x11c6   :  { %v3577_v33 = vpop.f32.mrb[14].mxu0 }
0x11c7   :  { %v1260_v34 = vpop.f32.mrb[15].mxu0 }
0x11c8   :  { %v1261_v62 = vadd.f32 %v3635_v6, %v1260_v34 }
0x11ca   :  { %v3579_v16 = vpop.f32.mrb[16].mxu0 }
0x11cb   :  { %v3032_v35 = vpop.eup %3031  ;;  %v3581_v36 = vpop.f32.mrb[17].mxu0 }
0x11cc   :  { %1021 = vrot.lane.b32.xlu0 %v3032_v35, %s3286_s15  ;;  %v1266_v35 = vadd.f32 %v3577_v33, %v3635_v6 }
0x11cd   :  { %v3034_v20 = vpop.eup %3033 }
0x11ce   :  { %v3584_v37 = vpop.f32.mrb[18].mxu0  ;;  %v1015_v40 = vadd.f32 1.0, %v3034_v20 }
0x11cf   :  { %v3586_v38 = vpop.f32.mrb[19].mxu0 }
0x11d0   :  { %3035 = vrcp.f32 %v1015_v40 }
0x11da   :  { %v3036_v41 = vpop.eup %3035 }
0x11db   :  { %v1019_v44 = vmul.f32 %v3036_v41, %v920_v4 }
0x123e   :  { %v1022_v42 = vpop.permute.xlu0 %1021 }
0x123f   :  { %v1024_v43 = vmul.f32 %v3036_v41, %v1022_v42 }
0x1241   :  { %1026 = vrot.lane.b32.xlu1 %v1024_v43, %s3286_s15 }
0x12b3   :  { %v1027_v45 = vpop.permute.xlu1 %1026 }
0x12b4   :  { %v3589_v46 = vadd.f32 %v1027_v45, %v1019_v44 }
0x12b6   :  { %3037 = vtanh.f32 %v3589_v46 }
0x12c0   :  { %v3038_v47 = vpop.eup %3037 }
0x12c1   :  { %1032 = vrot.lane.b32.xlu0 %v3038_v47, %s3286_s15 }
0x1333   :  { %v1033_v54 = vpop.permute.xlu0 %1032 }
0x1334   :  { %v1035_v55 = vmul.f32 %v3036_v41, %v1033_v54 }
0x1336   :  { %1037 = vrot.lane.b32.xlu1 %v1035_v55, %s3287_s4 }
0x13a8   :  { %v1038_v56 = vpop.permute.xlu1 %1037 }
0x13a9   :  { %1041 = vst.msk [vmem:[#allocation3 + $0x30] sm:$0xff] %vm284_vm2, %v1038_v56  ;;  %2672 = vmatmul.mubr.msk.f32.vlgmr.msra.gmra.mrb[8].mxu1 %vm284_vm2, %v1038_v56 }
0x13aa   :  { %2891 = vmatpush3.bf16.msra.mxu1 %v3599_v50  ;;  %2702 = vmatprep.mubr.msk.f32.mxu1 %vm3284_vm1, %v3285_v12 }
0x13ab   :  { %2892 = vmatprep.subr.bf16.mxu1 %v3283_v9 }
0x13ae   :  { %2894 = vmatpush3.bf16.msra.mxu1 %v3609_v53 }
0x13af   :  { %2895 = vmatprep.subr.bf16.mxu1 %v3283_v9 }
0x13b0   :  { %v1157_v57 = vld [vmem:[#allocation3 + $0x30] sm:$0xff] }
0x13b1   :  { %2703 = vmatmul.mubr.f32.vlgmr.msra.gmra.mrb[10].mxu1 %v3285_v12  ;;  %2691 = vmatprep.mubr.msk.f32.mxu0 %vm284_vm2, %v1157_v57 }
0x13b2   :  { %2897 = vmatpush3.bf16.msra.mxu1 %v3599_v50  ;;  %2713 = vmatprep.mubr.msk.f32.mxu1 %vm3284_vm1, %v3285_v12 }
0x13b3   :  { %2898 = vmatprep.subr.bf16.mxu1 %v3283_v9 }
0x13b6   :  { %2900 = vmatpush3.bf16.msra.mxu1 %v3609_v53 }
0x13b7   :  { %2907 = vmatprep.subr.bf16.mxu1 %v3283_v9 }
0x147c   :  { %v1116_v59 = vpop.f32.mrb[8].mxu1 }
0x147d   :  { %v1120_v60 = vadd.f32 %v1116_v59, %v268_v58  ;;  %v2673_v61 = vpop.f32.mrb[9].mxu1 }
0x147f   :  { %v2417_v17 = vmul.f32 -1.442695, %v1120_v60 }
0x1484   :  { %v1378_v63 = vpop.f32.mrb[10].mxu1 }
0x1485   :  { %v1382_v0 = vadd.f32 %v1378_v63, %v1261_v62  ;;  %v2704_v1 = vpop.f32.mrb[11].mxu1 }
0x1487   :  { %3039 = vtanh.f32 %v1382_v0  ;;  %v2427_v2 = vmul.f32 -1.442695, %v1382_v0 }
0x1489   :  { %3041 = vpow2.f32 %v2427_v2 }
0x1491   :  { %v3040_v11 = vpop.eup %3039 }
0x1492   :  { %1392 = vrot.lane.b32.xlu0 %v3040_v11, %s3286_s15 }
0x1493   :  { %v3042_v15 = vpop.eup %3041 }
0x1494   :  { %v1386_v19 = vadd.f32 1.0, %v3042_v15 }
0x1496   :  { %3043 = vrcp.f32 %v1386_v19 }
0x14a0   :  { %v3044_v3 = vpop.eup %3043 }
0x14a1   :  { %v1390_v7 = vmul.f32 0.0, %v3044_v3 }
0x1504   :  { %v1393_v4 = vpop.permute.xlu0 %1392 }
0x1505   :  { %v1395_v5 = vmul.f32 %v3044_v3, %v1393_v4 }
0x1507   :  { %1397 = vrot.lane.b32.xlu1 %v1395_v5, %s3286_s15 }
0x1579   :  { %v1398_v8 = vpop.permute.xlu1 %1397 }
0x157a   :  { %v1400_v10 = vadd.f32 %v1398_v8, %v1390_v7 }
0x157c   :  { %3045 = vtanh.f32 %v1400_v10 }
0x157d   :  { %3047 = vtanh.f32 %v1120_v60  ;;  %v1271_v60 = vadd.f32 %v3635_v6, %v3581_v36 }
0x157e   :  { %3049 = vpow2.f32 %v2417_v17 }
0x1586   :  { %v3046_v13 = vpop.eup %3045 }
0x1587   :  { %1403 = vrot.lane.b32.xlu0 %v3046_v13, %s3286_s15  ;;  %v3048_v14 = vpop.eup %3047 }
0x1588   :  { %v3050_v18 = vpop.eup %3049 }
0x1589   :  { %v1124_v21 = vadd.f32 1.0, %v3050_v18 }
0x158b   :  { %1130 = vrot.lane.b32.xlu0 %v3048_v14, %s3286_s15  ;;  %3051 = vrcp.f32 %v1124_v21  ;;  %v1276_v14 = vadd.f32 %v3579_v16, %v3635_v6 }
0x1595   :  { %v3052_v24 = vpop.eup %3051 }
0x1596   :  { %v1128_v28 = vmul.f32 %v3052_v24, %v3589_v46 }
0x15f9   :  { %v1404_v22 = vpop.permute.xlu0 %1403 }
0x15fa   :  { %v1406_v23 = vmul.f32 %v3044_v3, %v1404_v22 }
0x15fc   :  { %1409 = vrot.lane.b32.xlu1 %v1406_v23, %s3287_s4 }
0x15fd   :  { %v1131_v25 = vpop.permute.xlu0 %1130 }
0x15fe   :  { %v1133_v26 = vmul.f32 %v3052_v24, %v1131_v25 }
0x1600   :  { %1135 = vrot.lane.b32.xlu0 %v1133_v26, %s3286_s15 }
0x166e   :  { %v1410_v27 = vpop.permute.xlu1 %1409 }
0x166f   :  { %2714 = vmatmul.mubr.msk.f32.vlgmr.msra.gmra.mrb[12].mxu1 %vm284_vm2, %v1410_v27 }
0x1670   :  { %2909 = vmatpush3.bf16.msra.mxu1 %v3599_v50  ;;  %2735 = vmatprep.mubr.msk.f32.mxu1 %vm3284_vm1, %v3285_v12 }
0x1671   :  { %2910 = vmatprep.subr.bf16.mxu1 %v3283_v9 }
0x1672   :  { %v1136_v29 = vpop.permute.xlu0 %1135 }
0x1673   :  { %v1138_v30 = vadd.f32 %v1136_v29, %v1128_v28 }
0x1674   :  { %2912 = vmatpush3.bf16.msra.mxu1 %v3609_v53 }
0x1675   :  { %3053 = vtanh.f32 %v1138_v30  ;;  %2919 = vmatprep.subr.bf16.mxu1 %v3283_v9 }
0x167f   :  { %v3054_v31 = vpop.eup %3053 }
0x1680   :  { %1141 = vrot.lane.b32.xlu0 %v3054_v31, %s3286_s15 }
0x16f2   :  { %v1142_v32 = vpop.permute.xlu0 %1141 }
0x16f3   :  { %v1144_v34 = vmul.f32 %v3052_v24, %v1142_v32 }
0x16f5   :  { %1146 = vrot.lane.b32.xlu0 %v1144_v34, %s3287_s4 }
0x1742   :  { %v1479_v39 = vpop.f32.mrb[12].mxu1 }
0x1743   :  { %v1483_v20 = vadd.f32 %v1479_v39, %v1266_v35  ;;  %v2715_v40 = vpop.f32.mrb[13].mxu1  ;;  %v1281_v39 = vadd.f32 %v3635_v6, %v3586_v38 }
0x1745   :  { %3055 = vtanh.f32 %v1483_v20  ;;  %v2429_v44 = vmul.f32 -1.442695, %v1483_v20 }
0x1747   :  { %3057 = vpow2.f32 %v2429_v44 }
0x174f   :  { %v3056_v41 = vpop.eup %3055 }
0x1750   :  { %1493 = vrot.lane.b32.xlu1 %v3056_v41, %s3286_s15 }
0x1751   :  { %v3058_v45 = vpop.eup %3057 }
0x1752   :  { %v1487_v33 = vadd.f32 1.0, %v3058_v45 }
0x1754   :  { %3059 = vrcp.f32 %v1487_v33 }
0x175e   :  { %v3060_v46 = vpop.eup %3059 }
0x175f   :  { %v1491_v49 = vmul.f32 %v3060_v46, %v1400_v10 }
0x1767   :  { %v1147_v42 = vpop.permute.xlu0 %1146 }
0x1768   :  { %1150 = vst.msk [vmem:[#allocation3 + $0x38] sm:$0xff] %vm284_vm2, %v1147_v42 }
0x176f   :  { %v1158_v43 = vld [vmem:[#allocation3 + $0x38] sm:$0xff] }
0x1770   :  { %2692 = vmatmul.mubr.msk.f32.gmra.mrb[20].mxu0 %vm284_vm2, %v1158_v43 }
0x1771   :  { %2724 = vmatprep.mubr.msk.f32.mxu0 %vm3284_vm1, %v3285_v12 }
0x17c2   :  { %v1494_v47 = vpop.permute.xlu1 %1493 }
0x17c3   :  { %v1496_v48 = vmul.f32 %v3060_v46, %v1494_v47 }
0x17c5   :  { %1498 = vrot.lane.b32.xlu1 %v1496_v48, %s3286_s15 }
0x1837   :  { %v1499_v51 = vpop.permute.xlu1 %1498 }
0x1838   :  { %v1501_v52 = vadd.f32 %v1499_v51, %v1491_v49 }
0x183a   :  { %3061 = vtanh.f32 %v1501_v52 }
0x1843   :  { %v3662_v54 = vpop.f32.mrb[20].mxu0 }
0x1844   :  { %v3062_v55 = vpop.eup %3061  ;;  %v3664_v56 = vpop.f32.mrb[21].mxu0 }
0x1845   :  { %1504 = vrot.lane.b32.xlu1 %v3062_v55, %s3286_s15 }
0x18b7   :  { %v1505_v57 = vpop.permute.xlu1 %1504 }
0x18b8   :  { %v1507_v58 = vmul.f32 %v3060_v46, %v1505_v57 }
0x18ba   :  { %1510 = vrot.lane.b32.xlu1 %v1507_v58, %s3287_s4  ;;  %v1286_v58 = vadd.f32 %v3584_v37, %v3635_v6 }
0x192c   :  { %v1511_v59 = vpop.permute.xlu1 %1510 }
0x192d   :  { %2725 = vmatmul.mubr.msk.f32.vlgmr.msra.gmra.mrb[22].mxu0 %vm284_vm2, %v1511_v59 }
0x192e   :  { %2915 = vmatpush3.bf16.msra.mxu0 %v3599_v50  ;;  %2746 = vmatprep.mubr.msk.f32.mxu0 %vm3284_vm1, %v3285_v12 }
0x192f   :  { %2916 = vmatprep.subr.bf16.mxu0 %v3283_v9 }
0x1932   :  { %2918 = vmatpush3.bf16.msra.mxu0 %v3609_v53 }
0x1933   :  { %2925 = vmatprep.subr.bf16.mxu0 %v3283_v9 }
0x1a00   :  { %v1580_v61 = vpop.f32.mrb[22].mxu0 }
0x1a01   :  { %v1584_v62 = vadd.f32 %v1580_v61, %v1271_v60  ;;  %v2726_v63 = vpop.f32.mrb[23].mxu0 }
0x1a03   :  { %3063 = vtanh.f32 %v1584_v62  ;;  %v2431_v1 = vmul.f32 -1.442695, %v1584_v62 }
0x1a05   :  { %3065 = vpow2.f32 %v2431_v1 }
0x1a0d   :  { %v3064_v0 = vpop.eup %3063 }
0x1a0e   :  { %1594 = vrot.lane.b32.xlu0 %v3064_v0, %s3286_s15 }
0x1a0f   :  { %v3066_v11 = vpop.eup %3065 }
0x1a10   :  { %v1588_v2 = vadd.f32 1.0, %v3066_v11 }
0x1a12   :  { %3067 = vrcp.f32 %v1588_v2 }
0x1a1c   :  { %v3068_v15 = vpop.eup %3067 }
0x1a1d   :  { %v1592_v4 = vmul.f32 %v3068_v15, %v1501_v52 }
0x1a80   :  { %v1595_v19 = vpop.permute.xlu0 %1594 }
0x1a81   :  { %v1597_v3 = vmul.f32 %v3068_v15, %v1595_v19 }
0x1a83   :  { %1599 = vrot.lane.b32.xlu1 %v1597_v3, %s3286_s15 }
0x1af5   :  { %v1600_v5 = vpop.permute.xlu1 %1599 }
0x1af6   :  { %v1602_v36 = vadd.f32 %v1600_v5, %v1592_v4 }
0x1af8   :  { %3069 = vtanh.f32 %v1602_v36 }
0x1b02   :  { %v3070_v7 = vpop.eup %3069 }
0x1b03   :  { %1605 = vrot.lane.b32.xlu0 %v3070_v7, %s3286_s15 }
0x1b75   :  { %v1606_v8 = vpop.permute.xlu0 %1605 }
0x1b76   :  { %v1608_v10 = vmul.f32 %v3068_v15, %v1606_v8 }
0x1b78   :  { %1611 = vrot.lane.b32.xlu1 %v1608_v10, %s3287_s4 }
0x1bea   :  { %v1612_v13 = vpop.permute.xlu1 %1611 }
0x1beb   :  { %2736 = vmatmul.mubr.msk.f32.vlgmr.msra.gmra.mrb[14].mxu1 %vm284_vm2, %v1612_v13 }
0x1bec   :  { %2921 = vmatpush3.bf16.msra.mxu1 %v3599_v50  ;;  %2757 = vmatprep.mubr.msk.f32.mxu1 %vm3284_vm1, %v3285_v12 }
0x1bed   :  { %2922 = vmatprep.subr.bf16.mxu1 %v3283_v9 }
0x1bf0   :  { %2924 = vmatpush3.bf16.msra.mxu1 %v3609_v53 }
0x1bf1   :  { %2931 = vmatprep.subr.bf16.mxu1 %v3283_v9 }
0x1cbe   :  { %v1681_v17 = vpop.f32.mrb[14].mxu1 }
0x1cbf   :  { %v1685_v18 = vadd.f32 %v1681_v17, %v1276_v14  ;;  %v2737_v21 = vpop.f32.mrb[15].mxu1 }
0x1cc1   :  { %3071 = vtanh.f32 %v1685_v18  ;;  %v2433_v23 = vmul.f32 -1.442695, %v1685_v18 }
0x1cc3   :  { %3073 = vpow2.f32 %v2433_v23 }
0x1ccb   :  { %v3072_v22 = vpop.eup %3071 }
0x1ccc   :  { %1695 = vrot.lane.b32.xlu0 %v3072_v22, %s3286_s15 }
0x1ccd   :  { %v3074_v24 = vpop.eup %3073 }
0x1cce   :  { %v1689_v25 = vadd.f32 1.0, %v3074_v24 }
0x1cd0   :  { %3075 = vrcp.f32 %v1689_v25 }
0x1cda   :  { %v3076_v26 = vpop.eup %3075 }
0x1cdb   :  { %v1693_v29 = vmul.f32 %v3076_v26, %v1602_v36  ;;  %v1291_v36 = vadd.f32 %v3635_v6, %v3664_v56 }
0x1d3e   :  { %v1696_v27 = vpop.permute.xlu0 %1695 }
0x1d3f   :  { %v1698_v28 = vmul.f32 %v3076_v26, %v1696_v27 }
0x1d41   :  { %1700 = vrot.lane.b32.xlu1 %v1698_v28, %s3286_s15 }
0x1db3   :  { %v1701_v30 = vpop.permute.xlu1 %1700 }
0x1db4   :  { %v1703_v16 = vadd.f32 %v1701_v30, %v1693_v29  ;;  %v1296_v30 = vadd.f32 %v3662_v54, %v3635_v6  ;;  %v2119_v54 = vld [vmem:[%s3783_s9] sm:$0xf] }
0x1db6   :  { %3077 = vtanh.f32 %v1703_v16 }
0x1dc0   :  { %v3078_v31 = vpop.eup %3077 }
0x1dc1   :  { %1706 = vrot.lane.b32.xlu0 %v3078_v31, %s3286_s15 }
0x1e33   :  { %v1707_v32 = vpop.permute.xlu0 %1706 }
0x1e34   :  { %v1709_v34 = vmul.f32 %v3076_v26, %v1707_v32 }
0x1e36   :  { %1712 = vrot.lane.b32.xlu1 %v1709_v34, %s3287_s4 }
0x1ea8   :  { %v1713_v35 = vpop.permute.xlu1 %1712 }
0x1ea9   :  { %2747 = vmatmul.mubr.msk.f32.vlgmr.msra.gmra.mrb[24].mxu0 %vm284_vm2, %v1713_v35 }
0x1eaa   :  { %2927 = vmatpush3.bf16.msra.mxu0 %v3599_v50  ;;  %2768 = vmatprep.mubr.msk.f32.mxu0 %vm3284_vm1, %v3285_v12 }
0x1eab   :  { %2928 = vmatprep.subr.bf16.mxu0 %v3283_v9 }
0x1eae   :  { %2930 = vmatpush3.bf16.msra.mxu0 %v3609_v53 }
0x1eaf   :  { %2782 = vmatprep.subr.mxu0 %v3285_v12 }
0x1f7c   :  { %v1782_v20 = vpop.f32.mrb[24].mxu0 }
0x1f7d   :  { %v1786_v40 = vadd.f32 %v1782_v20, %v1281_v39  ;;  %v2748_v41 = vpop.f32.mrb[25].mxu0 }
0x1f7f   :  { %3079 = vtanh.f32 %v1786_v40  ;;  %v2435_v43 = vmul.f32 -1.442695, %v1786_v40 }
0x1f81   :  { %3081 = vpow2.f32 %v2435_v43 }
0x1f89   :  { %v3080_v42 = vpop.eup %3079 }
0x1f8a   :  { %1796 = vrot.lane.b32.xlu0 %v3080_v42, %s3286_s15 }
0x1f8b   :  { %v3082_v44 = vpop.eup %3081 }
0x1f8c   :  { %v1790_v45 = vadd.f32 1.0, %v3082_v44 }
0x1f8e   :  { %3083 = vrcp.f32 %v1790_v45  ;;  %v2114_v45 = vld [vmem:[%s3775_s1] sm:$0xff] }
0x1f98   :  { %v3084_v33 = vpop.eup %3083 }
0x1f99   :  { %v1794_v48 = vmul.f32 %v3084_v33, %v1703_v16 }
0x1ffc   :  { %v1797_v46 = vpop.permute.xlu0 %1796 }
0x1ffd   :  { %v1799_v47 = vmul.f32 %v3084_v33, %v1797_v46  ;;  %v2116_v46 = vld [vmem:[#allocation12 + $0x8] sm:$0xff] }
0x1fff   :  { %1801 = vrot.lane.b32.xlu1 %v1799_v47, %s3286_s15  ;;  %v2117_v47 = vld [vmem:[#allocation12 + $0x10] sm:$0xff] }
0x2071   :  { %v1802_v49 = vpop.permute.xlu1 %1801 }
0x2072   :  { %v1804_v38 = vadd.f32 %v1802_v49, %v1794_v48  ;;  %v2118_v48 = vld [vmem:[#allocation12 + $0x18] sm:$0xff] }
0x2074   :  { %3085 = vtanh.f32 %v1804_v38 }
0x207e   :  { %v3086_v51 = vpop.eup %3085 }
0x207f   :  { %1807 = vrot.lane.b32.xlu0 %v3086_v51, %s3286_s15 }
0x20f1   :  { %v1808_v52 = vpop.permute.xlu0 %1807 }
0x20f2   :  { %v1810_v55 = vmul.f32 %v3084_v33, %v1808_v52  ;;  %v2115_v33 = vld [vmem:[#allocation12] sm:$0xff] }
0x20f3   :  { %v2938_v49 = vpack.c.bf16 %v2116_v46, %v2115_v33  ;;  %v2282_v52 = vld [vmem:[#allocation13] sm:$0xff] }
0x20f4   :  { %1813 = vrot.lane.b32.xlu1 %v1810_v55, %s3287_s4  ;;  %v2283_v55 = vld [vmem:[#allocation13 + $0x8] sm:$0xff] }
0x2166   :  { %v1814_v57 = vpop.permute.xlu1 %1813 }
0x2167   :  { %2758 = vmatmul.mubr.msk.f32.vlgmr.msra.gmra.mrb[16].mxu1 %vm284_vm2, %v1814_v57  ;;  %v2284_v57 = vld [vmem:[#allocation13 + $0x10] sm:$0xff] }
0x2168   :  { %2933 = vmatpush3.bf16.msra.mxu1 %v3599_v50  ;;  %2779 = vmatprep.mubr.msk.f32.mxu1 %vm3284_vm1, %v3285_v12 }
0x2169   :  { %2934 = vmatprep.subr.bf16.mxu1 %v3283_v9 }
0x216c   :  { %2936 = vmatpush3.bf16.msra.mxu1 %v3609_v53 }
0x216d   :  { %2943 = vmatprep.subr.bf16.mxu1 %v3283_v9 }
0x223a   :  { %v1883_v59 = vpop.f32.mrb[16].mxu1 }
0x223b   :  { %v1887_v60 = vadd.f32 %v1883_v59, %v1286_v58  ;;  %v2759_v61 = vpop.f32.mrb[17].mxu1  ;;  %v2944_v58 = vpack.c.bf16 %v2283_v55, %v2282_v52  ;;  %v2285_v59 = vld [vmem:[#allocation13 + $0x18] sm:$0xff] }
0x223c   :  { %v2286_v61 = vld [vmem:[#allocation13 + $0x20] sm:$0xff] }
0x223d   :  { %3087 = vtanh.f32 %v1887_v60  ;;  %v2437_v50 = vmul.f32 -1.442695, %v1887_v60  ;;  %v2947_v60 = vpack.c.bf16 %v2285_v59, %v2284_v57 }
0x223f   :  { %3089 = vpow2.f32 %v2437_v50  ;;  %v2288_v50 = vld [vmem:[#allocation13 + $0x30] sm:$0xff] }
0x2247   :  { %v3088_v62 = vpop.eup %3087 }
0x2248   :  { %1897 = vrot.lane.b32.xlu0 %v3088_v62, %s3286_s15  ;;  %v2287_v62 = vld [vmem:[#allocation13 + $0x28] sm:$0xff] }
0x2249   :  { %v3090_v63 = vpop.eup %3089 }
0x224a   :  { %v1891_v0 = vadd.f32 1.0, %v3090_v63  ;;  %v2289_v63 = vld [vmem:[#allocation13 + $0x38] sm:$0xff] }
0x224c   :  { %3091 = vrcp.f32 %v1891_v0 }
0x2256   :  { %v3092_v1 = vpop.eup %3091 }
0x2257   :  { %v1895_v2 = vmul.f32 %v3092_v1, %v1804_v38  ;;  %v2941_v38 = vpack.c.bf16 %v2118_v48, %v2117_v47 }
0x22ba   :  { %v1898_v11 = vpop.permute.xlu0 %1897 }
0x22bb   :  { %v1900_v53 = vmul.f32 %v3092_v1, %v1898_v11  ;;  %v2953_v11 = vpack.c.bf16 %v2289_v63, %v2288_v50 }
0x22bd   :  { %1902 = vrot.lane.b32.xlu1 %v1900_v53, %s3286_s15  ;;  %v2290_v53 = vld [vmem:[#allocation13 + $0x40] sm:$0xff] }
0x232f   :  { %v1903_v15 = vpop.permute.xlu1 %1902 }
0x2330   :  { %v1905_v37 = vadd.f32 %v1903_v15, %v1895_v2  ;;  %v2291_v2 = vld [vmem:[#allocation13 + $0x48] sm:$0xff] }
0x2331   :  { %v2956_v15 = vpack.c.bf16 %v2291_v2, %v2290_v53 }
0x2332   :  { %3093 = vtanh.f32 %v1905_v37 }
0x233c   :  { %v3094_v19 = vpop.eup %3093 }
0x233d   :  { %1908 = vrot.lane.b32.xlu0 %v3094_v19, %s3286_s15  ;;  %v2293_v19 = vld [vmem:[#allocation13 + $0x58] sm:$0xff] }
0x23af   :  { %v1909_v3 = vpop.permute.xlu0 %1908 }
0x23b0   :  { %v1911_v4 = vmul.f32 %v3092_v1, %v1909_v3 }
0x23b2   :  { %1914 = vrot.lane.b32.xlu1 %v1911_v4, %s3287_s4 }
0x2424   :  { %v1915_v5 = vpop.permute.xlu1 %1914 }
0x2425   :  { %2769 = vmatmul.mubr.msk.f32.vlgmr.msra.gmra.mrb[26].mxu0 %vm284_vm2, %v1915_v5 }
0x2426   :  { %2784 = vmatprep.mubr.msk.f32.mxu0 %vm3284_vm1, %v3285_v12  ;;  %2783 = vmatpush3.msk.msra.mxu0 %vm2124_vm3, %v2119_v54 }
0x2427   :  { %2937 = vmatprep.subr.bf16.mxu0 %v3283_v9 }
0x2429   :  { %2785 = vmatmul.mubr.msk.f32.vlgmr.msra.gmra.mrb[28].mxu0 %vm2120_vm4, %v2114_v45 }
0x242a   :  { %2795 = vmatprep.mubr.msk.f32.mxu0 %vm3284_vm1, %v3285_v12  ;;  %2939 = vmatpush3.bf16.msra.mxu0 %v2938_v49 }
0x242b   :  { %2940 = vmatprep.subr.bf16.mxu0 %v3283_v9 }
0x242e   :  { %2942 = vmatpush3.bf16.msra.mxu0 %v2941_v38 }
0x24f8   :  { %v1984_v7 = vpop.f32.mrb[26].mxu0 }
0x24f9   :  { %v1988_v8 = vadd.f32 %v1984_v7, %v1291_v36  ;;  %v2770_v10 = vpop.f32.mrb[27].mxu0  ;;  %v2294_v7 = vld [vmem:[#allocation13 + $0x60] sm:$0xff] }
0x24fb   :  { %3095 = vtanh.f32 %v1988_v8  ;;  %v2439_v14 = vmul.f32 -1.442695, %v1988_v8  ;;  %v2295_v8 = vld [vmem:[#allocation13 + $0x68] sm:$0xff] }
0x24fc   :  { %v2194_v4 = vpop.f32.mrb[28].mxu0  ;;  %v2962_v10 = vpack.c.bf16 %v2295_v8, %v2294_v7 }
0x24fd   :  { %3097 = vpow2.f32 %v2439_v14  ;;  %v2786_v5 = vpop.f32.mrb[29].mxu0  ;;  %v2297_v14 = vld [vmem:[#allocation13 + $0x78] sm:$0xff] }
0x2505   :  { %v3096_v13 = vpop.eup %3095 }
0x2506   :  { %1998 = vrot.lane.b32.xlu0 %v3096_v13, %s3286_s15  ;;  %v2296_v13 = vld [vmem:[#allocation13 + $0x70] sm:$0xff] }
0x2507   :  { %v3098_v17 = vpop.eup %3097 }
0x2508   :  { %v1992_v18 = vadd.f32 1.0, %v3098_v17  ;;  %v2965_v17 = vpack.c.bf16 %v2297_v14, %v2296_v13 }
0x250a   :  { %3099 = vrcp.f32 %v1992_v18 }
0x2514   :  { %v3100_v21 = vpop.eup %3099 }
0x2515   :  { %v1996_v24 = vmul.f32 %v3100_v21, %v1905_v37  ;;  %v2292_v37 = vld [vmem:[#allocation13 + $0x50] sm:$0xff] }
0x2516   :  { %v2959_v3 = vpack.c.bf16 %v2293_v19, %v2292_v37 }
0x2578   :  { %v1999_v22 = vpop.permute.xlu0 %1998 }
0x2579   :  { %v2001_v23 = vmul.f32 %v3100_v21, %v1999_v22 }
0x257b   :  { %2003 = vrot.lane.b32.xlu1 %v2001_v23, %s3286_s15 }
0x25ed   :  { %v2004_v25 = vpop.permute.xlu1 %2003 }
0x25ee   :  { %v2006_v56 = vadd.f32 %v2004_v25, %v1996_v24 }
0x25f0   :  { %3101 = vtanh.f32 %v2006_v56 }
0x25fa   :  { %v3102_v26 = vpop.eup %3101 }
0x25fb   :  { %2009 = vrot.lane.b32.xlu0 %v3102_v26, %s3286_s15 }
0x266d   :  { %v2010_v27 = vpop.permute.xlu0 %2009 }
0x266e   :  { %v2012_v28 = vmul.f32 %v3100_v21, %v2010_v27  ;;  %v2445_v21 = vld [vmem:[%s3784_s10] ss:$0 sm:$0xff] }
0x2670   :  { %2015 = vrot.lane.b32.xlu1 %v2012_v28, %s3287_s4 }
0x26e2   :  { %v2016_v29 = vpop.permute.xlu1 %2015 }
0x26e3   :  { %2780 = vmatmul.mubr.msk.f32.vlgmr.msra.gmra.mrb[18].mxu1 %vm284_vm2, %v2016_v29 }
0x26e4   :  { %2830 = vmatprep.mubr.msk.f32.mxu1 %vm3284_vm1, %v3285_v12  ;;  %2945 = vmatpush3.bf16.msra.mxu1 %v2944_v58  ;;  %v2950_v12 = vpack.c.bf16 %v2287_v62, %v2286_v61 }
0x26e5   :  { %2946 = vmatprep.subr.bf16.mxu1 %v3283_v9 }
0x26e8   :  { %2948 = vmatpush3.bf16.msra.mxu1 %v2947_v60 }
0x26e9   :  { %2949 = vmatprep.subr.bf16.mxu1 %v3283_v9 }
0x26ec   :  { %2951 = vmatpush3.bf16.msra.mxu1 %v2950_v12 }
0x26ed   :  { %2952 = vmatprep.subr.bf16.mxu1 %v3283_v9 }
0x26f0   :  { %2954 = vmatpush3.bf16.msra.mxu1 %v2953_v11 }
0x26f1   :  { %2955 = vmatprep.subr.bf16.mxu1 %v3283_v9 }
0x26f4   :  { %2957 = vmatpush3.bf16.msra.mxu1 %v2956_v15 }
0x26f5   :  { %2958 = vmatprep.subr.bf16.mxu1 %v3283_v9 }
0x26f8   :  { %2960 = vmatpush3.bf16.msra.mxu1 %v2959_v3 }
0x26f9   :  { %2961 = vmatprep.subr.bf16.mxu1 %v3283_v9 }
0x26fc   :  { %2963 = vmatpush3.bf16.msra.mxu1 %v2962_v10 }
0x26fd   :  { %2964 = vmatprep.subr.bf16.mxu1 %v3283_v9 }
0x2700   :  { %2966 = vmatpush3.bf16.msra.mxu1 %v2965_v17 }
0x27b6   :  { %v2085_v16 = vpop.f32.mrb[18].mxu1 }
0x27b7   :  { %v2089_v31 = vadd.f32 %v2085_v16, %v1296_v30  ;;  %v2781_v32 = vpop.f32.mrb[19].mxu1 }
0x27b9   :  { %3103 = vtanh.f32 %v2089_v31  ;;  %v2441_v35 = vmul.f32 -1.442695, %v2089_v31 }
0x27bb   :  { %3105 = vpow2.f32 %v2441_v35 }
0x27c3   :  { %v3104_v34 = vpop.eup %3103 }
0x27c4   :  { %2099 = vrot.lane.b32.xlu0 %v3104_v34, %s3286_s15 }
0x27c5   :  { %v3106_v39 = vpop.eup %3105 }
0x27c6   :  { %v2093_v20 = vadd.f32 1.0, %v3106_v39 }
0x27c8   :  { %3107 = vrcp.f32 %v2093_v20 }
0x27d2   :  { %v3108_v40 = vpop.eup %3107 }
0x27d3   :  { %v2097_v43 = vmul.f32 %v3108_v40, %v2006_v56  ;;  %v2446_v56 = vld [vmem:[%s3786_s12] ss:$0 sm:$0xff] }
0x2836   :  { %v2100_v41 = vpop.permute.xlu0 %2099 }
0x2837   :  { %v2102_v42 = vmul.f32 %v3108_v40, %v2100_v41 }
0x2839   :  { %2104 = vrot.lane.b32.xlu1 %v2102_v42, %s3286_s15 }
0x28ab   :  { %v2105_v44 = vpop.permute.xlu1 %2104 }
0x28ac   :  { %v2107_v6 = vadd.f32 %v2105_v44, %v2097_v43 }
0x28ae   :  { %3109 = vtanh.f32 %v2107_v6 }
0x28b8   :  { %v3110_v51 = vpop.eup %3109 }
0x28b9   :  { %2110 = vrot.lane.b32.xlu0 %v3110_v51, %s3286_s15 }
0x292b   :  { %v2111_v0 = vpop.permute.xlu0 %2110 }
0x292c   :  { %v2113_v1 = vmul.f32 %v3108_v40, %v2111_v0 }
0x292e   :  { %2199 = vrot.lane.b32.xlu1 %v2113_v1, %s3287_s4 }
0x29a0   :  { %v2200_v36 = vpop.permute.xlu1 %2199 }
0x29a1   :  { %2796 = vmatmul.mubr.msk.f32.vlgmr.msra.gmra.mrb[30].mxu0 %vm284_vm2, %v2200_v36 }
0x2a74   :  { %v2269_v18 = vpop.f32.mrb[30].mxu0 }
0x2a75   :  { %v2270_v22 = vadd.f32 %v2269_v18, %v2194_v4  ;;  %v2797_v23 = vpop.f32.mrb[31].mxu0 }
0x2a77   :  { %v2280_v24 = vadd.f32 %v2445_v21, %v2270_v22 }
0x2a79   :  { %v2281_v25 = vmax.f32 %v2280_v24, 0.0 }
0x2a7b   :  { %2831 = vmatmul.mubr.f32.vlgmr.msra.gmra.mrb[20].mxu1 %v2281_v25 }
0x2b4e   :  { %v2371_v9 = vpop.f32.mrb[20].mxu1 }
0x2b4f   :  { %v2372_v26 = vadd.f32 %v2446_v56, %v2371_v9  ;;  %v2832_v27 = vpop.f32.mrb[21].mxu1 }
0x2b51   :  { %2375 = vst [vmem:[#allocation15] sm:$0xff] %v2372_v26 }
0x2b52   :  { %3254 = shalt.err (!%p3251_p10)
}
0x2b53   :  { %s3255_s8 = scalar_lea.hbm %s3787_s13, 128 }
0x2b54   :  { %p3256_p11 = scmp.ne.s32.totalorder %s3787_s13, %s3255_s8  ;;  %p3259_p12 = scmp.lt.u32.totalorder %s3255_s8, %s3787_s13 }
0x2b56   :  { %p3261_p13 = pnand %p3259_p12, %p3256_p11 }
0x2b58   :  { %3264 = shalt.err (!%p3261_p13)
}
0x2b59   :  { %2385 = dma.vmem_to_hbm [thread:$0]  %s2383_s25, 128, %s3787_s13, [#allocation6]  }
0x2b5a   :  { %3273 = dma.done.wait [#allocation6], 128  }
0x2b5b   :  { %3274 = vsyncadd [#allocation6], 4294967168 }
0x2b5c   :  { %2389 = vsyncpa [#allocation5], 1 }
0x2b5d   :  { %2390 = vsyncpa [#allocation8], 1 }
0x2b5e   :  { %2391 = vsyncpa [#allocation11], 1 }
0x2b5f   :  { %2392 = vsyncpa [#allocation14], 1 }
0x2b60   :  { %2393 = vsyncpa [#allocation6], 1 }

</bundles_post_ra>
